<compile_context>
chip_gen: v5e
topology: v5e:2x2
jax: 0.10.0
libtpu: 0.0.40
codegen_flags: <defaults>
</compile_context>

<pallas_src>
import functools

import jax
import jax.numpy as jnp
from jax.experimental import pallas as pl
from jax.experimental.pallas import tpu as pltpu


# ---------------------------------------------------------------------------
# Single fused kernel: multi-layer GRU recurrence + ReLU + FC + LogSoftmax.
# ---------------------------------------------------------------------------
def _grunet_kernel(x2d_ref, h0_ref, wih0_ref, wihr_ref, whh_ref,
                   brz_ref, bihn_ref, bhhn_ref, fcw_ref, fcb_ref,
                   logits_ref, hout_ref, top_scratch, *, seq_len, batch):
    T, B = seq_len, batch
    L, _, H = h0_ref.shape

    wih0 = wih0_ref[...]                     # (In, 3H)   layer-0 input weights (pre-T)
    whh = whh_ref[...]                       # (L, H, 3H) hidden weights (pre-T)
    brz = brz_ref[...]                       # (L, 1, 2H) b_ih[:2H] + b_hh[:2H]
    bihn = bihn_ref[...]                     # (L, 1, H)  b_ih[2H:]
    bhhn = bhhn_ref[...]                     # (L, 1, H)  b_hh[2H:]

    # Hoisted layer-0 input projection for ALL time steps: one MXU call.
    gi0 = jnp.dot(x2d_ref[...], wih0,
                  preferred_element_type=jnp.float32)        # (T*B, 3H)

    hs = [h0_ref[l] for l in range(L)]       # per-layer hidden state, (B, H)

    for t in range(T):                       # static unrolled time loop
        # All L hidden projections depend only on LAST step's hidden states,
        # so issue them together before the layer-serial gate math.
        gh = [jnp.dot(hs[l], whh[l], preferred_element_type=jnp.float32)
              for l in range(L)]             # each (B, 3H)

        inp = None
        for l in range(L):                   # static unrolled layer loop
            if l == 0:
                gi = gi0[t * B:(t + 1) * B, :]                         # (B, 3H)
            else:
                gi = jnp.dot(inp, wihr_ref[l - 1],
                             preferred_element_type=jnp.float32)       # (B, 3H)
            gh_l = gh[l]

            # One sigmoid pass over the contiguous [r|z] slab.
            rz = jax.nn.sigmoid(gi[:, :2 * H] + gh_l[:, :2 * H] + brz[l])
            r = rz[:, :H]
            z = rz[:, H:]
            n = jnp.tanh(gi[:, 2 * H:] + bihn[l] + r * (gh_l[:, 2 * H:] + bhhn[l]))
            h_new = (1.0 - z) * n + z * hs[l]

            hs[l] = h_new
            inp = h_new

        # PyTorch quirk: out[:, -1] with seq-major layout selects the LAST
        # BATCH element of the top layer at every time step -> rows of (T, H).
        top_scratch[pl.ds(t, 1), :] = inp[B - 1:B, :]

    # Final hidden state, written once.
    for l in range(L):
        hout_ref[l] = hs[l]

    # Fused head: ReLU -> Linear -> LogSoftmax(dim=1).
    a = jnp.maximum(top_scratch[...], 0.0)                             # (T, H)
    y = jnp.dot(a, fcw_ref[...], preferred_element_type=jnp.float32) + fcb_ref[...]
    m = jnp.max(y, axis=1, keepdims=True)
    lse = jnp.log(jnp.sum(jnp.exp(y - m), axis=1, keepdims=True)) + m
    logits_ref[...] = y - lse


def grunet_forward(packed, x, h0):
    T, B, In = x.shape
    L, _, H = h0.shape
    O = packed["fc_w_t"].shape[1]
    x2d = x.reshape(T * B, In)               # contiguous, free layout change

    full = lambda shape: pl.BlockSpec(shape, lambda i: (0,) * len(shape))

    logits, h_out = pl.pallas_call(
        functools.partial(_grunet_kernel, seq_len=T, batch=B),
        out_shape=(jax.ShapeDtypeStruct((T, O), jnp.float32),
                   jax.ShapeDtypeStruct((L, B, H), jnp.float32)),
        grid=(1,),
        in_specs=[
            full((T * B, In)),               # x, flattened (T*B, In)
            full((L, B, H)),                 # h0
            full((In, 3 * H)),               # W_ih layer0 (transposed)
            full((max(L - 1, 1), H, 3 * H)), # W_ih layers>0 (transposed)
            full((L, H, 3 * H)),             # W_hh (transposed)
            full((L, 1, 2 * H)),             # combined r/z biases
            full((L, 1, H)),                 # b_ih (n gate)
            full((L, 1, H)),                 # b_hh (n gate)
            full((H, O)),                    # fc weight (transposed)
            full((1, O)),                    # fc bias
        ],
        out_specs=(
            full((T, O)),                    # logits
            full((L, B, H)),                 # final hidden
        ),
        scratch_shapes=[pltpu.VMEM((T, H), jnp.float32)],  # top-layer rows for the head
        compiler_params=pltpu.CompilerParams(
            dimension_semantics=("arbitrary",)),
    )(x2d, h0, packed["wih0_t"], packed["wihr_t"], packed["whh_t"],
      packed["brz"], packed["bihn"], packed["bhhn"],
      packed["fc_w_t"], packed["fc_b"])
    return logits, h_out


# ---------------------------------------------------------------------------
# Parameter setup (PyTorch layout) + one-time packing into kernel-ready layout.
# ---------------------------------------------------------------------------
def init_params(key, input_size, hidden_size, output_size, num_layers):
    H = hidden_size
    stdv = 1.0 / jnp.sqrt(jnp.float32(H))
    keys = jax.random.split(key, 4 * num_layers + 2)

    def u(k, shape):
        return jax.random.uniform(k, shape, jnp.float32, -stdv, stdv)

    params = {}
    ki = 0
    for l in range(num_layers):
        in_sz = input_size if l == 0 else H
        params[f"w_ih_l{l}"] = u(keys[ki], (3 * H, in_sz)); ki += 1
        params[f"w_hh_l{l}"] = u(keys[ki], (3 * H, H)); ki += 1
        params[f"b_ih_l{l}"] = u(keys[ki], (3 * H,)); ki += 1
        params[f"b_hh_l{l}"] = u(keys[ki], (3 * H,)); ki += 1
    params["fc_w"] = u(keys[ki], (output_size, H)); ki += 1
    params["fc_b"] = u(keys[ki], (output_size,)); ki += 1
    return params


def pack_params(params, *, hidden_size, num_layers):
    """One-time re-layout: transposed / stacked weights, pre-combined r/z biases."""
    H, L = hidden_size, num_layers
    wih0_t = params["w_ih_l0"].T                                          # (In, 3H)
    if L > 1:
        wihr_t = jnp.stack([params[f"w_ih_l{l}"].T for l in range(1, L)]) # (L-1, H, 3H)
    else:
        wihr_t = jnp.zeros((1, H, 3 * H), jnp.float32)  # placeholder, never read for L==1
    whh_t = jnp.stack([params[f"w_hh_l{l}"].T for l in range(L)])         # (L, H, 3H)
    bih = jnp.stack([params[f"b_ih_l{l}"] for l in range(L)])             # (L, 3H)
    bhh = jnp.stack([params[f"b_hh_l{l}"] for l in range(L)])             # (L, 3H)
    return dict(
        wih0_t=wih0_t,
        wihr_t=wihr_t,
        whh_t=whh_t,
        brz=(bih[:, :2 * H] + bhh[:, :2 * H])[:, None, :],                # (L, 1, 2H)
        bihn=bih[:, 2 * H:][:, None, :],                                  # (L, 1, H)
        bhhn=bhh[:, 2 * H:][:, None, :],                                  # (L, 1, H)
        fc_w_t=params["fc_w"].T,                                          # (H, O)
        fc_b=params["fc_b"][None, :],                                     # (1, O)
    )


# ---------------------------------------------------------------------------
# Pure-JAX reference (same math) for a sanity check.
# ---------------------------------------------------------------------------
def grunet_reference(params, x, h, *, hidden_size, num_layers):
    H, L = hidden_size, num_layers
    T = x.shape[0]
    hs = [h[l] for l in range(L)]
    outs = []
    for t in range(T):
        inp = x[t]
        for l in range(L):
            w_ih, w_hh = params[f"w_ih_l{l}"], params[f"w_hh_l{l}"]
            b_ih, b_hh = params[f"b_ih_l{l}"], params[f"b_hh_l{l}"]
            gi = inp @ w_ih.T + b_ih
            gh = hs[l] @ w_hh.T + b_hh
            r = jax.nn.sigmoid(gi[:, :H] + gh[:, :H])
            z = jax.nn.sigmoid(gi[:, H:2 * H] + gh[:, H:2 * H])
            n = jnp.tanh(gi[:, 2 * H:] + r * gh[:, 2 * H:])
            hs[l] = (1.0 - z) * n + z * hs[l]
            inp = hs[l]
        outs.append(inp)
    out = jnp.stack(outs)                      # (T, B, H)
    last = jax.nn.relu(out[:, -1, :])          # PyTorch out[:, -1] quirk -> (T, H)
    y = last @ params["fc_w"].T + params["fc_b"]
    logits = jax.nn.log_softmax(y, axis=1)
    return logits, jnp.stack(hs)


if __name__ == "__main__":
    input_size, hidden_size, output_size, num_layers = 16, 32, 3, 3
    seq_len, batch = 8, 2

    key = jax.random.PRNGKey(0)
    kp, kx = jax.random.split(key)
    params = init_params(kp, input_size, hidden_size, output_size, num_layers)
    packed = pack_params(params, hidden_size=hidden_size, num_layers=num_layers)

    x = jax.random.normal(kx, (seq_len, batch, input_size), jnp.float32)
    h0 = jnp.zeros((num_layers, batch, hidden_size), jnp.float32)  # init_hidden

    fwd = jax.jit(grunet_forward)
    logits, h_out = jax.block_until_ready(fwd(packed, x, h0))

    ref_logits, ref_h = grunet_reference(params, x, h0,
                                         hidden_size=hidden_size,
                                         num_layers=num_layers)

    assert logits.shape == (seq_len, output_size)
    assert h_out.shape == (num_layers, batch, hidden_size)
    assert jnp.all(jnp.isfinite(logits)) and jnp.all(jnp.isfinite(h_out))
    assert jnp.allclose(logits, ref_logits, atol=1e-2, rtol=1e-2)
    assert jnp.allclose(h_out, ref_h, atol=1e-2, rtol=1e-2)

    print("KERNEL_OK")
</pallas_src>

<mosaic_0001>
module attributes {stable_mosaic.version = 11 : i64} {
  func.func @_grunet_kernel(%arg0: i32, %arg1: memref<16x16xf32, #tpu.memory_space<vmem>>, %arg2: memref<3x2x32xf32, #tpu.memory_space<vmem>>, %arg3: memref<16x96xf32, #tpu.memory_space<vmem>>, %arg4: memref<2x32x96xf32, #tpu.memory_space<vmem>>, %arg5: memref<3x32x96xf32, #tpu.memory_space<vmem>>, %arg6: memref<3x1x64xf32, #tpu.memory_space<vmem>>, %arg7: memref<3x1x32xf32, #tpu.memory_space<vmem>>, %arg8: memref<3x1x32xf32, #tpu.memory_space<vmem>>, %arg9: memref<32x3xf32, #tpu.memory_space<vmem>>, %arg10: memref<1x3xf32, #tpu.memory_space<vmem>>, %arg11: memref<8x3xf32, #tpu.memory_space<vmem>>, %arg12: memref<3x2x32xf32, #tpu.memory_space<vmem>>, %arg13: memref<8x32xf32, #tpu.memory_space<vmem>>) attributes {dimension_semantics = [#tpu.dimension_semantics<arbitrary>], iteration_bounds = array<i64: 1>, scalar_prefetch = 0 : i64, scratch_operands = 1 : i64, tpu.core_type = #tpu.core_type<tc>, window_params = [{pipeline_mode = #tpu.pipeline_mode<synchronous>, transform_indices = @transform_0, window_bounds = array<i64: 16, 16>}, {pipeline_mode = #tpu.pipeline_mode<synchronous>, transform_indices = @transform_1, window_bounds = array<i64: 3, 2, 32>}, {pipeline_mode = #tpu.pipeline_mode<synchronous>, transform_indices = @transform_2, window_bounds = array<i64: 16, 96>}, {pipeline_mode = #tpu.pipeline_mode<synchronous>, transform_indices = @transform_3, window_bounds = array<i64: 2, 32, 96>}, {pipeline_mode = #tpu.pipeline_mode<synchronous>, transform_indices = @transform_4, window_bounds = array<i64: 3, 32, 96>}, {pipeline_mode = #tpu.pipeline_mode<synchronous>, transform_indices = @transform_5, window_bounds = array<i64: 3, 1, 64>}, {pipeline_mode = #tpu.pipeline_mode<synchronous>, transform_indices = @transform_6, window_bounds = array<i64: 3, 1, 32>}, {pipeline_mode = #tpu.pipeline_mode<synchronous>, transform_indices = @transform_7, window_bounds = array<i64: 3, 1, 32>}, {pipeline_mode = #tpu.pipeline_mode<synchronous>, transform_indices = @transform_8, window_bounds = array<i64: 32, 3>}, {pipeline_mode = #tpu.pipeline_mode<synchronous>, transform_indices = @transform_9, window_bounds = array<i64: 1, 3>}, {pipeline_mode = #tpu.pipeline_mode<synchronous>, transform_indices = @transform_10, window_bounds = array<i64: 8, 3>}, {pipeline_mode = #tpu.pipeline_mode<synchronous>, transform_indices = @transform_11, window_bounds = array<i64: 3, 2, 32>}]} {
    %c0 = arith.constant 0 : index
    %c0_0 = arith.constant 0 : index
    %0 = vector.load %arg3[%c0, %c0_0] : memref<16x96xf32, #tpu.memory_space<vmem>>, vector<16x96xf32>
    %c0_1 = arith.constant 0 : index
    %c0_2 = arith.constant 0 : index
    %c0_3 = arith.constant 0 : index
    %1 = vector.load %arg5[%c0_1, %c0_2, %c0_3] : memref<3x32x96xf32, #tpu.memory_space<vmem>>, vector<3x32x96xf32>
    %c0_4 = arith.constant 0 : index
    %c0_5 = arith.constant 0 : index
    %c0_6 = arith.constant 0 : index
    %2 = vector.load %arg6[%c0_4, %c0_5, %c0_6] : memref<3x1x64xf32, #tpu.memory_space<vmem>>, vector<3x1x64xf32>
    %c0_7 = arith.constant 0 : index
    %c0_8 = arith.constant 0 : index
    %c0_9 = arith.constant 0 : index
    %3 = vector.load %arg7[%c0_7, %c0_8, %c0_9] : memref<3x1x32xf32, #tpu.memory_space<vmem>>, vector<3x1x32xf32>
    %c0_10 = arith.constant 0 : index
    %c0_11 = arith.constant 0 : index
    %c0_12 = arith.constant 0 : index
    %4 = vector.load %arg8[%c0_10, %c0_11, %c0_12] : memref<3x1x32xf32, #tpu.memory_space<vmem>>, vector<3x1x32xf32>
    %c0_13 = arith.constant 0 : index
    %c0_14 = arith.constant 0 : index
    %5 = vector.load %arg1[%c0_13, %c0_14] : memref<16x16xf32, #tpu.memory_space<vmem>>, vector<16x16xf32>
    %cst = arith.constant dense<0.000000e+00> : vector<16x96xf32>
    %6 = tpu.matmul %5, %0, %cst {dimension_numbers = #tpu.dot_dimension_numbers<[1], [0], [0], [1], [0, 0, 1, 1], [], []>} : vector<16x16xf32>, vector<16x96xf32>, vector<16x96xf32> -> vector<16x96xf32>
    %c0_15 = arith.constant 0 : index
    %c0_16 = arith.constant 0 : index
    %c0_17 = arith.constant 0 : index
    %7 = vector.load %arg2[%c0_15, %c0_16, %c0_17] : memref<3x2x32xf32, #tpu.memory_space<vmem>>, vector<1x2x32xf32>
    %8 = vector.shape_cast %7 : vector<1x2x32xf32> to vector<2x32xf32>
    %c1 = arith.constant 1 : index
    %c0_18 = arith.constant 0 : index
    %c0_19 = arith.constant 0 : index
    %9 = vector.load %arg2[%c1, %c0_18, %c0_19] : memref<3x2x32xf32, #tpu.memory_space<vmem>>, vector<1x2x32xf32>
    %10 = vector.shape_cast %9 : vector<1x2x32xf32> to vector<2x32xf32>
    %c2 = arith.constant 2 : index
    %c0_20 = arith.constant 0 : index
    %c0_21 = arith.constant 0 : index
    %11 = vector.load %arg2[%c2, %c0_20, %c0_21] : memref<3x2x32xf32, #tpu.memory_space<vmem>>, vector<1x2x32xf32>
    %12 = vector.shape_cast %11 : vector<1x2x32xf32> to vector<2x32xf32>
    %13 = vector.extract_strided_slice %1 {offsets = [0, 0, 0], sizes = [1, 32, 96], strides = [1, 1, 1]} : vector<3x32x96xf32> to vector<1x32x96xf32>
    %14 = vector.shape_cast %13 : vector<1x32x96xf32> to vector<32x96xf32>
    %cst_22 = arith.constant dense<0.000000e+00> : vector<2x96xf32>
    %15 = tpu.matmul %8, %14, %cst_22 {dimension_numbers = #tpu.dot_dimension_numbers<[1], [0], [0], [1], [0, 0, 1, 1], [], []>} : vector<2x32xf32>, vector<32x96xf32>, vector<2x96xf32> -> vector<2x96xf32>
    %16 = vector.extract_strided_slice %1 {offsets = [1, 0, 0], sizes = [1, 32, 96], strides = [1, 1, 1]} : vector<3x32x96xf32> to vector<1x32x96xf32>
    %17 = vector.shape_cast %16 : vector<1x32x96xf32> to vector<32x96xf32>
    %cst_23 = arith.constant dense<0.000000e+00> : vector<2x96xf32>
    %18 = tpu.matmul %10, %17, %cst_23 {dimension_numbers = #tpu.dot_dimension_numbers<[1], [0], [0], [1], [0, 0, 1, 1], [], []>} : vector<2x32xf32>, vector<32x96xf32>, vector<2x96xf32> -> vector<2x96xf32>
    %19 = vector.extract_strided_slice %1 {offsets = [2, 0, 0], sizes = [1, 32, 96], strides = [1, 1, 1]} : vector<3x32x96xf32> to vector<1x32x96xf32>
    %20 = vector.shape_cast %19 : vector<1x32x96xf32> to vector<32x96xf32>
    %cst_24 = arith.constant dense<0.000000e+00> : vector<2x96xf32>
    %21 = tpu.matmul %12, %20, %cst_24 {dimension_numbers = #tpu.dot_dimension_numbers<[1], [0], [0], [1], [0, 0, 1, 1], [], []>} : vector<2x32xf32>, vector<32x96xf32>, vector<2x96xf32> -> vector<2x96xf32>
    %22 = vector.extract_strided_slice %6 {offsets = [0, 0], sizes = [2, 96], strides = [1, 1]} : vector<16x96xf32> to vector<2x96xf32>
    %23 = vector.extract_strided_slice %22 {offsets = [0, 0], sizes = [2, 64], strides = [1, 1]} : vector<2x96xf32> to vector<2x64xf32>
    %24 = vector.extract_strided_slice %15 {offsets = [0, 0], sizes = [2, 64], strides = [1, 1]} : vector<2x96xf32> to vector<2x64xf32>
    %25 = arith.addf %23, %24 : vector<2x64xf32>
    %26 = vector.extract_strided_slice %2 {offsets = [0, 0, 0], sizes = [1, 1, 64], strides = [1, 1, 1]} : vector<3x1x64xf32> to vector<1x1x64xf32>
    %27 = vector.shape_cast %26 : vector<1x1x64xf32> to vector<1x64xf32>
    %28 = vector.broadcast %27 : vector<1x64xf32> to vector<2x64xf32>
    %29 = arith.addf %25, %28 : vector<2x64xf32>
    %30 = arith.negf %29 : vector<2x64xf32>
    %31 = math.exp %30 : vector<2x64xf32>
    %cst_25 = arith.constant 1.000000e+00 : f32
    %32 = vector.broadcast %cst_25 : f32 to vector<2x64xf32>
    %33 = arith.addf %32, %31 : vector<2x64xf32>
    %34 = arith.divf %32, %33 : vector<2x64xf32>
    %35 = vector.extract_strided_slice %34 {offsets = [0, 0], sizes = [2, 32], strides = [1, 1]} : vector<2x64xf32> to vector<2x32xf32>
    %36 = vector.extract_strided_slice %34 {offsets = [0, 32], sizes = [2, 32], strides = [1, 1]} : vector<2x64xf32> to vector<2x32xf32>
    %37 = vector.extract_strided_slice %22 {offsets = [0, 64], sizes = [2, 32], strides = [1, 1]} : vector<2x96xf32> to vector<2x32xf32>
    %38 = vector.extract_strided_slice %3 {offsets = [0, 0, 0], sizes = [1, 1, 32], strides = [1, 1, 1]} : vector<3x1x32xf32> to vector<1x1x32xf32>
    %39 = vector.shape_cast %38 : vector<1x1x32xf32> to vector<1x32xf32>
    %40 = vector.broadcast %39 : vector<1x32xf32> to vector<2x32xf32>
    %41 = arith.addf %37, %40 : vector<2x32xf32>
    %42 = vector.extract_strided_slice %15 {offsets = [0, 64], sizes = [2, 32], strides = [1, 1]} : vector<2x96xf32> to vector<2x32xf32>
    %43 = vector.extract_strided_slice %4 {offsets = [0, 0, 0], sizes = [1, 1, 32], strides = [1, 1, 1]} : vector<3x1x32xf32> to vector<1x1x32xf32>
    %44 = vector.shape_cast %43 : vector<1x1x32xf32> to vector<1x32xf32>
    %45 = vector.broadcast %44 : vector<1x32xf32> to vector<2x32xf32>
    %46 = arith.addf %42, %45 : vector<2x32xf32>
    %47 = arith.mulf %35, %46 : vector<2x32xf32>
    %48 = arith.addf %41, %47 : vector<2x32xf32>
    %49 = math.tanh %48 : vector<2x32xf32>
    %cst_26 = arith.constant 1.000000e+00 : f32
    %50 = vector.broadcast %cst_26 : f32 to vector<2x32xf32>
    %51 = arith.subf %50, %36 : vector<2x32xf32>
    %52 = arith.mulf %51, %49 : vector<2x32xf32>
    %53 = arith.mulf %36, %8 : vector<2x32xf32>
    %54 = arith.addf %52, %53 : vector<2x32xf32>
    %c0_27 = arith.constant 0 : index
    %c0_28 = arith.constant 0 : index
    %c0_29 = arith.constant 0 : index
    %55 = vector.load %arg4[%c0_27, %c0_28, %c0_29] : memref<2x32x96xf32, #tpu.memory_space<vmem>>, vector<1x32x96xf32>
    %56 = vector.shape_cast %55 : vector<1x32x96xf32> to vector<32x96xf32>
    %cst_30 = arith.constant dense<0.000000e+00> : vector<2x96xf32>
    %57 = tpu.matmul %54, %56, %cst_30 {dimension_numbers = #tpu.dot_dimension_numbers<[1], [0], [0], [1], [0, 0, 1, 1], [], []>} : vector<2x32xf32>, vector<32x96xf32>, vector<2x96xf32> -> vector<2x96xf32>
    %58 = vector.extract_strided_slice %57 {offsets = [0, 0], sizes = [2, 64], strides = [1, 1]} : vector<2x96xf32> to vector<2x64xf32>
    %59 = vector.extract_strided_slice %18 {offsets = [0, 0], sizes = [2, 64], strides = [1, 1]} : vector<2x96xf32> to vector<2x64xf32>
    %60 = arith.addf %58, %59 : vector<2x64xf32>
    %61 = vector.extract_strided_slice %2 {offsets = [1, 0, 0], sizes = [1, 1, 64], strides = [1, 1, 1]} : vector<3x1x64xf32> to vector<1x1x64xf32>
    %62 = vector.shape_cast %61 : vector<1x1x64xf32> to vector<1x64xf32>
    %63 = vector.broadcast %62 : vector<1x64xf32> to vector<2x64xf32>
    %64 = arith.addf %60, %63 : vector<2x64xf32>
    %65 = arith.negf %64 : vector<2x64xf32>
    %66 = math.exp %65 : vector<2x64xf32>
    %cst_31 = arith.constant 1.000000e+00 : f32
    %67 = vector.broadcast %cst_31 : f32 to vector<2x64xf32>
    %68 = arith.addf %67, %66 : vector<2x64xf32>
    %69 = arith.divf %67, %68 : vector<2x64xf32>
    %70 = vector.extract_strided_slice %69 {offsets = [0, 0], sizes = [2, 32], strides = [1, 1]} : vector<2x64xf32> to vector<2x32xf32>
    %71 = vector.extract_strided_slice %69 {offsets = [0, 32], sizes = [2, 32], strides = [1, 1]} : vector<2x64xf32> to vector<2x32xf32>
    %72 = vector.extract_strided_slice %57 {offsets = [0, 64], sizes = [2, 32], strides = [1, 1]} : vector<2x96xf32> to vector<2x32xf32>
    %73 = vector.extract_strided_slice %3 {offsets = [1, 0, 0], sizes = [1, 1, 32], strides = [1, 1, 1]} : vector<3x1x32xf32> to vector<1x1x32xf32>
    %74 = vector.shape_cast %73 : vector<1x1x32xf32> to vector<1x32xf32>
    %75 = vector.broadcast %74 : vector<1x32xf32> to vector<2x32xf32>
    %76 = arith.addf %72, %75 : vector<2x32xf32>
    %77 = vector.extract_strided_slice %18 {offsets = [0, 64], sizes = [2, 32], strides = [1, 1]} : vector<2x96xf32> to vector<2x32xf32>
    %78 = vector.extract_strided_slice %4 {offsets = [1, 0, 0], sizes = [1, 1, 32], strides = [1, 1, 1]} : vector<3x1x32xf32> to vector<1x1x32xf32>
    %79 = vector.shape_cast %78 : vector<1x1x32xf32> to vector<1x32xf32>
    %80 = vector.broadcast %79 : vector<1x32xf32> to vector<2x32xf32>
    %81 = arith.addf %77, %80 : vector<2x32xf32>
    %82 = arith.mulf %70, %81 : vector<2x32xf32>
    %83 = arith.addf %76, %82 : vector<2x32xf32>
    %84 = math.tanh %83 : vector<2x32xf32>
    %cst_32 = arith.constant 1.000000e+00 : f32
    %85 = vector.broadcast %cst_32 : f32 to vector<2x32xf32>
    %86 = arith.subf %85, %71 : vector<2x32xf32>
    %87 = arith.mulf %86, %84 : vector<2x32xf32>
    %88 = arith.mulf %71, %10 : vector<2x32xf32>
    %89 = arith.addf %87, %88 : vector<2x32xf32>
    %c1_33 = arith.constant 1 : index
    %c0_34 = arith.constant 0 : index
    %c0_35 = arith.constant 0 : index
    %90 = vector.load %arg4[%c1_33, %c0_34, %c0_35] : memref<2x32x96xf32, #tpu.memory_space<vmem>>, vector<1x32x96xf32>
    %91 = vector.shape_cast %90 : vector<1x32x96xf32> to vector<32x96xf32>
    %cst_36 = arith.constant dense<0.000000e+00> : vector<2x96xf32>
    %92 = tpu.matmul %89, %91, %cst_36 {dimension_numbers = #tpu.dot_dimension_numbers<[1], [0], [0], [1], [0, 0, 1, 1], [], []>} : vector<2x32xf32>, vector<32x96xf32>, vector<2x96xf32> -> vector<2x96xf32>
    %93 = vector.extract_strided_slice %92 {offsets = [0, 0], sizes = [2, 64], strides = [1, 1]} : vector<2x96xf32> to vector<2x64xf32>
    %94 = vector.extract_strided_slice %21 {offsets = [0, 0], sizes = [2, 64], strides = [1, 1]} : vector<2x96xf32> to vector<2x64xf32>
    %95 = arith.addf %93, %94 : vector<2x64xf32>
    %96 = vector.extract_strided_slice %2 {offsets = [2, 0, 0], sizes = [1, 1, 64], strides = [1, 1, 1]} : vector<3x1x64xf32> to vector<1x1x64xf32>
    %97 = vector.shape_cast %96 : vector<1x1x64xf32> to vector<1x64xf32>
    %98 = vector.broadcast %97 : vector<1x64xf32> to vector<2x64xf32>
    %99 = arith.addf %95, %98 : vector<2x64xf32>
    %100 = arith.negf %99 : vector<2x64xf32>
    %101 = math.exp %100 : vector<2x64xf32>
    %cst_37 = arith.constant 1.000000e+00 : f32
    %102 = vector.broadcast %cst_37 : f32 to vector<2x64xf32>
    %103 = arith.addf %102, %101 : vector<2x64xf32>
    %104 = arith.divf %102, %103 : vector<2x64xf32>
    %105 = vector.extract_strided_slice %104 {offsets = [0, 0], sizes = [2, 32], strides = [1, 1]} : vector<2x64xf32> to vector<2x32xf32>
    %106 = vector.extract_strided_slice %104 {offsets = [0, 32], sizes = [2, 32], strides = [1, 1]} : vector<2x64xf32> to vector<2x32xf32>
    %107 = vector.extract_strided_slice %92 {offsets = [0, 64], sizes = [2, 32], strides = [1, 1]} : vector<2x96xf32> to vector<2x32xf32>
    %108 = vector.extract_strided_slice %3 {offsets = [2, 0, 0], sizes = [1, 1, 32], strides = [1, 1, 1]} : vector<3x1x32xf32> to vector<1x1x32xf32>
    %109 = vector.shape_cast %108 : vector<1x1x32xf32> to vector<1x32xf32>
    %110 = vector.broadcast %109 : vector<1x32xf32> to vector<2x32xf32>
    %111 = arith.addf %107, %110 : vector<2x32xf32>
    %112 = vector.extract_strided_slice %21 {offsets = [0, 64], sizes = [2, 32], strides = [1, 1]} : vector<2x96xf32> to vector<2x32xf32>
    %113 = vector.extract_strided_slice %4 {offsets = [2, 0, 0], sizes = [1, 1, 32], strides = [1, 1, 1]} : vector<3x1x32xf32> to vector<1x1x32xf32>
    %114 = vector.shape_cast %113 : vector<1x1x32xf32> to vector<1x32xf32>
    %115 = vector.broadcast %114 : vector<1x32xf32> to vector<2x32xf32>
    %116 = arith.addf %112, %115 : vector<2x32xf32>
    %117 = arith.mulf %105, %116 : vector<2x32xf32>
    %118 = arith.addf %111, %117 : vector<2x32xf32>
    %119 = math.tanh %118 : vector<2x32xf32>
    %cst_38 = arith.constant 1.000000e+00 : f32
    %120 = vector.broadcast %cst_38 : f32 to vector<2x32xf32>
    %121 = arith.subf %120, %106 : vector<2x32xf32>
    %122 = arith.mulf %121, %119 : vector<2x32xf32>
    %123 = arith.mulf %106, %12 : vector<2x32xf32>
    %124 = arith.addf %122, %123 : vector<2x32xf32>
    %125 = vector.extract_strided_slice %124 {offsets = [1, 0], sizes = [1, 32], strides = [1, 1]} : vector<2x32xf32> to vector<1x32xf32>
    %c0_39 = arith.constant 0 : index
    %c0_40 = arith.constant 0 : index
    %126 = vector.load %arg13[%c0_39, %c0_40] : memref<8x32xf32, #tpu.memory_space<vmem>>, vector<1x32xf32>
    tpu.vector_store %arg13[%c0_39, %c0_40], %125 {strides = array<i32>} : memref<8x32xf32, #tpu.memory_space<vmem>>, vector<1x32xf32>,
    %127 = vector.extract_strided_slice %1 {offsets = [0, 0, 0], sizes = [1, 32, 96], strides = [1, 1, 1]} : vector<3x32x96xf32> to vector<1x32x96xf32>
    %128 = vector.shape_cast %127 : vector<1x32x96xf32> to vector<32x96xf32>
    %cst_41 = arith.constant dense<0.000000e+00> : vector<2x96xf32>
    %129 = tpu.matmul %54, %128, %cst_41 {dimension_numbers = #tpu.dot_dimension_numbers<[1], [0], [0], [1], [0, 0, 1, 1], [], []>} : vector<2x32xf32>, vector<32x96xf32>, vector<2x96xf32> -> vector<2x96xf32>
    %130 = vector.extract_strided_slice %1 {offsets = [1, 0, 0], sizes = [1, 32, 96], strides = [1, 1, 1]} : vector<3x32x96xf32> to vector<1x32x96xf32>
    %131 = vector.shape_cast %130 : vector<1x32x96xf32> to vector<32x96xf32>
    %cst_42 = arith.constant dense<0.000000e+00> : vector<2x96xf32>
    %132 = tpu.matmul %89, %131, %cst_42 {dimension_numbers = #tpu.dot_dimension_numbers<[1], [0], [0], [1], [0, 0, 1, 1], [], []>} : vector<2x32xf32>, vector<32x96xf32>, vector<2x96xf32> -> vector<2x96xf32>
    %133 = vector.extract_strided_slice %1 {offsets = [2, 0, 0], sizes = [1, 32, 96], strides = [1, 1, 1]} : vector<3x32x96xf32> to vector<1x32x96xf32>
    %134 = vector.shape_cast %133 : vector<1x32x96xf32> to vector<32x96xf32>
    %cst_43 = arith.constant dense<0.000000e+00> : vector<2x96xf32>
    %135 = tpu.matmul %124, %134, %cst_43 {dimension_numbers = #tpu.dot_dimension_numbers<[1], [0], [0], [1], [0, 0, 1, 1], [], []>} : vector<2x32xf32>, vector<32x96xf32>, vector<2x96xf32> -> vector<2x96xf32>
    %136 = vector.extract_strided_slice %6 {offsets = [2, 0], sizes = [2, 96], strides = [1, 1]} : vector<16x96xf32> to vector<2x96xf32>
    %137 = vector.extract_strided_slice %136 {offsets = [0, 0], sizes = [2, 64], strides = [1, 1]} : vector<2x96xf32> to vector<2x64xf32>
    %138 = vector.extract_strided_slice %129 {offsets = [0, 0], sizes = [2, 64], strides = [1, 1]} : vector<2x96xf32> to vector<2x64xf32>
    %139 = arith.addf %137, %138 : vector<2x64xf32>
    %140 = vector.extract_strided_slice %2 {offsets = [0, 0, 0], sizes = [1, 1, 64], strides = [1, 1, 1]} : vector<3x1x64xf32> to vector<1x1x64xf32>
    %141 = vector.shape_cast %140 : vector<1x1x64xf32> to vector<1x64xf32>
    %142 = vector.broadcast %141 : vector<1x64xf32> to vector<2x64xf32>
    %143 = arith.addf %139, %142 : vector<2x64xf32>
    %144 = arith.negf %143 : vector<2x64xf32>
    %145 = math.exp %144 : vector<2x64xf32>
    %cst_44 = arith.constant 1.000000e+00 : f32
    %146 = vector.broadcast %cst_44 : f32 to vector<2x64xf32>
    %147 = arith.addf %146, %145 : vector<2x64xf32>
    %148 = arith.divf %146, %147 : vector<2x64xf32>
    %149 = vector.extract_strided_slice %148 {offsets = [0, 0], sizes = [2, 32], strides = [1, 1]} : vector<2x64xf32> to vector<2x32xf32>
    %150 = vector.extract_strided_slice %148 {offsets = [0, 32], sizes = [2, 32], strides = [1, 1]} : vector<2x64xf32> to vector<2x32xf32>
    %151 = vector.extract_strided_slice %136 {offsets = [0, 64], sizes = [2, 32], strides = [1, 1]} : vector<2x96xf32> to vector<2x32xf32>
    %152 = vector.extract_strided_slice %3 {offsets = [0, 0, 0], sizes = [1, 1, 32], strides = [1, 1, 1]} : vector<3x1x32xf32> to vector<1x1x32xf32>
    %153 = vector.shape_cast %152 : vector<1x1x32xf32> to vector<1x32xf32>
    %154 = vector.broadcast %153 : vector<1x32xf32> to vector<2x32xf32>
    %155 = arith.addf %151, %154 : vector<2x32xf32>
    %156 = vector.extract_strided_slice %129 {offsets = [0, 64], sizes = [2, 32], strides = [1, 1]} : vector<2x96xf32> to vector<2x32xf32>
    %157 = vector.extract_strided_slice %4 {offsets = [0, 0, 0], sizes = [1, 1, 32], strides = [1, 1, 1]} : vector<3x1x32xf32> to vector<1x1x32xf32>
    %158 = vector.shape_cast %157 : vector<1x1x32xf32> to vector<1x32xf32>
    %159 = vector.broadcast %158 : vector<1x32xf32> to vector<2x32xf32>
    %160 = arith.addf %156, %159 : vector<2x32xf32>
    %161 = arith.mulf %149, %160 : vector<2x32xf32>
    %162 = arith.addf %155, %161 : vector<2x32xf32>
    %163 = math.tanh %162 : vector<2x32xf32>
    %cst_45 = arith.constant 1.000000e+00 : f32
    %164 = vector.broadcast %cst_45 : f32 to vector<2x32xf32>
    %165 = arith.subf %164, %150 : vector<2x32xf32>
    %166 = arith.mulf %165, %163 : vector<2x32xf32>
    %167 = arith.mulf %150, %54 : vector<2x32xf32>
    %168 = arith.addf %166, %167 : vector<2x32xf32>
    %c0_46 = arith.constant 0 : index
    %c0_47 = arith.constant 0 : index
    %c0_48 = arith.constant 0 : index
    %169 = vector.load %arg4[%c0_46, %c0_47, %c0_48] : memref<2x32x96xf32, #tpu.memory_space<vmem>>, vector<1x32x96xf32>
    %170 = vector.shape_cast %169 : vector<1x32x96xf32> to vector<32x96xf32>
    %cst_49 = arith.constant dense<0.000000e+00> : vector<2x96xf32>
    %171 = tpu.matmul %168, %170, %cst_49 {dimension_numbers = #tpu.dot_dimension_numbers<[1], [0], [0], [1], [0, 0, 1, 1], [], []>} : vector<2x32xf32>, vector<32x96xf32>, vector<2x96xf32> -> vector<2x96xf32>
    %172 = vector.extract_strided_slice %171 {offsets = [0, 0], sizes = [2, 64], strides = [1, 1]} : vector<2x96xf32> to vector<2x64xf32>
    %173 = vector.extract_strided_slice %132 {offsets = [0, 0], sizes = [2, 64], strides = [1, 1]} : vector<2x96xf32> to vector<2x64xf32>
    %174 = arith.addf %172, %173 : vector<2x64xf32>
    %175 = vector.extract_strided_slice %2 {offsets = [1, 0, 0], sizes = [1, 1, 64], strides = [1, 1, 1]} : vector<3x1x64xf32> to vector<1x1x64xf32>
    %176 = vector.shape_cast %175 : vector<1x1x64xf32> to vector<1x64xf32>
    %177 = vector.broadcast %176 : vector<1x64xf32> to vector<2x64xf32>
    %178 = arith.addf %174, %177 : vector<2x64xf32>
    %179 = arith.negf %178 : vector<2x64xf32>
    %180 = math.exp %179 : vector<2x64xf32>
    %cst_50 = arith.constant 1.000000e+00 : f32
    %181 = vector.broadcast %cst_50 : f32 to vector<2x64xf32>
    %182 = arith.addf %181, %180 : vector<2x64xf32>
    %183 = arith.divf %181, %182 : vector<2x64xf32>
    %184 = vector.extract_strided_slice %183 {offsets = [0, 0], sizes = [2, 32], strides = [1, 1]} : vector<2x64xf32> to vector<2x32xf32>
    %185 = vector.extract_strided_slice %183 {offsets = [0, 32], sizes = [2, 32], strides = [1, 1]} : vector<2x64xf32> to vector<2x32xf32>
    %186 = vector.extract_strided_slice %171 {offsets = [0, 64], sizes = [2, 32], strides = [1, 1]} : vector<2x96xf32> to vector<2x32xf32>
    %187 = vector.extract_strided_slice %3 {offsets = [1, 0, 0], sizes = [1, 1, 32], strides = [1, 1, 1]} : vector<3x1x32xf32> to vector<1x1x32xf32>
    %188 = vector.shape_cast %187 : vector<1x1x32xf32> to vector<1x32xf32>
    %189 = vector.broadcast %188 : vector<1x32xf32> to vector<2x32xf32>
    %190 = arith.addf %186, %189 : vector<2x32xf32>
    %191 = vector.extract_strided_slice %132 {offsets = [0, 64], sizes = [2, 32], strides = [1, 1]} : vector<2x96xf32> to vector<2x32xf32>
    %192 = vector.extract_strided_slice %4 {offsets = [1, 0, 0], sizes = [1, 1, 32], strides = [1, 1, 1]} : vector<3x1x32xf32> to vector<1x1x32xf32>
    %193 = vector.shape_cast %192 : vector<1x1x32xf32> to vector<1x32xf32>
    %194 = vector.broadcast %193 : vector<1x32xf32> to vector<2x32xf32>
    %195 = arith.addf %191, %194 : vector<2x32xf32>
    %196 = arith.mulf %184, %195 : vector<2x32xf32>
    %197 = arith.addf %190, %196 : vector<2x32xf32>
    %198 = math.tanh %197 : vector<2x32xf32>
    %cst_51 = arith.constant 1.000000e+00 : f32
    %199 = vector.broadcast %cst_51 : f32 to vector<2x32xf32>
    %200 = arith.subf %199, %185 : vector<2x32xf32>
    %201 = arith.mulf %200, %198 : vector<2x32xf32>
    %202 = arith.mulf %185, %89 : vector<2x32xf32>
    %203 = arith.addf %201, %202 : vector<2x32xf32>
    %c1_52 = arith.constant 1 : index
    %c0_53 = arith.constant 0 : index
    %c0_54 = arith.constant 0 : index
    %204 = vector.load %arg4[%c1_52, %c0_53, %c0_54] : memref<2x32x96xf32, #tpu.memory_space<vmem>>, vector<1x32x96xf32>
    %205 = vector.shape_cast %204 : vector<1x32x96xf32> to vector<32x96xf32>
    %cst_55 = arith.constant dense<0.000000e+00> : vector<2x96xf32>
    %206 = tpu.matmul %203, %205, %cst_55 {dimension_numbers = #tpu.dot_dimension_numbers<[1], [0], [0], [1], [0, 0, 1, 1], [], []>} : vector<2x32xf32>, vector<32x96xf32>, vector<2x96xf32> -> vector<2x96xf32>
    %207 = vector.extract_strided_slice %206 {offsets = [0, 0], sizes = [2, 64], strides = [1, 1]} : vector<2x96xf32> to vector<2x64xf32>
    %208 = vector.extract_strided_slice %135 {offsets = [0, 0], sizes = [2, 64], strides = [1, 1]} : vector<2x96xf32> to vector<2x64xf32>
    %209 = arith.addf %207, %208 : vector<2x64xf32>
    %210 = vector.extract_strided_slice %2 {offsets = [2, 0, 0], sizes = [1, 1, 64], strides = [1, 1, 1]} : vector<3x1x64xf32> to vector<1x1x64xf32>
    %211 = vector.shape_cast %210 : vector<1x1x64xf32> to vector<1x64xf32>
    %212 = vector.broadcast %211 : vector<1x64xf32> to vector<2x64xf32>
    %213 = arith.addf %209, %212 : vector<2x64xf32>
    %214 = arith.negf %213 : vector<2x64xf32>
    %215 = math.exp %214 : vector<2x64xf32>
    %cst_56 = arith.constant 1.000000e+00 : f32
    %216 = vector.broadcast %cst_56 : f32 to vector<2x64xf32>
    %217 = arith.addf %216, %215 : vector<2x64xf32>
    %218 = arith.divf %216, %217 : vector<2x64xf32>
    %219 = vector.extract_strided_slice %218 {offsets = [0, 0], sizes = [2, 32], strides = [1, 1]} : vector<2x64xf32> to vector<2x32xf32>
    %220 = vector.extract_strided_slice %218 {offsets = [0, 32], sizes = [2, 32], strides = [1, 1]} : vector<2x64xf32> to vector<2x32xf32>
    %221 = vector.extract_strided_slice %206 {offsets = [0, 64], sizes = [2, 32], strides = [1, 1]} : vector<2x96xf32> to vector<2x32xf32>
    %222 = vector.extract_strided_slice %3 {offsets = [2, 0, 0], sizes = [1, 1, 32], strides = [1, 1, 1]} : vector<3x1x32xf32> to vector<1x1x32xf32>
    %223 = vector.shape_cast %222 : vector<1x1x32xf32> to vector<1x32xf32>
    %224 = vector.broadcast %223 : vector<1x32xf32> to vector<2x32xf32>
    %225 = arith.addf %221, %224 : vector<2x32xf32>
    %226 = vector.extract_strided_slice %135 {offsets = [0, 64], sizes = [2, 32], strides = [1, 1]} : vector<2x96xf32> to vector<2x32xf32>
    %227 = vector.extract_strided_slice %4 {offsets = [2, 0, 0], sizes = [1, 1, 32], strides = [1, 1, 1]} : vector<3x1x32xf32> to vector<1x1x32xf32>
    %228 = vector.shape_cast %227 : vector<1x1x32xf32> to vector<1x32xf32>
    %229 = vector.broadcast %228 : vector<1x32xf32> to vector<2x32xf32>
    %230 = arith.addf %226, %229 : vector<2x32xf32>
    %231 = arith.mulf %219, %230 : vector<2x32xf32>
    %232 = arith.addf %225, %231 : vector<2x32xf32>
    %233 = math.tanh %232 : vector<2x32xf32>
    %cst_57 = arith.constant 1.000000e+00 : f32
    %234 = vector.broadcast %cst_57 : f32 to vector<2x32xf32>
    %235 = arith.subf %234, %220 : vector<2x32xf32>
    %236 = arith.mulf %235, %233 : vector<2x32xf32>
    %237 = arith.mulf %220, %124 : vector<2x32xf32>
    %238 = arith.addf %236, %237 : vector<2x32xf32>
    %239 = vector.extract_strided_slice %238 {offsets = [1, 0], sizes = [1, 32], strides = [1, 1]} : vector<2x32xf32> to vector<1x32xf32>
    %c1_58 = arith.constant 1 : index
    %c0_59 = arith.constant 0 : index
    %240 = vector.load %arg13[%c1_58, %c0_59] : memref<8x32xf32, #tpu.memory_space<vmem>>, vector<1x32xf32>
    tpu.vector_store %arg13[%c1_58, %c0_59], %239 {strides = array<i32>} : memref<8x32xf32, #tpu.memory_space<vmem>>, vector<1x32xf32>,
    %241 = vector.extract_strided_slice %1 {offsets = [0, 0, 0], sizes = [1, 32, 96], strides = [1, 1, 1]} : vector<3x32x96xf32> to vector<1x32x96xf32>
    %242 = vector.shape_cast %241 : vector<1x32x96xf32> to vector<32x96xf32>
    %cst_60 = arith.constant dense<0.000000e+00> : vector<2x96xf32>
    %243 = tpu.matmul %168, %242, %cst_60 {dimension_numbers = #tpu.dot_dimension_numbers<[1], [0], [0], [1], [0, 0, 1, 1], [], []>} : vector<2x32xf32>, vector<32x96xf32>, vector<2x96xf32> -> vector<2x96xf32>
    %244 = vector.extract_strided_slice %1 {offsets = [1, 0, 0], sizes = [1, 32, 96], strides = [1, 1, 1]} : vector<3x32x96xf32> to vector<1x32x96xf32>
    %245 = vector.shape_cast %244 : vector<1x32x96xf32> to vector<32x96xf32>
    %cst_61 = arith.constant dense<0.000000e+00> : vector<2x96xf32>
    %246 = tpu.matmul %203, %245, %cst_61 {dimension_numbers = #tpu.dot_dimension_numbers<[1], [0], [0], [1], [0, 0, 1, 1], [], []>} : vector<2x32xf32>, vector<32x96xf32>, vector<2x96xf32> -> vector<2x96xf32>
    %247 = vector.extract_strided_slice %1 {offsets = [2, 0, 0], sizes = [1, 32, 96], strides = [1, 1, 1]} : vector<3x32x96xf32> to vector<1x32x96xf32>
    %248 = vector.shape_cast %247 : vector<1x32x96xf32> to vector<32x96xf32>
    %cst_62 = arith.constant dense<0.000000e+00> : vector<2x96xf32>
    %249 = tpu.matmul %238, %248, %cst_62 {dimension_numbers = #tpu.dot_dimension_numbers<[1], [0], [0], [1], [0, 0, 1, 1], [], []>} : vector<2x32xf32>, vector<32x96xf32>, vector<2x96xf32> -> vector<2x96xf32>
    %250 = vector.extract_strided_slice %6 {offsets = [4, 0], sizes = [2, 96], strides = [1, 1]} : vector<16x96xf32> to vector<2x96xf32>
    %251 = vector.extract_strided_slice %250 {offsets = [0, 0], sizes = [2, 64], strides = [1, 1]} : vector<2x96xf32> to vector<2x64xf32>
    %252 = vector.extract_strided_slice %243 {offsets = [0, 0], sizes = [2, 64], strides = [1, 1]} : vector<2x96xf32> to vector<2x64xf32>
    %253 = arith.addf %251, %252 : vector<2x64xf32>
    %254 = vector.extract_strided_slice %2 {offsets = [0, 0, 0], sizes = [1, 1, 64], strides = [1, 1, 1]} : vector<3x1x64xf32> to vector<1x1x64xf32>
    %255 = vector.shape_cast %254 : vector<1x1x64xf32> to vector<1x64xf32>
    %256 = vector.broadcast %255 : vector<1x64xf32> to vector<2x64xf32>
    %257 = arith.addf %253, %256 : vector<2x64xf32>
    %258 = arith.negf %257 : vector<2x64xf32>
    %259 = math.exp %258 : vector<2x64xf32>
    %cst_63 = arith.constant 1.000000e+00 : f32
    %260 = vector.broadcast %cst_63 : f32 to vector<2x64xf32>
    %261 = arith.addf %260, %259 : vector<2x64xf32>
    %262 = arith.divf %260, %261 : vector<2x64xf32>
    %263 = vector.extract_strided_slice %262 {offsets = [0, 0], sizes = [2, 32], strides = [1, 1]} : vector<2x64xf32> to vector<2x32xf32>
    %264 = vector.extract_strided_slice %262 {offsets = [0, 32], sizes = [2, 32], strides = [1, 1]} : vector<2x64xf32> to vector<2x32xf32>
    %265 = vector.extract_strided_slice %250 {offsets = [0, 64], sizes = [2, 32], strides = [1, 1]} : vector<2x96xf32> to vector<2x32xf32>
    %266 = vector.extract_strided_slice %3 {offsets = [0, 0, 0], sizes = [1, 1, 32], strides = [1, 1, 1]} : vector<3x1x32xf32> to vector<1x1x32xf32>
    %267 = vector.shape_cast %266 : vector<1x1x32xf32> to vector<1x32xf32>
    %268 = vector.broadcast %267 : vector<1x32xf32> to vector<2x32xf32>
    %269 = arith.addf %265, %268 : vector<2x32xf32>
    %270 = vector.extract_strided_slice %243 {offsets = [0, 64], sizes = [2, 32], strides = [1, 1]} : vector<2x96xf32> to vector<2x32xf32>
    %271 = vector.extract_strided_slice %4 {offsets = [0, 0, 0], sizes = [1, 1, 32], strides = [1, 1, 1]} : vector<3x1x32xf32> to vector<1x1x32xf32>
    %272 = vector.shape_cast %271 : vector<1x1x32xf32> to vector<1x32xf32>
    %273 = vector.broadcast %272 : vector<1x32xf32> to vector<2x32xf32>
    %274 = arith.addf %270, %273 : vector<2x32xf32>
    %275 = arith.mulf %263, %274 : vector<2x32xf32>
    %276 = arith.addf %269, %275 : vector<2x32xf32>
    %277 = math.tanh %276 : vector<2x32xf32>
    %cst_64 = arith.constant 1.000000e+00 : f32
    %278 = vector.broadcast %cst_64 : f32 to vector<2x32xf32>
    %279 = arith.subf %278, %264 : vector<2x32xf32>
    %280 = arith.mulf %279, %277 : vector<2x32xf32>
    %281 = arith.mulf %264, %168 : vector<2x32xf32>
    %282 = arith.addf %280, %281 : vector<2x32xf32>
    %c0_65 = arith.constant 0 : index
    %c0_66 = arith.constant 0 : index
    %c0_67 = arith.constant 0 : index
    %283 = vector.load %arg4[%c0_65, %c0_66, %c0_67] : memref<2x32x96xf32, #tpu.memory_space<vmem>>, vector<1x32x96xf32>
    %284 = vector.shape_cast %283 : vector<1x32x96xf32> to vector<32x96xf32>
    %cst_68 = arith.constant dense<0.000000e+00> : vector<2x96xf32>
    %285 = tpu.matmul %282, %284, %cst_68 {dimension_numbers = #tpu.dot_dimension_numbers<[1], [0], [0], [1], [0, 0, 1, 1], [], []>} : vector<2x32xf32>, vector<32x96xf32>, vector<2x96xf32> -> vector<2x96xf32>
    %286 = vector.extract_strided_slice %285 {offsets = [0, 0], sizes = [2, 64], strides = [1, 1]} : vector<2x96xf32> to vector<2x64xf32>
    %287 = vector.extract_strided_slice %246 {offsets = [0, 0], sizes = [2, 64], strides = [1, 1]} : vector<2x96xf32> to vector<2x64xf32>
    %288 = arith.addf %286, %287 : vector<2x64xf32>
    %289 = vector.extract_strided_slice %2 {offsets = [1, 0, 0], sizes = [1, 1, 64], strides = [1, 1, 1]} : vector<3x1x64xf32> to vector<1x1x64xf32>
    %290 = vector.shape_cast %289 : vector<1x1x64xf32> to vector<1x64xf32>
    %291 = vector.broadcast %290 : vector<1x64xf32> to vector<2x64xf32>
    %292 = arith.addf %288, %291 : vector<2x64xf32>
    %293 = arith.negf %292 : vector<2x64xf32>
    %294 = math.exp %293 : vector<2x64xf32>
    %cst_69 = arith.constant 1.000000e+00 : f32
    %295 = vector.broadcast %cst_69 : f32 to vector<2x64xf32>
    %296 = arith.addf %295, %294 : vector<2x64xf32>
    %297 = arith.divf %295, %296 : vector<2x64xf32>
    %298 = vector.extract_strided_slice %297 {offsets = [0, 0], sizes = [2, 32], strides = [1, 1]} : vector<2x64xf32> to vector<2x32xf32>
    %299 = vector.extract_strided_slice %297 {offsets = [0, 32], sizes = [2, 32], strides = [1, 1]} : vector<2x64xf32> to vector<2x32xf32>
    %300 = vector.extract_strided_slice %285 {offsets = [0, 64], sizes = [2, 32], strides = [1, 1]} : vector<2x96xf32> to vector<2x32xf32>
    %301 = vector.extract_strided_slice %3 {offsets = [1, 0, 0], sizes = [1, 1, 32], strides = [1, 1, 1]} : vector<3x1x32xf32> to vector<1x1x32xf32>
    %302 = vector.shape_cast %301 : vector<1x1x32xf32> to vector<1x32xf32>
    %303 = vector.broadcast %302 : vector<1x32xf32> to vector<2x32xf32>
    %304 = arith.addf %300, %303 : vector<2x32xf32>
    %305 = vector.extract_strided_slice %246 {offsets = [0, 64], sizes = [2, 32], strides = [1, 1]} : vector<2x96xf32> to vector<2x32xf32>
    %306 = vector.extract_strided_slice %4 {offsets = [1, 0, 0], sizes = [1, 1, 32], strides = [1, 1, 1]} : vector<3x1x32xf32> to vector<1x1x32xf32>
    %307 = vector.shape_cast %306 : vector<1x1x32xf32> to vector<1x32xf32>
    %308 = vector.broadcast %307 : vector<1x32xf32> to vector<2x32xf32>
    %309 = arith.addf %305, %308 : vector<2x32xf32>
    %310 = arith.mulf %298, %309 : vector<2x32xf32>
    %311 = arith.addf %304, %310 : vector<2x32xf32>
    %312 = math.tanh %311 : vector<2x32xf32>
    %cst_70 = arith.constant 1.000000e+00 : f32
    %313 = vector.broadcast %cst_70 : f32 to vector<2x32xf32>
    %314 = arith.subf %313, %299 : vector<2x32xf32>
    %315 = arith.mulf %314, %312 : vector<2x32xf32>
    %316 = arith.mulf %299, %203 : vector<2x32xf32>
    %317 = arith.addf %315, %316 : vector<2x32xf32>
    %c1_71 = arith.constant 1 : index
    %c0_72 = arith.constant 0 : index
    %c0_73 = arith.constant 0 : index
    %318 = vector.load %arg4[%c1_71, %c0_72, %c0_73] : memref<2x32x96xf32, #tpu.memory_space<vmem>>, vector<1x32x96xf32>
    %319 = vector.shape_cast %318 : vector<1x32x96xf32> to vector<32x96xf32>
    %cst_74 = arith.constant dense<0.000000e+00> : vector<2x96xf32>
    %320 = tpu.matmul %317, %319, %cst_74 {dimension_numbers = #tpu.dot_dimension_numbers<[1], [0], [0], [1], [0, 0, 1, 1], [], []>} : vector<2x32xf32>, vector<32x96xf32>, vector<2x96xf32> -> vector<2x96xf32>
    %321 = vector.extract_strided_slice %320 {offsets = [0, 0], sizes = [2, 64], strides = [1, 1]} : vector<2x96xf32> to vector<2x64xf32>
    %322 = vector.extract_strided_slice %249 {offsets = [0, 0], sizes = [2, 64], strides = [1, 1]} : vector<2x96xf32> to vector<2x64xf32>
    %323 = arith.addf %321, %322 : vector<2x64xf32>
    %324 = vector.extract_strided_slice %2 {offsets = [2, 0, 0], sizes = [1, 1, 64], strides = [1, 1, 1]} : vector<3x1x64xf32> to vector<1x1x64xf32>
    %325 = vector.shape_cast %324 : vector<1x1x64xf32> to vector<1x64xf32>
    %326 = vector.broadcast %325 : vector<1x64xf32> to vector<2x64xf32>
    %327 = arith.addf %323, %326 : vector<2x64xf32>
    %328 = arith.negf %327 : vector<2x64xf32>
    %329 = math.exp %328 : vector<2x64xf32>
    %cst_75 = arith.constant 1.000000e+00 : f32
    %330 = vector.broadcast %cst_75 : f32 to vector<2x64xf32>
    %331 = arith.addf %330, %329 : vector<2x64xf32>
    %332 = arith.divf %330, %331 : vector<2x64xf32>
    %333 = vector.extract_strided_slice %332 {offsets = [0, 0], sizes = [2, 32], strides = [1, 1]} : vector<2x64xf32> to vector<2x32xf32>
    %334 = vector.extract_strided_slice %332 {offsets = [0, 32], sizes = [2, 32], strides = [1, 1]} : vector<2x64xf32> to vector<2x32xf32>
    %335 = vector.extract_strided_slice %320 {offsets = [0, 64], sizes = [2, 32], strides = [1, 1]} : vector<2x96xf32> to vector<2x32xf32>
    %336 = vector.extract_strided_slice %3 {offsets = [2, 0, 0], sizes = [1, 1, 32], strides = [1, 1, 1]} : vector<3x1x32xf32> to vector<1x1x32xf32>
    %337 = vector.shape_cast %336 : vector<1x1x32xf32> to vector<1x32xf32>
    %338 = vector.broadcast %337 : vector<1x32xf32> to vector<2x32xf32>
    %339 = arith.addf %335, %338 : vector<2x32xf32>
    %340 = vector.extract_strided_slice %249 {offsets = [0, 64], sizes = [2, 32], strides = [1, 1]} : vector<2x96xf32> to vector<2x32xf32>
    %341 = vector.extract_strided_slice %4 {offsets = [2, 0, 0], sizes = [1, 1, 32], strides = [1, 1, 1]} : vector<3x1x32xf32> to vector<1x1x32xf32>
    %342 = vector.shape_cast %341 : vector<1x1x32xf32> to vector<1x32xf32>
    %343 = vector.broadcast %342 : vector<1x32xf32> to vector<2x32xf32>
    %344 = arith.addf %340, %343 : vector<2x32xf32>
    %345 = arith.mulf %333, %344 : vector<2x32xf32>
    %346 = arith.addf %339, %345 : vector<2x32xf32>
    %347 = math.tanh %346 : vector<2x32xf32>
    %cst_76 = arith.constant 1.000000e+00 : f32
    %348 = vector.broadcast %cst_76 : f32 to vector<2x32xf32>
    %349 = arith.subf %348, %334 : vector<2x32xf32>
    %350 = arith.mulf %349, %347 : vector<2x32xf32>
    %351 = arith.mulf %334, %238 : vector<2x32xf32>
    %352 = arith.addf %350, %351 : vector<2x32xf32>
    %353 = vector.extract_strided_slice %352 {offsets = [1, 0], sizes = [1, 32], strides = [1, 1]} : vector<2x32xf32> to vector<1x32xf32>
    %c2_77 = arith.constant 2 : index
    %c0_78 = arith.constant 0 : index
    %354 = vector.load %arg13[%c2_77, %c0_78] : memref<8x32xf32, #tpu.memory_space<vmem>>, vector<1x32xf32>
    tpu.vector_store %arg13[%c2_77, %c0_78], %353 {strides = array<i32>} : memref<8x32xf32, #tpu.memory_space<vmem>>, vector<1x32xf32>,
    %355 = vector.extract_strided_slice %1 {offsets = [0, 0, 0], sizes = [1, 32, 96], strides = [1, 1, 1]} : vector<3x32x96xf32> to vector<1x32x96xf32>
    %356 = vector.shape_cast %355 : vector<1x32x96xf32> to vector<32x96xf32>
    %cst_79 = arith.constant dense<0.000000e+00> : vector<2x96xf32>
    %357 = tpu.matmul %282, %356, %cst_79 {dimension_numbers = #tpu.dot_dimension_numbers<[1], [0], [0], [1], [0, 0, 1, 1], [], []>} : vector<2x32xf32>, vector<32x96xf32>, vector<2x96xf32> -> vector<2x96xf32>
    %358 = vector.extract_strided_slice %1 {offsets = [1, 0, 0], sizes = [1, 32, 96], strides = [1, 1, 1]} : vector<3x32x96xf32> to vector<1x32x96xf32>
    %359 = vector.shape_cast %358 : vector<1x32x96xf32> to vector<32x96xf32>
    %cst_80 = arith.constant dense<0.000000e+00> : vector<2x96xf32>
    %360 = tpu.matmul %317, %359, %cst_80 {dimension_numbers = #tpu.dot_dimension_numbers<[1], [0], [0], [1], [0, 0, 1, 1], [], []>} : vector<2x32xf32>, vector<32x96xf32>, vector<2x96xf32> -> vector<2x96xf32>
    %361 = vector.extract_strided_slice %1 {offsets = [2, 0, 0], sizes = [1, 32, 96], strides = [1, 1, 1]} : vector<3x32x96xf32> to vector<1x32x96xf32>
    %362 = vector.shape_cast %361 : vector<1x32x96xf32> to vector<32x96xf32>
    %cst_81 = arith.constant dense<0.000000e+00> : vector<2x96xf32>
    %363 = tpu.matmul %352, %362, %cst_81 {dimension_numbers = #tpu.dot_dimension_numbers<[1], [0], [0], [1], [0, 0, 1, 1], [], []>} : vector<2x32xf32>, vector<32x96xf32>, vector<2x96xf32> -> vector<2x96xf32>
    %364 = vector.extract_strided_slice %6 {offsets = [6, 0], sizes = [2, 96], strides = [1, 1]} : vector<16x96xf32> to vector<2x96xf32>
    %365 = vector.extract_strided_slice %364 {offsets = [0, 0], sizes = [2, 64], strides = [1, 1]} : vector<2x96xf32> to vector<2x64xf32>
    %366 = vector.extract_strided_slice %357 {offsets = [0, 0], sizes = [2, 64], strides = [1, 1]} : vector<2x96xf32> to vector<2x64xf32>
    %367 = arith.addf %365, %366 : vector<2x64xf32>
    %368 = vector.extract_strided_slice %2 {offsets = [0, 0, 0], sizes = [1, 1, 64], strides = [1, 1, 1]} : vector<3x1x64xf32> to vector<1x1x64xf32>
    %369 = vector.shape_cast %368 : vector<1x1x64xf32> to vector<1x64xf32>
    %370 = vector.broadcast %369 : vector<1x64xf32> to vector<2x64xf32>
    %371 = arith.addf %367, %370 : vector<2x64xf32>
    %372 = arith.negf %371 : vector<2x64xf32>
    %373 = math.exp %372 : vector<2x64xf32>
    %cst_82 = arith.constant 1.000000e+00 : f32
    %374 = vector.broadcast %cst_82 : f32 to vector<2x64xf32>
    %375 = arith.addf %374, %373 : vector<2x64xf32>
    %376 = arith.divf %374, %375 : vector<2x64xf32>
    %377 = vector.extract_strided_slice %376 {offsets = [0, 0], sizes = [2, 32], strides = [1, 1]} : vector<2x64xf32> to vector<2x32xf32>
    %378 = vector.extract_strided_slice %376 {offsets = [0, 32], sizes = [2, 32], strides = [1, 1]} : vector<2x64xf32> to vector<2x32xf32>
    %379 = vector.extract_strided_slice %364 {offsets = [0, 64], sizes = [2, 32], strides = [1, 1]} : vector<2x96xf32> to vector<2x32xf32>
    %380 = vector.extract_strided_slice %3 {offsets = [0, 0, 0], sizes = [1, 1, 32], strides = [1, 1, 1]} : vector<3x1x32xf32> to vector<1x1x32xf32>
    %381 = vector.shape_cast %380 : vector<1x1x32xf32> to vector<1x32xf32>
    %382 = vector.broadcast %381 : vector<1x32xf32> to vector<2x32xf32>
    %383 = arith.addf %379, %382 : vector<2x32xf32>
    %384 = vector.extract_strided_slice %357 {offsets = [0, 64], sizes = [2, 32], strides = [1, 1]} : vector<2x96xf32> to vector<2x32xf32>
    %385 = vector.extract_strided_slice %4 {offsets = [0, 0, 0], sizes = [1, 1, 32], strides = [1, 1, 1]} : vector<3x1x32xf32> to vector<1x1x32xf32>
    %386 = vector.shape_cast %385 : vector<1x1x32xf32> to vector<1x32xf32>
    %387 = vector.broadcast %386 : vector<1x32xf32> to vector<2x32xf32>
    %388 = arith.addf %384, %387 : vector<2x32xf32>
    %389 = arith.mulf %377, %388 : vector<2x32xf32>
    %390 = arith.addf %383, %389 : vector<2x32xf32>
    %391 = math.tanh %390 : vector<2x32xf32>
    %cst_83 = arith.constant 1.000000e+00 : f32
    %392 = vector.broadcast %cst_83 : f32 to vector<2x32xf32>
    %393 = arith.subf %392, %378 : vector<2x32xf32>
    %394 = arith.mulf %393, %391 : vector<2x32xf32>
    %395 = arith.mulf %378, %282 : vector<2x32xf32>
    %396 = arith.addf %394, %395 : vector<2x32xf32>
    %c0_84 = arith.constant 0 : index
    %c0_85 = arith.constant 0 : index
    %c0_86 = arith.constant 0 : index
    %397 = vector.load %arg4[%c0_84, %c0_85, %c0_86] : memref<2x32x96xf32, #tpu.memory_space<vmem>>, vector<1x32x96xf32>
    %398 = vector.shape_cast %397 : vector<1x32x96xf32> to vector<32x96xf32>
    %cst_87 = arith.constant dense<0.000000e+00> : vector<2x96xf32>
    %399 = tpu.matmul %396, %398, %cst_87 {dimension_numbers = #tpu.dot_dimension_numbers<[1], [0], [0], [1], [0, 0, 1, 1], [], []>} : vector<2x32xf32>, vector<32x96xf32>, vector<2x96xf32> -> vector<2x96xf32>
    %400 = vector.extract_strided_slice %399 {offsets = [0, 0], sizes = [2, 64], strides = [1, 1]} : vector<2x96xf32> to vector<2x64xf32>
    %401 = vector.extract_strided_slice %360 {offsets = [0, 0], sizes = [2, 64], strides = [1, 1]} : vector<2x96xf32> to vector<2x64xf32>
    %402 = arith.addf %400, %401 : vector<2x64xf32>
    %403 = vector.extract_strided_slice %2 {offsets = [1, 0, 0], sizes = [1, 1, 64], strides = [1, 1, 1]} : vector<3x1x64xf32> to vector<1x1x64xf32>
    %404 = vector.shape_cast %403 : vector<1x1x64xf32> to vector<1x64xf32>
    %405 = vector.broadcast %404 : vector<1x64xf32> to vector<2x64xf32>
    %406 = arith.addf %402, %405 : vector<2x64xf32>
    %407 = arith.negf %406 : vector<2x64xf32>
    %408 = math.exp %407 : vector<2x64xf32>
    %cst_88 = arith.constant 1.000000e+00 : f32
    %409 = vector.broadcast %cst_88 : f32 to vector<2x64xf32>
    %410 = arith.addf %409, %408 : vector<2x64xf32>
    %411 = arith.divf %409, %410 : vector<2x64xf32>
    %412 = vector.extract_strided_slice %411 {offsets = [0, 0], sizes = [2, 32], strides = [1, 1]} : vector<2x64xf32> to vector<2x32xf32>
    %413 = vector.extract_strided_slice %411 {offsets = [0, 32], sizes = [2, 32], strides = [1, 1]} : vector<2x64xf32> to vector<2x32xf32>
    %414 = vector.extract_strided_slice %399 {offsets = [0, 64], sizes = [2, 32], strides = [1, 1]} : vector<2x96xf32> to vector<2x32xf32>
    %415 = vector.extract_strided_slice %3 {offsets = [1, 0, 0], sizes = [1, 1, 32], strides = [1, 1, 1]} : vector<3x1x32xf32> to vector<1x1x32xf32>
    %416 = vector.shape_cast %415 : vector<1x1x32xf32> to vector<1x32xf32>
    %417 = vector.broadcast %416 : vector<1x32xf32> to vector<2x32xf32>
    %418 = arith.addf %414, %417 : vector<2x32xf32>
    %419 = vector.extract_strided_slice %360 {offsets = [0, 64], sizes = [2, 32], strides = [1, 1]} : vector<2x96xf32> to vector<2x32xf32>
    %420 = vector.extract_strided_slice %4 {offsets = [1, 0, 0], sizes = [1, 1, 32], strides = [1, 1, 1]} : vector<3x1x32xf32> to vector<1x1x32xf32>
    %421 = vector.shape_cast %420 : vector<1x1x32xf32> to vector<1x32xf32>
    %422 = vector.broadcast %421 : vector<1x32xf32> to vector<2x32xf32>
    %423 = arith.addf %419, %422 : vector<2x32xf32>
    %424 = arith.mulf %412, %423 : vector<2x32xf32>
    %425 = arith.addf %418, %424 : vector<2x32xf32>
    %426 = math.tanh %425 : vector<2x32xf32>
    %cst_89 = arith.constant 1.000000e+00 : f32
    %427 = vector.broadcast %cst_89 : f32 to vector<2x32xf32>
    %428 = arith.subf %427, %413 : vector<2x32xf32>
    %429 = arith.mulf %428, %426 : vector<2x32xf32>
    %430 = arith.mulf %413, %317 : vector<2x32xf32>
    %431 = arith.addf %429, %430 : vector<2x32xf32>
    %c1_90 = arith.constant 1 : index
    %c0_91 = arith.constant 0 : index
    %c0_92 = arith.constant 0 : index
    %432 = vector.load %arg4[%c1_90, %c0_91, %c0_92] : memref<2x32x96xf32, #tpu.memory_space<vmem>>, vector<1x32x96xf32>
    %433 = vector.shape_cast %432 : vector<1x32x96xf32> to vector<32x96xf32>
    %cst_93 = arith.constant dense<0.000000e+00> : vector<2x96xf32>
    %434 = tpu.matmul %431, %433, %cst_93 {dimension_numbers = #tpu.dot_dimension_numbers<[1], [0], [0], [1], [0, 0, 1, 1], [], []>} : vector<2x32xf32>, vector<32x96xf32>, vector<2x96xf32> -> vector<2x96xf32>
    %435 = vector.extract_strided_slice %434 {offsets = [0, 0], sizes = [2, 64], strides = [1, 1]} : vector<2x96xf32> to vector<2x64xf32>
    %436 = vector.extract_strided_slice %363 {offsets = [0, 0], sizes = [2, 64], strides = [1, 1]} : vector<2x96xf32> to vector<2x64xf32>
    %437 = arith.addf %435, %436 : vector<2x64xf32>
    %438 = vector.extract_strided_slice %2 {offsets = [2, 0, 0], sizes = [1, 1, 64], strides = [1, 1, 1]} : vector<3x1x64xf32> to vector<1x1x64xf32>
    %439 = vector.shape_cast %438 : vector<1x1x64xf32> to vector<1x64xf32>
    %440 = vector.broadcast %439 : vector<1x64xf32> to vector<2x64xf32>
    %441 = arith.addf %437, %440 : vector<2x64xf32>
    %442 = arith.negf %441 : vector<2x64xf32>
    %443 = math.exp %442 : vector<2x64xf32>
    %cst_94 = arith.constant 1.000000e+00 : f32
    %444 = vector.broadcast %cst_94 : f32 to vector<2x64xf32>
    %445 = arith.addf %444, %443 : vector<2x64xf32>
    %446 = arith.divf %444, %445 : vector<2x64xf32>
    %447 = vector.extract_strided_slice %446 {offsets = [0, 0], sizes = [2, 32], strides = [1, 1]} : vector<2x64xf32> to vector<2x32xf32>
    %448 = vector.extract_strided_slice %446 {offsets = [0, 32], sizes = [2, 32], strides = [1, 1]} : vector<2x64xf32> to vector<2x32xf32>
    %449 = vector.extract_strided_slice %434 {offsets = [0, 64], sizes = [2, 32], strides = [1, 1]} : vector<2x96xf32> to vector<2x32xf32>
    %450 = vector.extract_strided_slice %3 {offsets = [2, 0, 0], sizes = [1, 1, 32], strides = [1, 1, 1]} : vector<3x1x32xf32> to vector<1x1x32xf32>
    %451 = vector.shape_cast %450 : vector<1x1x32xf32> to vector<1x32xf32>
    %452 = vector.broadcast %451 : vector<1x32xf32> to vector<2x32xf32>
    %453 = arith.addf %449, %452 : vector<2x32xf32>
    %454 = vector.extract_strided_slice %363 {offsets = [0, 64], sizes = [2, 32], strides = [1, 1]} : vector<2x96xf32> to vector<2x32xf32>
    %455 = vector.extract_strided_slice %4 {offsets = [2, 0, 0], sizes = [1, 1, 32], strides = [1, 1, 1]} : vector<3x1x32xf32> to vector<1x1x32xf32>
    %456 = vector.shape_cast %455 : vector<1x1x32xf32> to vector<1x32xf32>
    %457 = vector.broadcast %456 : vector<1x32xf32> to vector<2x32xf32>
    %458 = arith.addf %454, %457 : vector<2x32xf32>
    %459 = arith.mulf %447, %458 : vector<2x32xf32>
    %460 = arith.addf %453, %459 : vector<2x32xf32>
    %461 = math.tanh %460 : vector<2x32xf32>
    %cst_95 = arith.constant 1.000000e+00 : f32
    %462 = vector.broadcast %cst_95 : f32 to vector<2x32xf32>
    %463 = arith.subf %462, %448 : vector<2x32xf32>
    %464 = arith.mulf %463, %461 : vector<2x32xf32>
    %465 = arith.mulf %448, %352 : vector<2x32xf32>
    %466 = arith.addf %464, %465 : vector<2x32xf32>
    %467 = vector.extract_strided_slice %466 {offsets = [1, 0], sizes = [1, 32], strides = [1, 1]} : vector<2x32xf32> to vector<1x32xf32>
    %c3 = arith.constant 3 : index
    %c0_96 = arith.constant 0 : index
    %468 = vector.load %arg13[%c3, %c0_96] : memref<8x32xf32, #tpu.memory_space<vmem>>, vector<1x32xf32>
    tpu.vector_store %arg13[%c3, %c0_96], %467 {strides = array<i32>} : memref<8x32xf32, #tpu.memory_space<vmem>>, vector<1x32xf32>,
    %469 = vector.extract_strided_slice %1 {offsets = [0, 0, 0], sizes = [1, 32, 96], strides = [1, 1, 1]} : vector<3x32x96xf32> to vector<1x32x96xf32>
    %470 = vector.shape_cast %469 : vector<1x32x96xf32> to vector<32x96xf32>
    %cst_97 = arith.constant dense<0.000000e+00> : vector<2x96xf32>
    %471 = tpu.matmul %396, %470, %cst_97 {dimension_numbers = #tpu.dot_dimension_numbers<[1], [0], [0], [1], [0, 0, 1, 1], [], []>} : vector<2x32xf32>, vector<32x96xf32>, vector<2x96xf32> -> vector<2x96xf32>
    %472 = vector.extract_strided_slice %1 {offsets = [1, 0, 0], sizes = [1, 32, 96], strides = [1, 1, 1]} : vector<3x32x96xf32> to vector<1x32x96xf32>
    %473 = vector.shape_cast %472 : vector<1x32x96xf32> to vector<32x96xf32>
    %cst_98 = arith.constant dense<0.000000e+00> : vector<2x96xf32>
    %474 = tpu.matmul %431, %473, %cst_98 {dimension_numbers = #tpu.dot_dimension_numbers<[1], [0], [0], [1], [0, 0, 1, 1], [], []>} : vector<2x32xf32>, vector<32x96xf32>, vector<2x96xf32> -> vector<2x96xf32>
    %475 = vector.extract_strided_slice %1 {offsets = [2, 0, 0], sizes = [1, 32, 96], strides = [1, 1, 1]} : vector<3x32x96xf32> to vector<1x32x96xf32>
    %476 = vector.shape_cast %475 : vector<1x32x96xf32> to vector<32x96xf32>
    %cst_99 = arith.constant dense<0.000000e+00> : vector<2x96xf32>
    %477 = tpu.matmul %466, %476, %cst_99 {dimension_numbers = #tpu.dot_dimension_numbers<[1], [0], [0], [1], [0, 0, 1, 1], [], []>} : vector<2x32xf32>, vector<32x96xf32>, vector<2x96xf32> -> vector<2x96xf32>
    %478 = vector.extract_strided_slice %6 {offsets = [8, 0], sizes = [2, 96], strides = [1, 1]} : vector<16x96xf32> to vector<2x96xf32>
    %479 = vector.extract_strided_slice %478 {offsets = [0, 0], sizes = [2, 64], strides = [1, 1]} : vector<2x96xf32> to vector<2x64xf32>
    %480 = vector.extract_strided_slice %471 {offsets = [0, 0], sizes = [2, 64], strides = [1, 1]} : vector<2x96xf32> to vector<2x64xf32>
    %481 = arith.addf %479, %480 : vector<2x64xf32>
    %482 = vector.extract_strided_slice %2 {offsets = [0, 0, 0], sizes = [1, 1, 64], strides = [1, 1, 1]} : vector<3x1x64xf32> to vector<1x1x64xf32>
    %483 = vector.shape_cast %482 : vector<1x1x64xf32> to vector<1x64xf32>
    %484 = vector.broadcast %483 : vector<1x64xf32> to vector<2x64xf32>
    %485 = arith.addf %481, %484 : vector<2x64xf32>
    %486 = arith.negf %485 : vector<2x64xf32>
    %487 = math.exp %486 : vector<2x64xf32>
    %cst_100 = arith.constant 1.000000e+00 : f32
    %488 = vector.broadcast %cst_100 : f32 to vector<2x64xf32>
    %489 = arith.addf %488, %487 : vector<2x64xf32>
    %490 = arith.divf %488, %489 : vector<2x64xf32>
    %491 = vector.extract_strided_slice %490 {offsets = [0, 0], sizes = [2, 32], strides = [1, 1]} : vector<2x64xf32> to vector<2x32xf32>
    %492 = vector.extract_strided_slice %490 {offsets = [0, 32], sizes = [2, 32], strides = [1, 1]} : vector<2x64xf32> to vector<2x32xf32>
    %493 = vector.extract_strided_slice %478 {offsets = [0, 64], sizes = [2, 32], strides = [1, 1]} : vector<2x96xf32> to vector<2x32xf32>
    %494 = vector.extract_strided_slice %3 {offsets = [0, 0, 0], sizes = [1, 1, 32], strides = [1, 1, 1]} : vector<3x1x32xf32> to vector<1x1x32xf32>
    %495 = vector.shape_cast %494 : vector<1x1x32xf32> to vector<1x32xf32>
    %496 = vector.broadcast %495 : vector<1x32xf32> to vector<2x32xf32>
    %497 = arith.addf %493, %496 : vector<2x32xf32>
    %498 = vector.extract_strided_slice %471 {offsets = [0, 64], sizes = [2, 32], strides = [1, 1]} : vector<2x96xf32> to vector<2x32xf32>
    %499 = vector.extract_strided_slice %4 {offsets = [0, 0, 0], sizes = [1, 1, 32], strides = [1, 1, 1]} : vector<3x1x32xf32> to vector<1x1x32xf32>
    %500 = vector.shape_cast %499 : vector<1x1x32xf32> to vector<1x32xf32>
    %501 = vector.broadcast %500 : vector<1x32xf32> to vector<2x32xf32>
    %502 = arith.addf %498, %501 : vector<2x32xf32>
    %503 = arith.mulf %491, %502 : vector<2x32xf32>
    %504 = arith.addf %497, %503 : vector<2x32xf32>
    %505 = math.tanh %504 : vector<2x32xf32>
    %cst_101 = arith.constant 1.000000e+00 : f32
    %506 = vector.broadcast %cst_101 : f32 to vector<2x32xf32>
    %507 = arith.subf %506, %492 : vector<2x32xf32>
    %508 = arith.mulf %507, %505 : vector<2x32xf32>
    %509 = arith.mulf %492, %396 : vector<2x32xf32>
    %510 = arith.addf %508, %509 : vector<2x32xf32>
    %c0_102 = arith.constant 0 : index
    %c0_103 = arith.constant 0 : index
    %c0_104 = arith.constant 0 : index
    %511 = vector.load %arg4[%c0_102, %c0_103, %c0_104] : memref<2x32x96xf32, #tpu.memory_space<vmem>>, vector<1x32x96xf32>
    %512 = vector.shape_cast %511 : vector<1x32x96xf32> to vector<32x96xf32>
    %cst_105 = arith.constant dense<0.000000e+00> : vector<2x96xf32>
    %513 = tpu.matmul %510, %512, %cst_105 {dimension_numbers = #tpu.dot_dimension_numbers<[1], [0], [0], [1], [0, 0, 1, 1], [], []>} : vector<2x32xf32>, vector<32x96xf32>, vector<2x96xf32> -> vector<2x96xf32>
    %514 = vector.extract_strided_slice %513 {offsets = [0, 0], sizes = [2, 64], strides = [1, 1]} : vector<2x96xf32> to vector<2x64xf32>
    %515 = vector.extract_strided_slice %474 {offsets = [0, 0], sizes = [2, 64], strides = [1, 1]} : vector<2x96xf32> to vector<2x64xf32>
    %516 = arith.addf %514, %515 : vector<2x64xf32>
    %517 = vector.extract_strided_slice %2 {offsets = [1, 0, 0], sizes = [1, 1, 64], strides = [1, 1, 1]} : vector<3x1x64xf32> to vector<1x1x64xf32>
    %518 = vector.shape_cast %517 : vector<1x1x64xf32> to vector<1x64xf32>
    %519 = vector.broadcast %518 : vector<1x64xf32> to vector<2x64xf32>
    %520 = arith.addf %516, %519 : vector<2x64xf32>
    %521 = arith.negf %520 : vector<2x64xf32>
    %522 = math.exp %521 : vector<2x64xf32>
    %cst_106 = arith.constant 1.000000e+00 : f32
    %523 = vector.broadcast %cst_106 : f32 to vector<2x64xf32>
    %524 = arith.addf %523, %522 : vector<2x64xf32>
    %525 = arith.divf %523, %524 : vector<2x64xf32>
    %526 = vector.extract_strided_slice %525 {offsets = [0, 0], sizes = [2, 32], strides = [1, 1]} : vector<2x64xf32> to vector<2x32xf32>
    %527 = vector.extract_strided_slice %525 {offsets = [0, 32], sizes = [2, 32], strides = [1, 1]} : vector<2x64xf32> to vector<2x32xf32>
    %528 = vector.extract_strided_slice %513 {offsets = [0, 64], sizes = [2, 32], strides = [1, 1]} : vector<2x96xf32> to vector<2x32xf32>
    %529 = vector.extract_strided_slice %3 {offsets = [1, 0, 0], sizes = [1, 1, 32], strides = [1, 1, 1]} : vector<3x1x32xf32> to vector<1x1x32xf32>
    %530 = vector.shape_cast %529 : vector<1x1x32xf32> to vector<1x32xf32>
    %531 = vector.broadcast %530 : vector<1x32xf32> to vector<2x32xf32>
    %532 = arith.addf %528, %531 : vector<2x32xf32>
    %533 = vector.extract_strided_slice %474 {offsets = [0, 64], sizes = [2, 32], strides = [1, 1]} : vector<2x96xf32> to vector<2x32xf32>
    %534 = vector.extract_strided_slice %4 {offsets = [1, 0, 0], sizes = [1, 1, 32], strides = [1, 1, 1]} : vector<3x1x32xf32> to vector<1x1x32xf32>
    %535 = vector.shape_cast %534 : vector<1x1x32xf32> to vector<1x32xf32>
    %536 = vector.broadcast %535 : vector<1x32xf32> to vector<2x32xf32>
    %537 = arith.addf %533, %536 : vector<2x32xf32>
    %538 = arith.mulf %526, %537 : vector<2x32xf32>
    %539 = arith.addf %532, %538 : vector<2x32xf32>
    %540 = math.tanh %539 : vector<2x32xf32>
    %cst_107 = arith.constant 1.000000e+00 : f32
    %541 = vector.broadcast %cst_107 : f32 to vector<2x32xf32>
    %542 = arith.subf %541, %527 : vector<2x32xf32>
    %543 = arith.mulf %542, %540 : vector<2x32xf32>
    %544 = arith.mulf %527, %431 : vector<2x32xf32>
    %545 = arith.addf %543, %544 : vector<2x32xf32>
    %c1_108 = arith.constant 1 : index
    %c0_109 = arith.constant 0 : index
    %c0_110 = arith.constant 0 : index
    %546 = vector.load %arg4[%c1_108, %c0_109, %c0_110] : memref<2x32x96xf32, #tpu.memory_space<vmem>>, vector<1x32x96xf32>
    %547 = vector.shape_cast %546 : vector<1x32x96xf32> to vector<32x96xf32>
    %cst_111 = arith.constant dense<0.000000e+00> : vector<2x96xf32>
    %548 = tpu.matmul %545, %547, %cst_111 {dimension_numbers = #tpu.dot_dimension_numbers<[1], [0], [0], [1], [0, 0, 1, 1], [], []>} : vector<2x32xf32>, vector<32x96xf32>, vector<2x96xf32> -> vector<2x96xf32>
    %549 = vector.extract_strided_slice %548 {offsets = [0, 0], sizes = [2, 64], strides = [1, 1]} : vector<2x96xf32> to vector<2x64xf32>
    %550 = vector.extract_strided_slice %477 {offsets = [0, 0], sizes = [2, 64], strides = [1, 1]} : vector<2x96xf32> to vector<2x64xf32>
    %551 = arith.addf %549, %550 : vector<2x64xf32>
    %552 = vector.extract_strided_slice %2 {offsets = [2, 0, 0], sizes = [1, 1, 64], strides = [1, 1, 1]} : vector<3x1x64xf32> to vector<1x1x64xf32>
    %553 = vector.shape_cast %552 : vector<1x1x64xf32> to vector<1x64xf32>
    %554 = vector.broadcast %553 : vector<1x64xf32> to vector<2x64xf32>
    %555 = arith.addf %551, %554 : vector<2x64xf32>
    %556 = arith.negf %555 : vector<2x64xf32>
    %557 = math.exp %556 : vector<2x64xf32>
    %cst_112 = arith.constant 1.000000e+00 : f32
    %558 = vector.broadcast %cst_112 : f32 to vector<2x64xf32>
    %559 = arith.addf %558, %557 : vector<2x64xf32>
    %560 = arith.divf %558, %559 : vector<2x64xf32>
    %561 = vector.extract_strided_slice %560 {offsets = [0, 0], sizes = [2, 32], strides = [1, 1]} : vector<2x64xf32> to vector<2x32xf32>
    %562 = vector.extract_strided_slice %560 {offsets = [0, 32], sizes = [2, 32], strides = [1, 1]} : vector<2x64xf32> to vector<2x32xf32>
    %563 = vector.extract_strided_slice %548 {offsets = [0, 64], sizes = [2, 32], strides = [1, 1]} : vector<2x96xf32> to vector<2x32xf32>
    %564 = vector.extract_strided_slice %3 {offsets = [2, 0, 0], sizes = [1, 1, 32], strides = [1, 1, 1]} : vector<3x1x32xf32> to vector<1x1x32xf32>
    %565 = vector.shape_cast %564 : vector<1x1x32xf32> to vector<1x32xf32>
    %566 = vector.broadcast %565 : vector<1x32xf32> to vector<2x32xf32>
    %567 = arith.addf %563, %566 : vector<2x32xf32>
    %568 = vector.extract_strided_slice %477 {offsets = [0, 64], sizes = [2, 32], strides = [1, 1]} : vector<2x96xf32> to vector<2x32xf32>
    %569 = vector.extract_strided_slice %4 {offsets = [2, 0, 0], sizes = [1, 1, 32], strides = [1, 1, 1]} : vector<3x1x32xf32> to vector<1x1x32xf32>
    %570 = vector.shape_cast %569 : vector<1x1x32xf32> to vector<1x32xf32>
    %571 = vector.broadcast %570 : vector<1x32xf32> to vector<2x32xf32>
    %572 = arith.addf %568, %571 : vector<2x32xf32>
    %573 = arith.mulf %561, %572 : vector<2x32xf32>
    %574 = arith.addf %567, %573 : vector<2x32xf32>
    %575 = math.tanh %574 : vector<2x32xf32>
    %cst_113 = arith.constant 1.000000e+00 : f32
    %576 = vector.broadcast %cst_113 : f32 to vector<2x32xf32>
    %577 = arith.subf %576, %562 : vector<2x32xf32>
    %578 = arith.mulf %577, %575 : vector<2x32xf32>
    %579 = arith.mulf %562, %466 : vector<2x32xf32>
    %580 = arith.addf %578, %579 : vector<2x32xf32>
    %581 = vector.extract_strided_slice %580 {offsets = [1, 0], sizes = [1, 32], strides = [1, 1]} : vector<2x32xf32> to vector<1x32xf32>
    %c4 = arith.constant 4 : index
    %c0_114 = arith.constant 0 : index
    %582 = vector.load %arg13[%c4, %c0_114] : memref<8x32xf32, #tpu.memory_space<vmem>>, vector<1x32xf32>
    tpu.vector_store %arg13[%c4, %c0_114], %581 {strides = array<i32>} : memref<8x32xf32, #tpu.memory_space<vmem>>, vector<1x32xf32>,
    %583 = vector.extract_strided_slice %1 {offsets = [0, 0, 0], sizes = [1, 32, 96], strides = [1, 1, 1]} : vector<3x32x96xf32> to vector<1x32x96xf32>
    %584 = vector.shape_cast %583 : vector<1x32x96xf32> to vector<32x96xf32>
    %cst_115 = arith.constant dense<0.000000e+00> : vector<2x96xf32>
    %585 = tpu.matmul %510, %584, %cst_115 {dimension_numbers = #tpu.dot_dimension_numbers<[1], [0], [0], [1], [0, 0, 1, 1], [], []>} : vector<2x32xf32>, vector<32x96xf32>, vector<2x96xf32> -> vector<2x96xf32>
    %586 = vector.extract_strided_slice %1 {offsets = [1, 0, 0], sizes = [1, 32, 96], strides = [1, 1, 1]} : vector<3x32x96xf32> to vector<1x32x96xf32>
    %587 = vector.shape_cast %586 : vector<1x32x96xf32> to vector<32x96xf32>
    %cst_116 = arith.constant dense<0.000000e+00> : vector<2x96xf32>
    %588 = tpu.matmul %545, %587, %cst_116 {dimension_numbers = #tpu.dot_dimension_numbers<[1], [0], [0], [1], [0, 0, 1, 1], [], []>} : vector<2x32xf32>, vector<32x96xf32>, vector<2x96xf32> -> vector<2x96xf32>
    %589 = vector.extract_strided_slice %1 {offsets = [2, 0, 0], sizes = [1, 32, 96], strides = [1, 1, 1]} : vector<3x32x96xf32> to vector<1x32x96xf32>
    %590 = vector.shape_cast %589 : vector<1x32x96xf32> to vector<32x96xf32>
    %cst_117 = arith.constant dense<0.000000e+00> : vector<2x96xf32>
    %591 = tpu.matmul %580, %590, %cst_117 {dimension_numbers = #tpu.dot_dimension_numbers<[1], [0], [0], [1], [0, 0, 1, 1], [], []>} : vector<2x32xf32>, vector<32x96xf32>, vector<2x96xf32> -> vector<2x96xf32>
    %592 = vector.extract_strided_slice %6 {offsets = [10, 0], sizes = [2, 96], strides = [1, 1]} : vector<16x96xf32> to vector<2x96xf32>
    %593 = vector.extract_strided_slice %592 {offsets = [0, 0], sizes = [2, 64], strides = [1, 1]} : vector<2x96xf32> to vector<2x64xf32>
    %594 = vector.extract_strided_slice %585 {offsets = [0, 0], sizes = [2, 64], strides = [1, 1]} : vector<2x96xf32> to vector<2x64xf32>
    %595 = arith.addf %593, %594 : vector<2x64xf32>
    %596 = vector.extract_strided_slice %2 {offsets = [0, 0, 0], sizes = [1, 1, 64], strides = [1, 1, 1]} : vector<3x1x64xf32> to vector<1x1x64xf32>
    %597 = vector.shape_cast %596 : vector<1x1x64xf32> to vector<1x64xf32>
    %598 = vector.broadcast %597 : vector<1x64xf32> to vector<2x64xf32>
    %599 = arith.addf %595, %598 : vector<2x64xf32>
    %600 = arith.negf %599 : vector<2x64xf32>
    %601 = math.exp %600 : vector<2x64xf32>
    %cst_118 = arith.constant 1.000000e+00 : f32
    %602 = vector.broadcast %cst_118 : f32 to vector<2x64xf32>
    %603 = arith.addf %602, %601 : vector<2x64xf32>
    %604 = arith.divf %602, %603 : vector<2x64xf32>
    %605 = vector.extract_strided_slice %604 {offsets = [0, 0], sizes = [2, 32], strides = [1, 1]} : vector<2x64xf32> to vector<2x32xf32>
    %606 = vector.extract_strided_slice %604 {offsets = [0, 32], sizes = [2, 32], strides = [1, 1]} : vector<2x64xf32> to vector<2x32xf32>
    %607 = vector.extract_strided_slice %592 {offsets = [0, 64], sizes = [2, 32], strides = [1, 1]} : vector<2x96xf32> to vector<2x32xf32>
    %608 = vector.extract_strided_slice %3 {offsets = [0, 0, 0], sizes = [1, 1, 32], strides = [1, 1, 1]} : vector<3x1x32xf32> to vector<1x1x32xf32>
    %609 = vector.shape_cast %608 : vector<1x1x32xf32> to vector<1x32xf32>
    %610 = vector.broadcast %609 : vector<1x32xf32> to vector<2x32xf32>
    %611 = arith.addf %607, %610 : vector<2x32xf32>
    %612 = vector.extract_strided_slice %585 {offsets = [0, 64], sizes = [2, 32], strides = [1, 1]} : vector<2x96xf32> to vector<2x32xf32>
    %613 = vector.extract_strided_slice %4 {offsets = [0, 0, 0], sizes = [1, 1, 32], strides = [1, 1, 1]} : vector<3x1x32xf32> to vector<1x1x32xf32>
    %614 = vector.shape_cast %613 : vector<1x1x32xf32> to vector<1x32xf32>
    %615 = vector.broadcast %614 : vector<1x32xf32> to vector<2x32xf32>
    %616 = arith.addf %612, %615 : vector<2x32xf32>
    %617 = arith.mulf %605, %616 : vector<2x32xf32>
    %618 = arith.addf %611, %617 : vector<2x32xf32>
    %619 = math.tanh %618 : vector<2x32xf32>
    %cst_119 = arith.constant 1.000000e+00 : f32
    %620 = vector.broadcast %cst_119 : f32 to vector<2x32xf32>
    %621 = arith.subf %620, %606 : vector<2x32xf32>
    %622 = arith.mulf %621, %619 : vector<2x32xf32>
    %623 = arith.mulf %606, %510 : vector<2x32xf32>
    %624 = arith.addf %622, %623 : vector<2x32xf32>
    %c0_120 = arith.constant 0 : index
    %c0_121 = arith.constant 0 : index
    %c0_122 = arith.constant 0 : index
    %625 = vector.load %arg4[%c0_120, %c0_121, %c0_122] : memref<2x32x96xf32, #tpu.memory_space<vmem>>, vector<1x32x96xf32>
    %626 = vector.shape_cast %625 : vector<1x32x96xf32> to vector<32x96xf32>
    %cst_123 = arith.constant dense<0.000000e+00> : vector<2x96xf32>
    %627 = tpu.matmul %624, %626, %cst_123 {dimension_numbers = #tpu.dot_dimension_numbers<[1], [0], [0], [1], [0, 0, 1, 1], [], []>} : vector<2x32xf32>, vector<32x96xf32>, vector<2x96xf32> -> vector<2x96xf32>
    %628 = vector.extract_strided_slice %627 {offsets = [0, 0], sizes = [2, 64], strides = [1, 1]} : vector<2x96xf32> to vector<2x64xf32>
    %629 = vector.extract_strided_slice %588 {offsets = [0, 0], sizes = [2, 64], strides = [1, 1]} : vector<2x96xf32> to vector<2x64xf32>
    %630 = arith.addf %628, %629 : vector<2x64xf32>
    %631 = vector.extract_strided_slice %2 {offsets = [1, 0, 0], sizes = [1, 1, 64], strides = [1, 1, 1]} : vector<3x1x64xf32> to vector<1x1x64xf32>
    %632 = vector.shape_cast %631 : vector<1x1x64xf32> to vector<1x64xf32>
    %633 = vector.broadcast %632 : vector<1x64xf32> to vector<2x64xf32>
    %634 = arith.addf %630, %633 : vector<2x64xf32>
    %635 = arith.negf %634 : vector<2x64xf32>
    %636 = math.exp %635 : vector<2x64xf32>
    %cst_124 = arith.constant 1.000000e+00 : f32
    %637 = vector.broadcast %cst_124 : f32 to vector<2x64xf32>
    %638 = arith.addf %637, %636 : vector<2x64xf32>
    %639 = arith.divf %637, %638 : vector<2x64xf32>
    %640 = vector.extract_strided_slice %639 {offsets = [0, 0], sizes = [2, 32], strides = [1, 1]} : vector<2x64xf32> to vector<2x32xf32>
    %641 = vector.extract_strided_slice %639 {offsets = [0, 32], sizes = [2, 32], strides = [1, 1]} : vector<2x64xf32> to vector<2x32xf32>
    %642 = vector.extract_strided_slice %627 {offsets = [0, 64], sizes = [2, 32], strides = [1, 1]} : vector<2x96xf32> to vector<2x32xf32>
    %643 = vector.extract_strided_slice %3 {offsets = [1, 0, 0], sizes = [1, 1, 32], strides = [1, 1, 1]} : vector<3x1x32xf32> to vector<1x1x32xf32>
    %644 = vector.shape_cast %643 : vector<1x1x32xf32> to vector<1x32xf32>
    %645 = vector.broadcast %644 : vector<1x32xf32> to vector<2x32xf32>
    %646 = arith.addf %642, %645 : vector<2x32xf32>
    %647 = vector.extract_strided_slice %588 {offsets = [0, 64], sizes = [2, 32], strides = [1, 1]} : vector<2x96xf32> to vector<2x32xf32>
    %648 = vector.extract_strided_slice %4 {offsets = [1, 0, 0], sizes = [1, 1, 32], strides = [1, 1, 1]} : vector<3x1x32xf32> to vector<1x1x32xf32>
    %649 = vector.shape_cast %648 : vector<1x1x32xf32> to vector<1x32xf32>
    %650 = vector.broadcast %649 : vector<1x32xf32> to vector<2x32xf32>
    %651 = arith.addf %647, %650 : vector<2x32xf32>
    %652 = arith.mulf %640, %651 : vector<2x32xf32>
    %653 = arith.addf %646, %652 : vector<2x32xf32>
    %654 = math.tanh %653 : vector<2x32xf32>
    %cst_125 = arith.constant 1.000000e+00 : f32
    %655 = vector.broadcast %cst_125 : f32 to vector<2x32xf32>
    %656 = arith.subf %655, %641 : vector<2x32xf32>
    %657 = arith.mulf %656, %654 : vector<2x32xf32>
    %658 = arith.mulf %641, %545 : vector<2x32xf32>
    %659 = arith.addf %657, %658 : vector<2x32xf32>
    %c1_126 = arith.constant 1 : index
    %c0_127 = arith.constant 0 : index
    %c0_128 = arith.constant 0 : index
    %660 = vector.load %arg4[%c1_126, %c0_127, %c0_128] : memref<2x32x96xf32, #tpu.memory_space<vmem>>, vector<1x32x96xf32>
    %661 = vector.shape_cast %660 : vector<1x32x96xf32> to vector<32x96xf32>
    %cst_129 = arith.constant dense<0.000000e+00> : vector<2x96xf32>
    %662 = tpu.matmul %659, %661, %cst_129 {dimension_numbers = #tpu.dot_dimension_numbers<[1], [0], [0], [1], [0, 0, 1, 1], [], []>} : vector<2x32xf32>, vector<32x96xf32>, vector<2x96xf32> -> vector<2x96xf32>
    %663 = vector.extract_strided_slice %662 {offsets = [0, 0], sizes = [2, 64], strides = [1, 1]} : vector<2x96xf32> to vector<2x64xf32>
    %664 = vector.extract_strided_slice %591 {offsets = [0, 0], sizes = [2, 64], strides = [1, 1]} : vector<2x96xf32> to vector<2x64xf32>
    %665 = arith.addf %663, %664 : vector<2x64xf32>
    %666 = vector.extract_strided_slice %2 {offsets = [2, 0, 0], sizes = [1, 1, 64], strides = [1, 1, 1]} : vector<3x1x64xf32> to vector<1x1x64xf32>
    %667 = vector.shape_cast %666 : vector<1x1x64xf32> to vector<1x64xf32>
    %668 = vector.broadcast %667 : vector<1x64xf32> to vector<2x64xf32>
    %669 = arith.addf %665, %668 : vector<2x64xf32>
    %670 = arith.negf %669 : vector<2x64xf32>
    %671 = math.exp %670 : vector<2x64xf32>
    %cst_130 = arith.constant 1.000000e+00 : f32
    %672 = vector.broadcast %cst_130 : f32 to vector<2x64xf32>
    %673 = arith.addf %672, %671 : vector<2x64xf32>
    %674 = arith.divf %672, %673 : vector<2x64xf32>
    %675 = vector.extract_strided_slice %674 {offsets = [0, 0], sizes = [2, 32], strides = [1, 1]} : vector<2x64xf32> to vector<2x32xf32>
    %676 = vector.extract_strided_slice %674 {offsets = [0, 32], sizes = [2, 32], strides = [1, 1]} : vector<2x64xf32> to vector<2x32xf32>
    %677 = vector.extract_strided_slice %662 {offsets = [0, 64], sizes = [2, 32], strides = [1, 1]} : vector<2x96xf32> to vector<2x32xf32>
    %678 = vector.extract_strided_slice %3 {offsets = [2, 0, 0], sizes = [1, 1, 32], strides = [1, 1, 1]} : vector<3x1x32xf32> to vector<1x1x32xf32>
    %679 = vector.shape_cast %678 : vector<1x1x32xf32> to vector<1x32xf32>
    %680 = vector.broadcast %679 : vector<1x32xf32> to vector<2x32xf32>
    %681 = arith.addf %677, %680 : vector<2x32xf32>
    %682 = vector.extract_strided_slice %591 {offsets = [0, 64], sizes = [2, 32], strides = [1, 1]} : vector<2x96xf32> to vector<2x32xf32>
    %683 = vector.extract_strided_slice %4 {offsets = [2, 0, 0], sizes = [1, 1, 32], strides = [1, 1, 1]} : vector<3x1x32xf32> to vector<1x1x32xf32>
    %684 = vector.shape_cast %683 : vector<1x1x32xf32> to vector<1x32xf32>
    %685 = vector.broadcast %684 : vector<1x32xf32> to vector<2x32xf32>
    %686 = arith.addf %682, %685 : vector<2x32xf32>
    %687 = arith.mulf %675, %686 : vector<2x32xf32>
    %688 = arith.addf %681, %687 : vector<2x32xf32>
    %689 = math.tanh %688 : vector<2x32xf32>
    %cst_131 = arith.constant 1.000000e+00 : f32
    %690 = vector.broadcast %cst_131 : f32 to vector<2x32xf32>
    %691 = arith.subf %690, %676 : vector<2x32xf32>
    %692 = arith.mulf %691, %689 : vector<2x32xf32>
    %693 = arith.mulf %676, %580 : vector<2x32xf32>
    %694 = arith.addf %692, %693 : vector<2x32xf32>
    %695 = vector.extract_strided_slice %694 {offsets = [1, 0], sizes = [1, 32], strides = [1, 1]} : vector<2x32xf32> to vector<1x32xf32>
    %c5 = arith.constant 5 : index
    %c0_132 = arith.constant 0 : index
    %696 = vector.load %arg13[%c5, %c0_132] : memref<8x32xf32, #tpu.memory_space<vmem>>, vector<1x32xf32>
    tpu.vector_store %arg13[%c5, %c0_132], %695 {strides = array<i32>} : memref<8x32xf32, #tpu.memory_space<vmem>>, vector<1x32xf32>,
    %697 = vector.extract_strided_slice %1 {offsets = [0, 0, 0], sizes = [1, 32, 96], strides = [1, 1, 1]} : vector<3x32x96xf32> to vector<1x32x96xf32>
    %698 = vector.shape_cast %697 : vector<1x32x96xf32> to vector<32x96xf32>
    %cst_133 = arith.constant dense<0.000000e+00> : vector<2x96xf32>
    %699 = tpu.matmul %624, %698, %cst_133 {dimension_numbers = #tpu.dot_dimension_numbers<[1], [0], [0], [1], [0, 0, 1, 1], [], []>} : vector<2x32xf32>, vector<32x96xf32>, vector<2x96xf32> -> vector<2x96xf32>
    %700 = vector.extract_strided_slice %1 {offsets = [1, 0, 0], sizes = [1, 32, 96], strides = [1, 1, 1]} : vector<3x32x96xf32> to vector<1x32x96xf32>
    %701 = vector.shape_cast %700 : vector<1x32x96xf32> to vector<32x96xf32>
    %cst_134 = arith.constant dense<0.000000e+00> : vector<2x96xf32>
    %702 = tpu.matmul %659, %701, %cst_134 {dimension_numbers = #tpu.dot_dimension_numbers<[1], [0], [0], [1], [0, 0, 1, 1], [], []>} : vector<2x32xf32>, vector<32x96xf32>, vector<2x96xf32> -> vector<2x96xf32>
    %703 = vector.extract_strided_slice %1 {offsets = [2, 0, 0], sizes = [1, 32, 96], strides = [1, 1, 1]} : vector<3x32x96xf32> to vector<1x32x96xf32>
    %704 = vector.shape_cast %703 : vector<1x32x96xf32> to vector<32x96xf32>
    %cst_135 = arith.constant dense<0.000000e+00> : vector<2x96xf32>
    %705 = tpu.matmul %694, %704, %cst_135 {dimension_numbers = #tpu.dot_dimension_numbers<[1], [0], [0], [1], [0, 0, 1, 1], [], []>} : vector<2x32xf32>, vector<32x96xf32>, vector<2x96xf32> -> vector<2x96xf32>
    %706 = vector.extract_strided_slice %6 {offsets = [12, 0], sizes = [2, 96], strides = [1, 1]} : vector<16x96xf32> to vector<2x96xf32>
    %707 = vector.extract_strided_slice %706 {offsets = [0, 0], sizes = [2, 64], strides = [1, 1]} : vector<2x96xf32> to vector<2x64xf32>
    %708 = vector.extract_strided_slice %699 {offsets = [0, 0], sizes = [2, 64], strides = [1, 1]} : vector<2x96xf32> to vector<2x64xf32>
    %709 = arith.addf %707, %708 : vector<2x64xf32>
    %710 = vector.extract_strided_slice %2 {offsets = [0, 0, 0], sizes = [1, 1, 64], strides = [1, 1, 1]} : vector<3x1x64xf32> to vector<1x1x64xf32>
    %711 = vector.shape_cast %710 : vector<1x1x64xf32> to vector<1x64xf32>
    %712 = vector.broadcast %711 : vector<1x64xf32> to vector<2x64xf32>
    %713 = arith.addf %709, %712 : vector<2x64xf32>
    %714 = arith.negf %713 : vector<2x64xf32>
    %715 = math.exp %714 : vector<2x64xf32>
    %cst_136 = arith.constant 1.000000e+00 : f32
    %716 = vector.broadcast %cst_136 : f32 to vector<2x64xf32>
    %717 = arith.addf %716, %715 : vector<2x64xf32>
    %718 = arith.divf %716, %717 : vector<2x64xf32>
    %719 = vector.extract_strided_slice %718 {offsets = [0, 0], sizes = [2, 32], strides = [1, 1]} : vector<2x64xf32> to vector<2x32xf32>
    %720 = vector.extract_strided_slice %718 {offsets = [0, 32], sizes = [2, 32], strides = [1, 1]} : vector<2x64xf32> to vector<2x32xf32>
    %721 = vector.extract_strided_slice %706 {offsets = [0, 64], sizes = [2, 32], strides = [1, 1]} : vector<2x96xf32> to vector<2x32xf32>
    %722 = vector.extract_strided_slice %3 {offsets = [0, 0, 0], sizes = [1, 1, 32], strides = [1, 1, 1]} : vector<3x1x32xf32> to vector<1x1x32xf32>
    %723 = vector.shape_cast %722 : vector<1x1x32xf32> to vector<1x32xf32>
    %724 = vector.broadcast %723 : vector<1x32xf32> to vector<2x32xf32>
    %725 = arith.addf %721, %724 : vector<2x32xf32>
    %726 = vector.extract_strided_slice %699 {offsets = [0, 64], sizes = [2, 32], strides = [1, 1]} : vector<2x96xf32> to vector<2x32xf32>
    %727 = vector.extract_strided_slice %4 {offsets = [0, 0, 0], sizes = [1, 1, 32], strides = [1, 1, 1]} : vector<3x1x32xf32> to vector<1x1x32xf32>
    %728 = vector.shape_cast %727 : vector<1x1x32xf32> to vector<1x32xf32>
    %729 = vector.broadcast %728 : vector<1x32xf32> to vector<2x32xf32>
    %730 = arith.addf %726, %729 : vector<2x32xf32>
    %731 = arith.mulf %719, %730 : vector<2x32xf32>
    %732 = arith.addf %725, %731 : vector<2x32xf32>
    %733 = math.tanh %732 : vector<2x32xf32>
    %cst_137 = arith.constant 1.000000e+00 : f32
    %734 = vector.broadcast %cst_137 : f32 to vector<2x32xf32>
    %735 = arith.subf %734, %720 : vector<2x32xf32>
    %736 = arith.mulf %735, %733 : vector<2x32xf32>
    %737 = arith.mulf %720, %624 : vector<2x32xf32>
    %738 = arith.addf %736, %737 : vector<2x32xf32>
    %c0_138 = arith.constant 0 : index
    %c0_139 = arith.constant 0 : index
    %c0_140 = arith.constant 0 : index
    %739 = vector.load %arg4[%c0_138, %c0_139, %c0_140] : memref<2x32x96xf32, #tpu.memory_space<vmem>>, vector<1x32x96xf32>
    %740 = vector.shape_cast %739 : vector<1x32x96xf32> to vector<32x96xf32>
    %cst_141 = arith.constant dense<0.000000e+00> : vector<2x96xf32>
    %741 = tpu.matmul %738, %740, %cst_141 {dimension_numbers = #tpu.dot_dimension_numbers<[1], [0], [0], [1], [0, 0, 1, 1], [], []>} : vector<2x32xf32>, vector<32x96xf32>, vector<2x96xf32> -> vector<2x96xf32>
    %742 = vector.extract_strided_slice %741 {offsets = [0, 0], sizes = [2, 64], strides = [1, 1]} : vector<2x96xf32> to vector<2x64xf32>
    %743 = vector.extract_strided_slice %702 {offsets = [0, 0], sizes = [2, 64], strides = [1, 1]} : vector<2x96xf32> to vector<2x64xf32>
    %744 = arith.addf %742, %743 : vector<2x64xf32>
    %745 = vector.extract_strided_slice %2 {offsets = [1, 0, 0], sizes = [1, 1, 64], strides = [1, 1, 1]} : vector<3x1x64xf32> to vector<1x1x64xf32>
    %746 = vector.shape_cast %745 : vector<1x1x64xf32> to vector<1x64xf32>
    %747 = vector.broadcast %746 : vector<1x64xf32> to vector<2x64xf32>
    %748 = arith.addf %744, %747 : vector<2x64xf32>
    %749 = arith.negf %748 : vector<2x64xf32>
    %750 = math.exp %749 : vector<2x64xf32>
    %cst_142 = arith.constant 1.000000e+00 : f32
    %751 = vector.broadcast %cst_142 : f32 to vector<2x64xf32>
    %752 = arith.addf %751, %750 : vector<2x64xf32>
    %753 = arith.divf %751, %752 : vector<2x64xf32>
    %754 = vector.extract_strided_slice %753 {offsets = [0, 0], sizes = [2, 32], strides = [1, 1]} : vector<2x64xf32> to vector<2x32xf32>
    %755 = vector.extract_strided_slice %753 {offsets = [0, 32], sizes = [2, 32], strides = [1, 1]} : vector<2x64xf32> to vector<2x32xf32>
    %756 = vector.extract_strided_slice %741 {offsets = [0, 64], sizes = [2, 32], strides = [1, 1]} : vector<2x96xf32> to vector<2x32xf32>
    %757 = vector.extract_strided_slice %3 {offsets = [1, 0, 0], sizes = [1, 1, 32], strides = [1, 1, 1]} : vector<3x1x32xf32> to vector<1x1x32xf32>
    %758 = vector.shape_cast %757 : vector<1x1x32xf32> to vector<1x32xf32>
    %759 = vector.broadcast %758 : vector<1x32xf32> to vector<2x32xf32>
    %760 = arith.addf %756, %759 : vector<2x32xf32>
    %761 = vector.extract_strided_slice %702 {offsets = [0, 64], sizes = [2, 32], strides = [1, 1]} : vector<2x96xf32> to vector<2x32xf32>
    %762 = vector.extract_strided_slice %4 {offsets = [1, 0, 0], sizes = [1, 1, 32], strides = [1, 1, 1]} : vector<3x1x32xf32> to vector<1x1x32xf32>
    %763 = vector.shape_cast %762 : vector<1x1x32xf32> to vector<1x32xf32>
    %764 = vector.broadcast %763 : vector<1x32xf32> to vector<2x32xf32>
    %765 = arith.addf %761, %764 : vector<2x32xf32>
    %766 = arith.mulf %754, %765 : vector<2x32xf32>
    %767 = arith.addf %760, %766 : vector<2x32xf32>
    %768 = math.tanh %767 : vector<2x32xf32>
    %cst_143 = arith.constant 1.000000e+00 : f32
    %769 = vector.broadcast %cst_143 : f32 to vector<2x32xf32>
    %770 = arith.subf %769, %755 : vector<2x32xf32>
    %771 = arith.mulf %770, %768 : vector<2x32xf32>
    %772 = arith.mulf %755, %659 : vector<2x32xf32>
    %773 = arith.addf %771, %772 : vector<2x32xf32>
    %c1_144 = arith.constant 1 : index
    %c0_145 = arith.constant 0 : index
    %c0_146 = arith.constant 0 : index
    %774 = vector.load %arg4[%c1_144, %c0_145, %c0_146] : memref<2x32x96xf32, #tpu.memory_space<vmem>>, vector<1x32x96xf32>
    %775 = vector.shape_cast %774 : vector<1x32x96xf32> to vector<32x96xf32>
    %cst_147 = arith.constant dense<0.000000e+00> : vector<2x96xf32>
    %776 = tpu.matmul %773, %775, %cst_147 {dimension_numbers = #tpu.dot_dimension_numbers<[1], [0], [0], [1], [0, 0, 1, 1], [], []>} : vector<2x32xf32>, vector<32x96xf32>, vector<2x96xf32> -> vector<2x96xf32>
    %777 = vector.extract_strided_slice %776 {offsets = [0, 0], sizes = [2, 64], strides = [1, 1]} : vector<2x96xf32> to vector<2x64xf32>
    %778 = vector.extract_strided_slice %705 {offsets = [0, 0], sizes = [2, 64], strides = [1, 1]} : vector<2x96xf32> to vector<2x64xf32>
    %779 = arith.addf %777, %778 : vector<2x64xf32>
    %780 = vector.extract_strided_slice %2 {offsets = [2, 0, 0], sizes = [1, 1, 64], strides = [1, 1, 1]} : vector<3x1x64xf32> to vector<1x1x64xf32>
    %781 = vector.shape_cast %780 : vector<1x1x64xf32> to vector<1x64xf32>
    %782 = vector.broadcast %781 : vector<1x64xf32> to vector<2x64xf32>
    %783 = arith.addf %779, %782 : vector<2x64xf32>
    %784 = arith.negf %783 : vector<2x64xf32>
    %785 = math.exp %784 : vector<2x64xf32>
    %cst_148 = arith.constant 1.000000e+00 : f32
    %786 = vector.broadcast %cst_148 : f32 to vector<2x64xf32>
    %787 = arith.addf %786, %785 : vector<2x64xf32>
    %788 = arith.divf %786, %787 : vector<2x64xf32>
    %789 = vector.extract_strided_slice %788 {offsets = [0, 0], sizes = [2, 32], strides = [1, 1]} : vector<2x64xf32> to vector<2x32xf32>
    %790 = vector.extract_strided_slice %788 {offsets = [0, 32], sizes = [2, 32], strides = [1, 1]} : vector<2x64xf32> to vector<2x32xf32>
    %791 = vector.extract_strided_slice %776 {offsets = [0, 64], sizes = [2, 32], strides = [1, 1]} : vector<2x96xf32> to vector<2x32xf32>
    %792 = vector.extract_strided_slice %3 {offsets = [2, 0, 0], sizes = [1, 1, 32], strides = [1, 1, 1]} : vector<3x1x32xf32> to vector<1x1x32xf32>
    %793 = vector.shape_cast %792 : vector<1x1x32xf32> to vector<1x32xf32>
    %794 = vector.broadcast %793 : vector<1x32xf32> to vector<2x32xf32>
    %795 = arith.addf %791, %794 : vector<2x32xf32>
    %796 = vector.extract_strided_slice %705 {offsets = [0, 64], sizes = [2, 32], strides = [1, 1]} : vector<2x96xf32> to vector<2x32xf32>
    %797 = vector.extract_strided_slice %4 {offsets = [2, 0, 0], sizes = [1, 1, 32], strides = [1, 1, 1]} : vector<3x1x32xf32> to vector<1x1x32xf32>
    %798 = vector.shape_cast %797 : vector<1x1x32xf32> to vector<1x32xf32>
    %799 = vector.broadcast %798 : vector<1x32xf32> to vector<2x32xf32>
    %800 = arith.addf %796, %799 : vector<2x32xf32>
    %801 = arith.mulf %789, %800 : vector<2x32xf32>
    %802 = arith.addf %795, %801 : vector<2x32xf32>
    %803 = math.tanh %802 : vector<2x32xf32>
    %cst_149 = arith.constant 1.000000e+00 : f32
    %804 = vector.broadcast %cst_149 : f32 to vector<2x32xf32>
    %805 = arith.subf %804, %790 : vector<2x32xf32>
    %806 = arith.mulf %805, %803 : vector<2x32xf32>
    %807 = arith.mulf %790, %694 : vector<2x32xf32>
    %808 = arith.addf %806, %807 : vector<2x32xf32>
    %809 = vector.extract_strided_slice %808 {offsets = [1, 0], sizes = [1, 32], strides = [1, 1]} : vector<2x32xf32> to vector<1x32xf32>
    %c6 = arith.constant 6 : index
    %c0_150 = arith.constant 0 : index
    %810 = vector.load %arg13[%c6, %c0_150] : memref<8x32xf32, #tpu.memory_space<vmem>>, vector<1x32xf32>
    tpu.vector_store %arg13[%c6, %c0_150], %809 {strides = array<i32>} : memref<8x32xf32, #tpu.memory_space<vmem>>, vector<1x32xf32>,
    %811 = vector.extract_strided_slice %1 {offsets = [0, 0, 0], sizes = [1, 32, 96], strides = [1, 1, 1]} : vector<3x32x96xf32> to vector<1x32x96xf32>
    %812 = vector.shape_cast %811 : vector<1x32x96xf32> to vector<32x96xf32>
    %cst_151 = arith.constant dense<0.000000e+00> : vector<2x96xf32>
    %813 = tpu.matmul %738, %812, %cst_151 {dimension_numbers = #tpu.dot_dimension_numbers<[1], [0], [0], [1], [0, 0, 1, 1], [], []>} : vector<2x32xf32>, vector<32x96xf32>, vector<2x96xf32> -> vector<2x96xf32>
    %814 = vector.extract_strided_slice %1 {offsets = [1, 0, 0], sizes = [1, 32, 96], strides = [1, 1, 1]} : vector<3x32x96xf32> to vector<1x32x96xf32>
    %815 = vector.shape_cast %814 : vector<1x32x96xf32> to vector<32x96xf32>
    %cst_152 = arith.constant dense<0.000000e+00> : vector<2x96xf32>
    %816 = tpu.matmul %773, %815, %cst_152 {dimension_numbers = #tpu.dot_dimension_numbers<[1], [0], [0], [1], [0, 0, 1, 1], [], []>} : vector<2x32xf32>, vector<32x96xf32>, vector<2x96xf32> -> vector<2x96xf32>
    %817 = vector.extract_strided_slice %1 {offsets = [2, 0, 0], sizes = [1, 32, 96], strides = [1, 1, 1]} : vector<3x32x96xf32> to vector<1x32x96xf32>
    %818 = vector.shape_cast %817 : vector<1x32x96xf32> to vector<32x96xf32>
    %cst_153 = arith.constant dense<0.000000e+00> : vector<2x96xf32>
    %819 = tpu.matmul %808, %818, %cst_153 {dimension_numbers = #tpu.dot_dimension_numbers<[1], [0], [0], [1], [0, 0, 1, 1], [], []>} : vector<2x32xf32>, vector<32x96xf32>, vector<2x96xf32> -> vector<2x96xf32>
    %820 = vector.extract_strided_slice %6 {offsets = [14, 0], sizes = [2, 96], strides = [1, 1]} : vector<16x96xf32> to vector<2x96xf32>
    %821 = vector.extract_strided_slice %820 {offsets = [0, 0], sizes = [2, 64], strides = [1, 1]} : vector<2x96xf32> to vector<2x64xf32>
    %822 = vector.extract_strided_slice %813 {offsets = [0, 0], sizes = [2, 64], strides = [1, 1]} : vector<2x96xf32> to vector<2x64xf32>
    %823 = arith.addf %821, %822 : vector<2x64xf32>
    %824 = vector.extract_strided_slice %2 {offsets = [0, 0, 0], sizes = [1, 1, 64], strides = [1, 1, 1]} : vector<3x1x64xf32> to vector<1x1x64xf32>
    %825 = vector.shape_cast %824 : vector<1x1x64xf32> to vector<1x64xf32>
    %826 = vector.broadcast %825 : vector<1x64xf32> to vector<2x64xf32>
    %827 = arith.addf %823, %826 : vector<2x64xf32>
    %828 = arith.negf %827 : vector<2x64xf32>
    %829 = math.exp %828 : vector<2x64xf32>
    %cst_154 = arith.constant 1.000000e+00 : f32
    %830 = vector.broadcast %cst_154 : f32 to vector<2x64xf32>
    %831 = arith.addf %830, %829 : vector<2x64xf32>
    %832 = arith.divf %830, %831 : vector<2x64xf32>
    %833 = vector.extract_strided_slice %832 {offsets = [0, 0], sizes = [2, 32], strides = [1, 1]} : vector<2x64xf32> to vector<2x32xf32>
    %834 = vector.extract_strided_slice %832 {offsets = [0, 32], sizes = [2, 32], strides = [1, 1]} : vector<2x64xf32> to vector<2x32xf32>
    %835 = vector.extract_strided_slice %820 {offsets = [0, 64], sizes = [2, 32], strides = [1, 1]} : vector<2x96xf32> to vector<2x32xf32>
    %836 = vector.extract_strided_slice %3 {offsets = [0, 0, 0], sizes = [1, 1, 32], strides = [1, 1, 1]} : vector<3x1x32xf32> to vector<1x1x32xf32>
    %837 = vector.shape_cast %836 : vector<1x1x32xf32> to vector<1x32xf32>
    %838 = vector.broadcast %837 : vector<1x32xf32> to vector<2x32xf32>
    %839 = arith.addf %835, %838 : vector<2x32xf32>
    %840 = vector.extract_strided_slice %813 {offsets = [0, 64], sizes = [2, 32], strides = [1, 1]} : vector<2x96xf32> to vector<2x32xf32>
    %841 = vector.extract_strided_slice %4 {offsets = [0, 0, 0], sizes = [1, 1, 32], strides = [1, 1, 1]} : vector<3x1x32xf32> to vector<1x1x32xf32>
    %842 = vector.shape_cast %841 : vector<1x1x32xf32> to vector<1x32xf32>
    %843 = vector.broadcast %842 : vector<1x32xf32> to vector<2x32xf32>
    %844 = arith.addf %840, %843 : vector<2x32xf32>
    %845 = arith.mulf %833, %844 : vector<2x32xf32>
    %846 = arith.addf %839, %845 : vector<2x32xf32>
    %847 = math.tanh %846 : vector<2x32xf32>
    %cst_155 = arith.constant 1.000000e+00 : f32
    %848 = vector.broadcast %cst_155 : f32 to vector<2x32xf32>
    %849 = arith.subf %848, %834 : vector<2x32xf32>
    %850 = arith.mulf %849, %847 : vector<2x32xf32>
    %851 = arith.mulf %834, %738 : vector<2x32xf32>
    %852 = arith.addf %850, %851 : vector<2x32xf32>
    %c0_156 = arith.constant 0 : index
    %c0_157 = arith.constant 0 : index
    %c0_158 = arith.constant 0 : index
    %853 = vector.load %arg4[%c0_156, %c0_157, %c0_158] : memref<2x32x96xf32, #tpu.memory_space<vmem>>, vector<1x32x96xf32>
    %854 = vector.shape_cast %853 : vector<1x32x96xf32> to vector<32x96xf32>
    %cst_159 = arith.constant dense<0.000000e+00> : vector<2x96xf32>
    %855 = tpu.matmul %852, %854, %cst_159 {dimension_numbers = #tpu.dot_dimension_numbers<[1], [0], [0], [1], [0, 0, 1, 1], [], []>} : vector<2x32xf32>, vector<32x96xf32>, vector<2x96xf32> -> vector<2x96xf32>
    %856 = vector.extract_strided_slice %855 {offsets = [0, 0], sizes = [2, 64], strides = [1, 1]} : vector<2x96xf32> to vector<2x64xf32>
    %857 = vector.extract_strided_slice %816 {offsets = [0, 0], sizes = [2, 64], strides = [1, 1]} : vector<2x96xf32> to vector<2x64xf32>
    %858 = arith.addf %856, %857 : vector<2x64xf32>
    %859 = vector.extract_strided_slice %2 {offsets = [1, 0, 0], sizes = [1, 1, 64], strides = [1, 1, 1]} : vector<3x1x64xf32> to vector<1x1x64xf32>
    %860 = vector.shape_cast %859 : vector<1x1x64xf32> to vector<1x64xf32>
    %861 = vector.broadcast %860 : vector<1x64xf32> to vector<2x64xf32>
    %862 = arith.addf %858, %861 : vector<2x64xf32>
    %863 = arith.negf %862 : vector<2x64xf32>
    %864 = math.exp %863 : vector<2x64xf32>
    %cst_160 = arith.constant 1.000000e+00 : f32
    %865 = vector.broadcast %cst_160 : f32 to vector<2x64xf32>
    %866 = arith.addf %865, %864 : vector<2x64xf32>
    %867 = arith.divf %865, %866 : vector<2x64xf32>
    %868 = vector.extract_strided_slice %867 {offsets = [0, 0], sizes = [2, 32], strides = [1, 1]} : vector<2x64xf32> to vector<2x32xf32>
    %869 = vector.extract_strided_slice %867 {offsets = [0, 32], sizes = [2, 32], strides = [1, 1]} : vector<2x64xf32> to vector<2x32xf32>
    %870 = vector.extract_strided_slice %855 {offsets = [0, 64], sizes = [2, 32], strides = [1, 1]} : vector<2x96xf32> to vector<2x32xf32>
    %871 = vector.extract_strided_slice %3 {offsets = [1, 0, 0], sizes = [1, 1, 32], strides = [1, 1, 1]} : vector<3x1x32xf32> to vector<1x1x32xf32>
    %872 = vector.shape_cast %871 : vector<1x1x32xf32> to vector<1x32xf32>
    %873 = vector.broadcast %872 : vector<1x32xf32> to vector<2x32xf32>
    %874 = arith.addf %870, %873 : vector<2x32xf32>
    %875 = vector.extract_strided_slice %816 {offsets = [0, 64], sizes = [2, 32], strides = [1, 1]} : vector<2x96xf32> to vector<2x32xf32>
    %876 = vector.extract_strided_slice %4 {offsets = [1, 0, 0], sizes = [1, 1, 32], strides = [1, 1, 1]} : vector<3x1x32xf32> to vector<1x1x32xf32>
    %877 = vector.shape_cast %876 : vector<1x1x32xf32> to vector<1x32xf32>
    %878 = vector.broadcast %877 : vector<1x32xf32> to vector<2x32xf32>
    %879 = arith.addf %875, %878 : vector<2x32xf32>
    %880 = arith.mulf %868, %879 : vector<2x32xf32>
    %881 = arith.addf %874, %880 : vector<2x32xf32>
    %882 = math.tanh %881 : vector<2x32xf32>
    %cst_161 = arith.constant 1.000000e+00 : f32
    %883 = vector.broadcast %cst_161 : f32 to vector<2x32xf32>
    %884 = arith.subf %883, %869 : vector<2x32xf32>
    %885 = arith.mulf %884, %882 : vector<2x32xf32>
    %886 = arith.mulf %869, %773 : vector<2x32xf32>
    %887 = arith.addf %885, %886 : vector<2x32xf32>
    %c1_162 = arith.constant 1 : index
    %c0_163 = arith.constant 0 : index
    %c0_164 = arith.constant 0 : index
    %888 = vector.load %arg4[%c1_162, %c0_163, %c0_164] : memref<2x32x96xf32, #tpu.memory_space<vmem>>, vector<1x32x96xf32>
    %889 = vector.shape_cast %888 : vector<1x32x96xf32> to vector<32x96xf32>
    %cst_165 = arith.constant dense<0.000000e+00> : vector<2x96xf32>
    %890 = tpu.matmul %887, %889, %cst_165 {dimension_numbers = #tpu.dot_dimension_numbers<[1], [0], [0], [1], [0, 0, 1, 1], [], []>} : vector<2x32xf32>, vector<32x96xf32>, vector<2x96xf32> -> vector<2x96xf32>
    %891 = vector.extract_strided_slice %890 {offsets = [0, 0], sizes = [2, 64], strides = [1, 1]} : vector<2x96xf32> to vector<2x64xf32>
    %892 = vector.extract_strided_slice %819 {offsets = [0, 0], sizes = [2, 64], strides = [1, 1]} : vector<2x96xf32> to vector<2x64xf32>
    %893 = arith.addf %891, %892 : vector<2x64xf32>
    %894 = vector.extract_strided_slice %2 {offsets = [2, 0, 0], sizes = [1, 1, 64], strides = [1, 1, 1]} : vector<3x1x64xf32> to vector<1x1x64xf32>
    %895 = vector.shape_cast %894 : vector<1x1x64xf32> to vector<1x64xf32>
    %896 = vector.broadcast %895 : vector<1x64xf32> to vector<2x64xf32>
    %897 = arith.addf %893, %896 : vector<2x64xf32>
    %898 = arith.negf %897 : vector<2x64xf32>
    %899 = math.exp %898 : vector<2x64xf32>
    %cst_166 = arith.constant 1.000000e+00 : f32
    %900 = vector.broadcast %cst_166 : f32 to vector<2x64xf32>
    %901 = arith.addf %900, %899 : vector<2x64xf32>
    %902 = arith.divf %900, %901 : vector<2x64xf32>
    %903 = vector.extract_strided_slice %902 {offsets = [0, 0], sizes = [2, 32], strides = [1, 1]} : vector<2x64xf32> to vector<2x32xf32>
    %904 = vector.extract_strided_slice %902 {offsets = [0, 32], sizes = [2, 32], strides = [1, 1]} : vector<2x64xf32> to vector<2x32xf32>
    %905 = vector.extract_strided_slice %890 {offsets = [0, 64], sizes = [2, 32], strides = [1, 1]} : vector<2x96xf32> to vector<2x32xf32>
    %906 = vector.extract_strided_slice %3 {offsets = [2, 0, 0], sizes = [1, 1, 32], strides = [1, 1, 1]} : vector<3x1x32xf32> to vector<1x1x32xf32>
    %907 = vector.shape_cast %906 : vector<1x1x32xf32> to vector<1x32xf32>
    %908 = vector.broadcast %907 : vector<1x32xf32> to vector<2x32xf32>
    %909 = arith.addf %905, %908 : vector<2x32xf32>
    %910 = vector.extract_strided_slice %819 {offsets = [0, 64], sizes = [2, 32], strides = [1, 1]} : vector<2x96xf32> to vector<2x32xf32>
    %911 = vector.extract_strided_slice %4 {offsets = [2, 0, 0], sizes = [1, 1, 32], strides = [1, 1, 1]} : vector<3x1x32xf32> to vector<1x1x32xf32>
    %912 = vector.shape_cast %911 : vector<1x1x32xf32> to vector<1x32xf32>
    %913 = vector.broadcast %912 : vector<1x32xf32> to vector<2x32xf32>
    %914 = arith.addf %910, %913 : vector<2x32xf32>
    %915 = arith.mulf %903, %914 : vector<2x32xf32>
    %916 = arith.addf %909, %915 : vector<2x32xf32>
    %917 = math.tanh %916 : vector<2x32xf32>
    %cst_167 = arith.constant 1.000000e+00 : f32
    %918 = vector.broadcast %cst_167 : f32 to vector<2x32xf32>
    %919 = arith.subf %918, %904 : vector<2x32xf32>
    %920 = arith.mulf %919, %917 : vector<2x32xf32>
    %921 = arith.mulf %904, %808 : vector<2x32xf32>
    %922 = arith.addf %920, %921 : vector<2x32xf32>
    %923 = vector.extract_strided_slice %922 {offsets = [1, 0], sizes = [1, 32], strides = [1, 1]} : vector<2x32xf32> to vector<1x32xf32>
    %c7 = arith.constant 7 : index
    %c0_168 = arith.constant 0 : index
    %924 = vector.load %arg13[%c7, %c0_168] : memref<8x32xf32, #tpu.memory_space<vmem>>, vector<1x32xf32>
    tpu.vector_store %arg13[%c7, %c0_168], %923 {strides = array<i32>} : memref<8x32xf32, #tpu.memory_space<vmem>>, vector<1x32xf32>,
    %c0_169 = arith.constant 0 : index
    %c0_170 = arith.constant 0 : index
    %c0_171 = arith.constant 0 : index
    %925 = vector.load %arg12[%c0_169, %c0_170, %c0_171] : memref<3x2x32xf32, #tpu.memory_space<vmem>>, vector<1x2x32xf32>
    %926 = vector.shape_cast %925 : vector<1x2x32xf32> to vector<2x32xf32>
    %927 = vector.shape_cast %852 : vector<2x32xf32> to vector<1x2x32xf32>
    tpu.vector_store %arg12[%c0_169, %c0_170, %c0_171], %927 {strides = array<i32>} : memref<3x2x32xf32, #tpu.memory_space<vmem>>, vector<1x2x32xf32>,
    %c1_172 = arith.constant 1 : index
    %c0_173 = arith.constant 0 : index
    %c0_174 = arith.constant 0 : index
    %928 = vector.load %arg12[%c1_172, %c0_173, %c0_174] : memref<3x2x32xf32, #tpu.memory_space<vmem>>, vector<1x2x32xf32>
    %929 = vector.shape_cast %928 : vector<1x2x32xf32> to vector<2x32xf32>
    %930 = vector.shape_cast %887 : vector<2x32xf32> to vector<1x2x32xf32>
    tpu.vector_store %arg12[%c1_172, %c0_173, %c0_174], %930 {strides = array<i32>} : memref<3x2x32xf32, #tpu.memory_space<vmem>>, vector<1x2x32xf32>,
    %c2_175 = arith.constant 2 : index
    %c0_176 = arith.constant 0 : index
    %c0_177 = arith.constant 0 : index
    %931 = vector.load %arg12[%c2_175, %c0_176, %c0_177] : memref<3x2x32xf32, #tpu.memory_space<vmem>>, vector<1x2x32xf32>
    %932 = vector.shape_cast %931 : vector<1x2x32xf32> to vector<2x32xf32>
    %933 = vector.shape_cast %922 : vector<2x32xf32> to vector<1x2x32xf32>
    tpu.vector_store %arg12[%c2_175, %c0_176, %c0_177], %933 {strides = array<i32>} : memref<3x2x32xf32, #tpu.memory_space<vmem>>, vector<1x2x32xf32>,
    %c0_178 = arith.constant 0 : index
    %c0_179 = arith.constant 0 : index
    %934 = vector.load %arg13[%c0_178, %c0_179] : memref<8x32xf32, #tpu.memory_space<vmem>>, vector<8x32xf32>
    %cst_180 = arith.constant 0.000000e+00 : f32
    %935 = vector.broadcast %cst_180 : f32 to vector<8x32xf32>
    %936 = arith.maximumf %934, %935 : vector<8x32xf32>
    %c0_181 = arith.constant 0 : index
    %c0_182 = arith.constant 0 : index
    %937 = vector.load %arg9[%c0_181, %c0_182] : memref<32x3xf32, #tpu.memory_space<vmem>>, vector<32x3xf32>
    %cst_183 = arith.constant dense<0.000000e+00> : vector<8x3xf32>
    %938 = tpu.matmul %936, %937, %cst_183 {dimension_numbers = #tpu.dot_dimension_numbers<[1], [0], [0], [1], [0, 0, 1, 1], [], []>} : vector<8x32xf32>, vector<32x3xf32>, vector<8x3xf32> -> vector<8x3xf32>
    %c0_184 = arith.constant 0 : index
    %c0_185 = arith.constant 0 : index
    %939 = vector.load %arg10[%c0_184, %c0_185] : memref<1x3xf32, #tpu.memory_space<vmem>>, vector<1x3xf32>
    %940 = vector.broadcast %939 : vector<1x3xf32> to vector<8x3xf32>
    %941 = arith.addf %938, %940 : vector<8x3xf32>
    %cst_186 = arith.constant dense<0xFF800000> : vector<8xf32>
    %942 = vector.multi_reduction <maximumf>, %941, %cst_186 [1] : vector<8x3xf32> to vector<8xf32>
    %943 = vector.shape_cast %942 : vector<8xf32> to vector<8x1xf32>
    %944 = vector.broadcast %943 : vector<8x1xf32> to vector<8x3xf32>
    %945 = arith.subf %941, %944 : vector<8x3xf32>
    %946 = math.exp %945 : vector<8x3xf32>
    %cst_187 = arith.constant dense<0.000000e+00> : vector<8xf32>
    %947 = vector.multi_reduction <add>, %946, %cst_187 [1] : vector<8x3xf32> to vector<8xf32>
    %948 = vector.shape_cast %947 : vector<8xf32> to vector<8x1xf32>
    %949 = math.log %948 : vector<8x1xf32>
    %950 = arith.addf %949, %943 : vector<8x1xf32>
    %951 = vector.broadcast %950 : vector<8x1xf32> to vector<8x3xf32>
    %952 = arith.subf %941, %951 : vector<8x3xf32>
    %c0_188 = arith.constant 0 : index
    %c0_189 = arith.constant 0 : index
    %953 = vector.load %arg11[%c0_188, %c0_189] : memref<8x3xf32, #tpu.memory_space<vmem>>, vector<8x3xf32>
    tpu.vector_store %arg11[%c0_188, %c0_189], %952 {strides = array<i32>} : memref<8x3xf32, #tpu.memory_space<vmem>>, vector<8x3xf32>,
    return
  }
  func.func @transform_0(%arg0: i32) -> (i32, i32) {
    %c0_i32 = arith.constant 0 : i32
    %c0_i32_0 = arith.constant 0 : i32
    %c0_i32_1 = arith.constant 0 : i32
    return %c0_i32, %c0_i32_0 : i32, i32
  }
  func.func @transform_1(%arg0: i32) -> (i32, i32, i32) {
    %c0_i32 = arith.constant 0 : i32
    %c0_i32_0 = arith.constant 0 : i32
    %c0_i32_1 = arith.constant 0 : i32
    %c0_i32_2 = arith.constant 0 : i32
    return %c0_i32, %c0_i32_0, %c0_i32_1 : i32, i32, i32
  }
  func.func @transform_2(%arg0: i32) -> (i32, i32) {
    %c0_i32 = arith.constant 0 : i32
    %c0_i32_0 = arith.constant 0 : i32
    %c0_i32_1 = arith.constant 0 : i32
    return %c0_i32, %c0_i32_0 : i32, i32
  }
  func.func @transform_3(%arg0: i32) -> (i32, i32, i32) {
    %c0_i32 = arith.constant 0 : i32
    %c0_i32_0 = arith.constant 0 : i32
    %c0_i32_1 = arith.constant 0 : i32
    %c0_i32_2 = arith.constant 0 : i32
    return %c0_i32, %c0_i32_0, %c0_i32_1 : i32, i32, i32
  }
  func.func @transform_4(%arg0: i32) -> (i32, i32, i32) {
    %c0_i32 = arith.constant 0 : i32
    %c0_i32_0 = arith.constant 0 : i32
    %c0_i32_1 = arith.constant 0 : i32
    %c0_i32_2 = arith.constant 0 : i32
    return %c0_i32, %c0_i32_0, %c0_i32_1 : i32, i32, i32
  }
  func.func @transform_5(%arg0: i32) -> (i32, i32, i32) {
    %c0_i32 = arith.constant 0 : i32
    %c0_i32_0 = arith.constant 0 : i32
    %c0_i32_1 = arith.constant 0 : i32
    %c0_i32_2 = arith.constant 0 : i32
    return %c0_i32, %c0_i32_0, %c0_i32_1 : i32, i32, i32
  }
  func.func @transform_6(%arg0: i32) -> (i32, i32, i32) {
    %c0_i32 = arith.constant 0 : i32
    %c0_i32_0 = arith.constant 0 : i32
    %c0_i32_1 = arith.constant 0 : i32
    %c0_i32_2 = arith.constant 0 : i32
    return %c0_i32, %c0_i32_0, %c0_i32_1 : i32, i32, i32
  }
  func.func @transform_7(%arg0: i32) -> (i32, i32, i32) {
    %c0_i32 = arith.constant 0 : i32
    %c0_i32_0 = arith.constant 0 : i32
    %c0_i32_1 = arith.constant 0 : i32
    %c0_i32_2 = arith.constant 0 : i32
    return %c0_i32, %c0_i32_0, %c0_i32_1 : i32, i32, i32
  }
  func.func @transform_8(%arg0: i32) -> (i32, i32) {
    %c0_i32 = arith.constant 0 : i32
    %c0_i32_0 = arith.constant 0 : i32
    %c0_i32_1 = arith.constant 0 : i32
    return %c0_i32, %c0_i32_0 : i32, i32
  }
  func.func @transform_9(%arg0: i32) -> (i32, i32) {
    %c0_i32 = arith.constant 0 : i32
    %c0_i32_0 = arith.constant 0 : i32
    %c0_i32_1 = arith.constant 0 : i32
    return %c0_i32, %c0_i32_0 : i32, i32
  }
  func.func @transform_10(%arg0: i32) -> (i32, i32) {
    %c0_i32 = arith.constant 0 : i32
    %c0_i32_0 = arith.constant 0 : i32
    %c0_i32_1 = arith.constant 0 : i32
    return %c0_i32, %c0_i32_0 : i32, i32
  }
  func.func @transform_11(%arg0: i32) -> (i32, i32, i32) {
    %c0_i32 = arith.constant 0 : i32
    %c0_i32_0 = arith.constant 0 : i32
    %c0_i32_1 = arith.constant 0 : i32
    %c0_i32_2 = arith.constant 0 : i32
    return %c0_i32, %c0_i32_0, %c0_i32_1 : i32, i32, i32
  }
}

</mosaic_0001>

<bundles_post_ra>
// kernel: grunet_forward.1
= control target key start
LH: loop header
LB: loop body
LE: loop exit
PB: predicated region body
PF: predicated region fallthrough
CT: control target
= control target key end

     0   :  { %17 = vsyncpa [#allocation4], 0  ;;  %s3567_s0 = inlined_call_operand.vmem [shape: f32[16,16], index: 0, kind: input, shape index: {}]   ;;  %s3568_s1 = inlined_call_operand.hbm [shape: f32[3,2,32], index: 1, kind: input, shape index: {}]   ;;  %s3569_s2 = inlined_call_operand.vmem [shape: f32[16,96], index: 2, kind: input, shape index: {}]   ;;  %s3570_s3 = inlined_call_operand.hbm [shape: f32[2,32,96], index: 3, kind: input, shape index: {}]   ;;  %s3571_s4 = inlined_call_operand.hbm [shape: f32[3,32,96], index: 4, kind: input, shape index: {}]   ;;  %s3572_s5 = inlined_call_operand.vmem [shape: f32[3,1,64], index: 5, kind: input, shape index: {}]   ;;  %s3573_s6 = inlined_call_operand.hbm [shape: f32[3,1,32], index: 6, kind: input, shape index: {}]   ;;  %s3574_s7 = inlined_call_operand.hbm [shape: f32[3,1,32], index: 7, kind: input, shape index: {}]   ;;  %s3575_s8 = inlined_call_operand.vmem [shape: f32[32,3], index: 8, kind: input, shape index: {}]   ;;  %s3576_s9 = inlined_call_operand.vmem [shape: f32[1,3], index: 9, kind: input, shape index: {}]   ;;  %s3577_s10 = inlined_call_operand.vmem [shape: f32[8,3], index: 10, kind: output, shape index: {0}]   ;;  %s3578_s11 = inlined_call_operand.hbm [shape: f32[3,2,32], index: 11, kind: output, shape index: {1}]  }
   0x1   :  { %18 = vsyncpa [#allocation7], 0 }
   0x2   :  { %19 = vsyncpa [#allocation10], 0  ;;  %s42_s19 = sshll.u32 %s3570_s3, 4  ;;  %s43_s19 = int_to_ptr.hbm [resolvable:$true] %s42_s19 }
   0x3   :  { %20 = vsyncpa [#allocation5], 0  ;;  %s2769_s20 = smov [#allocation6]   ;;  %s70_s24 = sshll.u32 %s3573_s6, 4  ;;  %s71_s24 = int_to_ptr.hbm [resolvable:$true] %s70_s24 }
   0x4   :  { %s44_s21 = sshll.u32 %s2769_s20, 4  ;;  %s2770_s25 = smov 128   ;;  %s45_s21 = int_to_ptr.vmem [resolvable:$true] %s44_s21 }
   0x5   :  { %s2771_s26 = smov 8   ;;  %s2772_s27 = smov [#allocation9]  }
   0x6   :  { %50 = dma.hbm_to_vmem [thread:$0]  %s43_s19, 1024, %s45_s21, [#allocation7], %s2770_s25, %s2770_s25, %s2771_s26  }
   0x7   :  { %s72_s28 = sshll.u32 %s2772_s27, 4  ;;  %s2773_s29 = smov 16   ;;  %s73_s28 = int_to_ptr.vmem [resolvable:$true] %s72_s28 }
   0x8   :  { %s2774_s30 = smov 1   ;;  %s27_s13 = sshll.u32 %s3568_s1, 4  ;;  %s28_s13 = int_to_ptr.hbm [resolvable:$true] %s27_s13 }
   0x9   :  { %78 = dma.hbm_to_vmem [thread:$0]  %s71_s24, 48, %s73_s28, [#allocation10], %s2773_s29, %s2773_s29, %s2774_s30  }
   0xa   :  { %s2775_s14 = smov [#allocation3]   ;;  %s55_s17 = sshll.u32 %s3571_s4, 4  ;;  %s56_s17 = int_to_ptr.hbm [resolvable:$true] %s55_s17 }
   0xb   :  { %s29_s15 = sshll.u32 %s2775_s14, 4  ;;  %s2776_s18 = smov 32   ;;  %s30_s15 = int_to_ptr.vmem [resolvable:$true] %s29_s15 }
   0xc   :  { %s2777_s19 = smov 2   ;;  %s2778_s20 = smov [#allocation8]  }
   0xd   :  { %35 = dma.hbm_to_vmem [thread:$0]  %s28_s13, 96, %s30_s15, [#allocation4], %s2776_s18, %s2776_s18, %s2777_s19  }
   0xe   :  { %s57_s21 = sshll.u32 %s2778_s20, 4  ;;  %s83_s1 = sshll.u32 %s3574_s7, 4  ;;  %s58_s21 = int_to_ptr.vmem [resolvable:$true] %s57_s21  ;;  %s84_s1 = int_to_ptr.hbm [resolvable:$true] %s83_s1 }
   0xf   :  { %63 = dma.hbm_to_vmem [thread:$0]  %s56_s17, 1536, %s58_s21, [#allocation7], %s2770_s25, %s2770_s25, %s2771_s26  }
  0x10   :  { %s2779_s24 = smov [#allocation11]  }
  0x11   :  { %s85_s27 = sshll.u32 %s2779_s24, 4  ;;  %s86_s27 = int_to_ptr.vmem [resolvable:$true] %s85_s27 }
  0x12   :  { %91 = dma.hbm_to_vmem [thread:$0]  %s84_s1, 48, %s86_s27, [#allocation10], %s2773_s29, %s2773_s29, %s2774_s30  }
  0x13   :  { %2761 = dma.done.wait [#allocation4], 96  }
  0x14   :  { %2762 = vsyncadd [#allocation4], 4294967200 }
  0x15   :  { %2763 = dma.done.wait [#allocation7], 2560  }
  0x16   :  { %2764 = vsyncadd [#allocation7], 4294964736 }
  0x17   :  { %2765 = dma.done.wait [#allocation10], 96  }
  0x18   :  { %2766 = vsyncadd [#allocation10], 4294967200  ;;  %v2861_v0 = vld [vmem:[#allocation8 + $0x18] sm:$0xff]  ;;  %v2863_v1 = vld [vmem:[#allocation8 + $0x10] sm:$0xff]  ;;  %vm141_vm0 = vcmask 130048   ;;  %vm176_vm1 = vcmask 261120  }
  0x19   :  { %v117_v2 = vld [vmem:[%s3569_s2 + $0x8] sm:$0xff]  ;;  %192 = vmatpush.msra.mxu1 %v2861_v0  ;;  %v2869_v3 = vld [vmem:[#allocation8 + $0x8] sm:$0xff]  ;;  %v116_v4 = vld [vmem:[%s3569_s2] sm:$0xff]  ;;  %s2780_s30 = smov 64  }
  0x1a   :  { %162 = vmatpush.msra.mxu0 %v117_v2  ;;  %v2874_v5 = vld [vmem:[#allocation8] sm:$0xff]  ;;  %v139_v6 = vld [vmem:[%s3567_s0] sm:$0xff]  ;;  %v171_v7 = vld [vmem:[#allocation3] sm:$0x3] }
  0x1b   :  { %193 = vmatpush.msra.mxu1 %v2863_v1  ;;  %v2444_v8 = vld [vmem:[#allocation11] ss:$0 sm:$0xff]  ;;  %v2445_v9 = vld [vmem:[#allocation9] ss:$0 sm:$0xff]  ;;  %v2900_v16 = vld [vmem:[%s3572_s5] ss:$0 sm:$0xff] }
  0x1c   :  { %163 = vmatpush.msra.mxu0 %v116_v4  ;;  %278 = vrot.lane.b32.xlu0 %v2444_v8, %s2780_s30  ;;  %v140_v10 = vld [vmem:[%s3567_s0 + $0x8] sm:$0xff]  ;;  %s2781_s0 = smov 96   ;;  %v2915_v39 = vld [vmem:[#allocation8 + $0x30] sm:$0xff]  ;;  %v2447_v40 = vld [vmem:[#allocation11 + $0x1] ss:$0 sm:$0xff] }
  0x1d   :  { %2363 = vmatmul.msk.f32.vlgmr.msra.gmra.mxu0 %vm141_vm0, %v139_v6  ;;  %194 = vmatpush.msra.mxu1 %v2869_v3  ;;  %v2913_v38 = vld [vmem:[#allocation8 + $0x38] sm:$0xff]  ;;  %v2919_v41 = vld [vmem:[#allocation8 + $0x28] sm:$0xff]  ;;  %v2925_v43 = vld [vmem:[#allocation8 + $0x50] sm:$0xff] }
  0x1e   :  { %272 = vrot.lane.b32.xlu1 %v2445_v9, %s2780_s30  ;;  %215 = vmatpush.msra.mxu2 %v2913_v38  ;;  %v2921_v42 = vld [vmem:[#allocation8 + $0x58] sm:$0xff]  ;;  %v2929_v45 = vld [vmem:[#allocation8 + $0x20] sm:$0xff]  ;;  %v2933_v46 = vld [vmem:[#allocation6 + $0x10] sm:$0xff] }
  0x1f   :  { %195 = vmatpush.msra.mxu1 %v2874_v5  ;;  %517 = vmatpush.msrb.mxu0 %v2913_v38  ;;  %v2927_v44 = vld [vmem:[#allocation6 + $0x18] sm:$0xff]  ;;  %v2938_v48 = vld [vmem:[#allocation8 + $0x48] sm:$0xff]  ;;  %v2946_v50 = vld [vmem:[#allocation8 + $0x40] sm:$0xff] }
  0x20   :  { %2365 = vmatmul.msk.f32.vlgmr.msra.gmra.mxu1 %vm176_vm1, %v171_v7  ;;  %216 = vmatpush.msra.mxu2 %v2915_v39  ;;  %v2936_v47 = vld [vmem:[#allocation3 + $0x2] sm:$0x3]  ;;  %v2943_v49 = vld [vmem:[#allocation6 + $0x8] sm:$0xff]  ;;  %v2952_v51 = vld [vmem:[#allocation3 + $0x4] sm:$0x3] }
  0x21   :  { %238 = vmatpush.msra.mxu3 %v2921_v42  ;;  %325 = vmatpush.msrb.mxu1 %v2927_v44  ;;  %v2954_v52 = vld [vmem:[#allocation6] sm:$0xff]  ;;  %v2994_v4 = vld [vmem:[%s3572_s5 + $0x1] ss:$0 sm:$0xff] }
  0x22   :  { %217 = vmatpush.msra.mxu2 %v2919_v41  ;;  %518 = vmatpush.msrb.mxu0 %v2915_v39  ;;  %v2448_v59 = vld [vmem:[#allocation9 + $0x1] ss:$0 sm:$0xff] }
  0x23   :  { %239 = vmatpush.msra.mxu3 %v2925_v43  ;;  %326 = vmatpush.msrb.mxu1 %v2933_v46 }
  0x24   :  { %218 = vmatpush.msra.mxu2 %v2929_v45  ;;  %519 = vmatpush.msrb.mxu0 %v2919_v41 }
  0x25   :  { %2364 = vmatmul.msk.f32.gmra.mxu0 %vm141_vm0, %v140_v10  ;;  %2366 = vmatmul.msk.f32.vlgmr.msra.gmra.mxu2 %vm176_vm1, %v2936_v47 }
  0x26   :  { %240 = vmatpush.msra.mxu3 %v2938_v48  ;;  %327 = vmatpush.msrb.mxu1 %v2943_v49 }
  0x27   :  { %520 = vmatpush.msrb.mxu0 %v2929_v45 }
  0x28   :  { %241 = vmatpush.msra.mxu3 %v2946_v50  ;;  %328 = vmatpush.msrb.mxu1 %v2954_v52 }
  0x29   :  { %754 = vmatpush.msra.mxu0 %v2861_v0  ;;  %2367 = vmatmul.msk.f32.vlgmr.msra.gmra.mxu3 %vm176_vm1, %v2952_v51 }
  0x2a   :  { %497 = vmatpush.msrb.mxu3 %v2861_v0  ;;  %539 = vmatpush.msra.mxu1 %v2921_v42 }
  0x2b   :  { %755 = vmatpush.msra.mxu0 %v2863_v1 }
  0x2c   :  { %498 = vmatpush.msrb.mxu3 %v2863_v1  ;;  %540 = vmatpush.msra.mxu1 %v2925_v43 }
  0x2d   :  { %756 = vmatpush.msra.mxu0 %v2869_v3 }
  0x2e   :  { %499 = vmatpush.msrb.mxu3 %v2869_v3  ;;  %541 = vmatpush.msra.mxu1 %v2938_v48 }
  0x2f   :  { %757 = vmatpush.msra.mxu0 %v2874_v5 }
  0x30   :  { %500 = vmatpush.msrb.mxu3 %v2874_v5  ;;  %542 = vmatpush.msra.mxu1 %v2946_v50 }
  0x8e   :  { %v2890_v11 = vpop.permute.xlu0 %278 }
  0x90   :  { %v2904_v33 = vpop.permute.xlu1 %272 }
  0x9a   :  { %v2894_v14 = vpop.f32.mrf.mxu0 }
  0x9b   :  { %v2908_v34 = vadd.f32 %v2904_v33, %v2894_v14 }
  0x9d   :  { %v197_v12 = vpop.f32.mrf.mxu1 }
  0x9e   :  { %v281_v13 = vadd.f32 %v2890_v11, %v197_v12  ;;  %v246_v15 = vadd.f32 %v197_v12, %v2894_v14 }
  0xa0   :  { %283 = vrot.lane.b32.xlu0 %v281_v13, %s2780_s30  ;;  %v250_v17 = vadd.f32 %v2900_v16, %v246_v15 }
  0xa2   :  { %v2368_v18 = vmul.f32 -1.442695, %v250_v17 }
  0xa4   :  { %2454 = vpow2.f32 %v2368_v18 }
  0xa8   :  { %v220_v61 = vpop.f32.mrf.mxu2 }
  0xaa   :  { %v2455_v19 = vpop.eup %2454 }
  0xab   :  { %v254_v20 = vadd.f32 1.0, %v2455_v19 }
  0xac   :  { %v2989_v2 = vpop.f32.mrf.mxu3 }
  0xad   :  { %2456 = vrcp.f32 %v254_v20  ;;  %v266_v26 = vand.u32 2147483648, %v254_v20  ;;  %vm260_vm3 = vweird.f32 %v254_v20  ;;  %v264_v27 = vand.u32 2147483647, %v254_v20 }
  0xaf   :  { %v267_v29 = vor.u32 1.1754944e-38, %v266_v26  ;;  %vm265_vm5 = vcmp.eq.f32.partialorder %v264_v27, 8.507059e+37 }
  0xb3   :  { %v2457_v21 = vpop.eup %2456 }
  0xb4   :  { %v256_v22 = vmul.f32 %v2457_v21, %v254_v20  ;;  %vm261_vm2 = vweird.f32 %v2457_v21 }
  0xb5   :  { %vm262_vm4 = vmor %vm260_vm3, %vm261_vm2 }
  0xb6   :  { %v257_v23 = vsub.f32 1.0, %v256_v22 }
  0xb8   :  { %v258_v24 = vmul.f32 %v2457_v21, %v257_v23 }
  0xba   :  { %v259_v25 = vadd.f32 %v2457_v21, %v258_v24 }
  0xbc   :  { %v263_v28 = vsel %vm262_vm4, %v2457_v21, %v259_v25 }
  0xbd   :  { %v268_v31 = vsel %vm265_vm5, %v267_v29, %v263_v28 }
  0xbe   :  { %v293_v54 = vsub.f32 1.0, %v268_v31 }
 0x112   :  { %v284_v30 = vpop.permute.xlu0 %283 }
 0x113   :  { %v286_v32 = vmul.f32 %v284_v30, %v268_v31 }
 0x115   :  { %288 = vrot.lane.b32.xlu1 %v286_v32, %s2780_s30 }
 0x11d   :  { %365 = vrot.lane.b32.xlu1 %v2447_v40, %s2780_s30 }
 0x125   :  { %359 = vrot.lane.b32.xlu1 %v2448_v59, %s2780_s30 }
 0x187   :  { %v289_v35 = vpop.permute.xlu1 %288 }
 0x188   :  { %v291_v36 = vadd.f32 %v289_v35, %v2908_v34 }
 0x18a   :  { %2458 = vtanh.f32 %v291_v36 }
 0x18f   :  { %v2979_v60 = vpop.permute.xlu1 %365 }
 0x190   :  { %v2459_v37 = vpop.eup %2458  ;;  %v368_v62 = vadd.f32 %v2979_v60, %v220_v61 }
 0x191   :  { %295 = vrot.lane.b32.xlu2 %v2459_v37, %s2781_s0 }
 0x199   :  { %299 = vrot.lane.b32.xlu2 %v171_v7, %s2776_s18 }
 0x1a1   :  { %370 = vrot.lane.b32.xlu2 %v368_v62, %s2780_s30 }
 0x1eb   :  { %v296_v53 = vpop.permute.xlu2 %295 }
 0x1ec   :  { %v298_v56 = vmul.f32 %v296_v53, %v293_v54 }
 0x1f3   :  { %v300_v55 = vpop.permute.xlu2 %299 }
 0x1f4   :  { %v302_v57 = vmul.f32 %v300_v55, %v268_v31 }
 0x1f6   :  { %v2974_v58 = vadd.f32 %v302_v57, %v298_v56 }
 0x1f8   :  { %309 = vrot.lane.b32.xlu0 %v2974_v58, %s2781_s0 }
 0x1fb   :  { %v371_v26 = vpop.permute.xlu2 %370 }
 0x26a   :  { %v310_v63 = vpop.permute.xlu0 %309 }
 0x26b   :  { %2369 = vmatmul.msk.f32.vlgmr.msrb.gmra.mxu1 %vm176_vm1, %v310_v63  ;;  %2373 = vmatmul.msk.f32.vlgmr.msrb.gmra.mxu3 %vm176_vm1, %v310_v63 }
 0x26c   :  { %774 = vmatpush.msrb.mxu1 %v2913_v38 }
 0x26e   :  { %775 = vmatpush.msrb.mxu1 %v2915_v39 }
 0x270   :  { %776 = vmatpush.msrb.mxu1 %v2919_v41 }
 0x272   :  { %777 = vmatpush.msrb.mxu1 %v2929_v45 }
 0x2e8   :  { %v330_v6 = vpop.f32.mrf.mxu1 }
 0x2e9   :  { %v333_v7 = vadd.f32 %v330_v6, %v220_v61 }
 0x2eb   :  { %v337_v8 = vadd.f32 %v2994_v4, %v333_v7 }
 0x2ed   :  { %v2370_v9 = vmul.f32 -1.442695, %v337_v8 }
 0x2ee   :  { %v502_v10 = vpop.f32.mrf.mxu3 }
 0x2ef   :  { %2460 = vpow2.f32 %v2370_v9  ;;  %v571_v12 = vadd.f32 %v502_v10, %v2890_v11  ;;  %v548_v30 = vrot.slane %v502_v10, 6 }
 0x2f1   :  { %v573_v13 = vrot.slane %v571_v12, 6  ;;  %v550_v31 = vadd.f32 %v548_v30, %v2894_v14 }
 0x2f3   :  { %574 = vrot.lane.b32.xlu0 %v573_v13, %s2780_s30  ;;  %v551_v32 = vadd.f32 %v2900_v16, %v550_v31 }
 0x2f5   :  { %v2461_v15 = vpop.eup %2460  ;;  %v2376_v35 = vmul.f32 -1.442695, %v551_v32 }
 0x2f6   :  { %v341_v17 = vadd.f32 1.0, %v2461_v15  ;;  %v3009_v15 = vld [vmem:[#allocation6 + $0x38] sm:$0xff] }
 0x2f7   :  { %413 = vmatpush.msrb.mxu2 %v3009_v15  ;;  %687 = vmatpush.msra.mxu3 %v3009_v15 }
 0x2f8   :  { %2462 = vrcp.f32 %v341_v17  ;;  %v353_v21 = vand.u32 2147483648, %v341_v17  ;;  %v351_v23 = vand.u32 2147483647, %v341_v17  ;;  %vm347_vm7 = vweird.f32 %v341_v17 }
 0x2f9   :  { %2464 = vpow2.f32 %v2376_v35 }
 0x2fa   :  { %v354_v25 = vor.u32 1.1754944e-38, %v353_v21  ;;  %vm352_vm9 = vcmp.eq.f32.partialorder %v351_v23, 8.507059e+37 }
 0x2fe   :  { %v2463_v18 = vpop.eup %2462 }
 0x2ff   :  { %v343_v19 = vmul.f32 %v2463_v18, %v341_v17  ;;  %vm348_vm6 = vweird.f32 %v2463_v18  ;;  %v2465_v36 = vpop.eup %2464  ;;  %v3011_v17 = vld [vmem:[#allocation6 + $0x30] sm:$0xff] }
 0x300   :  { %vm349_vm8 = vmor %vm347_vm7, %vm348_vm6  ;;  %v555_v37 = vadd.f32 1.0, %v2465_v36  ;;  %414 = vmatpush.msrb.mxu2 %v3011_v17  ;;  %688 = vmatpush.msra.mxu3 %v3011_v17 }
 0x301   :  { %v344_v20 = vsub.f32 1.0, %v343_v19 }
 0x302   :  { %2466 = vrcp.f32 %v555_v37  ;;  %v567_v57 = vand.u32 2147483648, %v555_v37  ;;  %vm561_vm11 = vweird.f32 %v555_v37  ;;  %v565_v59 = vand.u32 2147483647, %v555_v37 }
 0x303   :  { %v345_v22 = vmul.f32 %v2463_v18, %v344_v20 }
 0x304   :  { %v568_v62 = vor.u32 1.1754944e-38, %v567_v57  ;;  %vm566_vm13 = vcmp.eq.f32.partialorder %v565_v59, 8.507059e+37 }
 0x305   :  { %v346_v24 = vadd.f32 %v2463_v18, %v345_v22 }
 0x307   :  { %v350_v27 = vsel %vm349_vm8, %v2463_v18, %v346_v24 }
 0x308   :  { %v355_v28 = vsel %vm352_vm9, %v354_v25, %v350_v27  ;;  %v2467_v40 = vpop.eup %2466  ;;  %v2450_v27 = vld [vmem:[#allocation11 + $0x2] ss:$0 sm:$0xff] }
 0x309   :  { %v373_v29 = vmul.f32 %v371_v26, %v355_v28  ;;  %v557_v53 = vmul.f32 %v2467_v40, %v555_v37  ;;  %vm562_vm10 = vweird.f32 %v2467_v40  ;;  %v380_v21 = vsub.f32 1.0, %v355_v28 }
 0x30a   :  { %vm563_vm12 = vmor %vm561_vm11, %vm562_vm10  ;;  %vm483_vm11 = vcmask 254977  }
 0x30b   :  { %375 = vrot.lane.b32.xlu2 %v373_v29, %s2780_s30  ;;  %v558_v54 = vsub.f32 1.0, %v557_v53  ;;  %v3028_v29 = vld [vmem:[#allocation6 + $0x20] sm:$0xff] }
 0x30d   :  { %v559_v55 = vmul.f32 %v2467_v40, %v558_v54  ;;  %v2451_v54 = vld [vmem:[#allocation9 + $0x2] ss:$0 sm:$0xff] }
 0x30f   :  { %v560_v56 = vadd.f32 %v2467_v40, %v559_v55 }
 0x311   :  { %v564_v61 = vsel %vm563_vm12, %v2467_v40, %v560_v56  ;;  %v3071_v56 = vpop.f32.mrf.mxu0 }
 0x312   :  { %v569_v8 = vsel %vm566_vm13, %v568_v62, %v564_v61 }
 0x313   :  { %386 = vrot.lane.b32.xlu2 %v2936_v47, %s2776_s18  ;;  %v3004_v47 = vpop.permute.xlu1 %359  ;;  %v584_v30 = vsub.f32 1.0, %v569_v8 }
 0x314   :  { %v362_v63 = vadd.f32 %v3004_v47, %v330_v6  ;;  %v3015_v6 = vld [vmem:[#allocation6 + $0x28] sm:$0xff] }
 0x315   :  { %415 = vmatpush.msrb.mxu2 %v3015_v6  ;;  %689 = vmatpush.msra.mxu3 %v3015_v6 }
 0x317   :  { %416 = vmatpush.msrb.mxu2 %v3028_v29  ;;  %690 = vmatpush.msra.mxu3 %v3028_v29 }
 0x319   :  { %616 = vmatpush.msra.mxu2 %v2927_v44  ;;  %873 = vmatpush.msrb.mxu3 %v2927_v44 }
 0x31b   :  { %617 = vmatpush.msra.mxu2 %v2933_v46  ;;  %874 = vmatpush.msrb.mxu3 %v2933_v46 }
 0x31d   :  { %618 = vmatpush.msra.mxu2 %v2943_v49  ;;  %875 = vmatpush.msrb.mxu3 %v2943_v49 }
 0x31f   :  { %619 = vmatpush.msra.mxu2 %v2954_v52  ;;  %876 = vmatpush.msrb.mxu3 %v2954_v52 }
 0x365   :  { %v575_v7 = vpop.permute.xlu0 %574  ;;  %v376_v9 = vpop.permute.xlu2 %375 }
 0x366   :  { %v577_v10 = vmul.f32 %v575_v7, %v569_v8  ;;  %v378_v12 = vadd.f32 %v376_v9, %v362_v63 }
 0x368   :  { %2468 = vtanh.f32 %v378_v12  ;;  %579 = vrot.lane.b32.xlu0 %v577_v10, %s2780_s30 }
 0x36d   :  { %v387_v20 = vpop.permute.xlu2 %386 }
 0x36e   :  { %v2469_v13 = vpop.eup %2468  ;;  %v389_v23 = vmul.f32 %v387_v20, %v355_v28  ;;  %v590_v28 = vrot.slane %v2974_v58, 6 }
 0x36f   :  { %382 = vrot.lane.b32.xlu1 %v2469_v13, %s2781_s0 }
 0x370   :  { %v592_v35 = vmul.f32 %v590_v28, %v569_v8 }
 0x3da   :  { %v580_v18 = vpop.permute.xlu0 %579 }
 0x3db   :  { %v582_v19 = vadd.f32 %v580_v18, %v2908_v34 }
 0x3dd   :  { %2470 = vtanh.f32 %v582_v19 }
 0x3e1   :  { %v383_v22 = vpop.permute.xlu1 %382 }
 0x3e2   :  { %v385_v24 = vmul.f32 %v383_v22, %v380_v21 }
 0x3e3   :  { %v2471_v25 = vpop.eup %2470 }
 0x3e4   :  { %v3022_v26 = vadd.f32 %v389_v23, %v385_v24  ;;  %586 = vrot.lane.b32.xlu0 %v2471_v25, %s2781_s0 }
 0x3e6   :  { %397 = vrot.lane.b32.xlu1 %v3022_v26, %s2781_s0 }
 0x3ec   :  { %453 = vrot.lane.b32.xlu0 %v2450_v27, %s2780_s30 }
 0x456   :  { %v587_v31 = vpop.permute.xlu0 %586 }
 0x457   :  { %v589_v32 = vmul.f32 %v587_v31, %v584_v30 }
 0x458   :  { %v398_v36 = vpop.permute.xlu1 %397 }
 0x459   :  { %v3041_v37 = vadd.f32 %v592_v35, %v589_v32  ;;  %2371 = vmatmul.msk.f32.vlgmr.msrb.gmra.mxu2 %vm176_vm1, %v398_v36  ;;  %2374 = vmatmul.msk.f32.vlgmr.msrb.gmra.mxu0 %vm176_vm1, %v398_v36 }
 0x45a   :  { %796 = vmatpush.msrb.mxu2 %v2921_v42  ;;  %944 = vmatpush.msrb.mxu0 %v3009_v15 }
 0x45b   :  { %v599_v40 = vrot.slane %v3041_v37, 2 }
 0x45c   :  { %797 = vmatpush.msrb.mxu2 %v2925_v43  ;;  %945 = vmatpush.msrb.mxu0 %v3011_v17 }
 0x45d   :  { %600 = vrot.lane.b32.xlu2 %v599_v40, %s2781_s0 }
 0x45e   :  { %v3051_v58 = vpop.permute.xlu0 %453  ;;  %798 = vmatpush.msrb.mxu2 %v2938_v48  ;;  %946 = vmatpush.msrb.mxu0 %v3015_v6 }
 0x45f   :  { %v456_v53 = vadd.f32 %v3051_v58, %v2989_v2 }
 0x460   :  { %799 = vmatpush.msrb.mxu2 %v2946_v50  ;;  %947 = vmatpush.msrb.mxu0 %v3028_v29 }
 0x461   :  { %458 = vrot.lane.b32.xlu1 %v456_v53, %s2780_s30 }
 0x469   :  { %447 = vrot.lane.b32.xlu1 %v2451_v54, %s2780_s30 }
 0x4b7   :  { %v601_v55 = vpop.permute.xlu2 %600 }
 0x4b8   :  { %2377 = vmatmul.msk.f32.vlgmr.msra.gmra.mxu2 %vm176_vm1, %v601_v55  ;;  %2381 = vmatmul.msk.f32.vlgmr.msra.gmra.mxu0 %vm176_vm1, %v601_v55 }
 0x4b9   :  { %1031 = vmatpush.msra.mxu2 %v2913_v38  ;;  %1130 = vmatpush.msra.mxu0 %v2927_v44  ;;  %v3078_v44 = vld [vmem:[%s3572_s5 + $0x2] ss:$0 sm:$0xff] }
 0x4bb   :  { %1032 = vmatpush.msra.mxu2 %v2915_v39  ;;  %1131 = vmatpush.msra.mxu0 %v2933_v46 }
 0x4bd   :  { %1033 = vmatpush.msra.mxu2 %v2919_v41  ;;  %1132 = vmatpush.msra.mxu0 %v2943_v49 }
 0x4bf   :  { %1034 = vmatpush.msra.mxu2 %v2929_v45  ;;  %1133 = vmatpush.msra.mxu0 %v2954_v52 }
 0x4d6   :  { %v522_v57 = vpop.f32.mrf.mxu0 }
 0x4d7   :  { %v646_v59 = vadd.f32 %v522_v57, %v2979_v60 }
 0x4d9   :  { %648 = vrot.lane.b32.xlu2 %v646_v59, %s2780_s30 }
 0x4dc   :  { %v418_v46 = vpop.f32.mrf.mxu2 }
 0x4dd   :  { %v421_v61 = vadd.f32 %v418_v46, %v2989_v2  ;;  %v459_v2 = vpop.permute.xlu1 %458 }
 0x4df   :  { %v425_v49 = vadd.f32 %v3078_v44, %v421_v61 }
 0x4e1   :  { %v2372_v62 = vmul.f32 -1.442695, %v425_v49 }
 0x4e3   :  { %2472 = vpow2.f32 %v2372_v62 }
 0x4e5   :  { %v3089_v55 = vpop.permute.xlu1 %447 }
 0x4e6   :  { %v450_v62 = vadd.f32 %v3089_v55, %v418_v46 }
 0x4e9   :  { %v2473_v52 = vpop.eup %2472 }
 0x4ea   :  { %v429_v63 = vadd.f32 1.0, %v2473_v52 }
 0x4ec   :  { %2474 = vrcp.f32 %v429_v63  ;;  %v441_v10 = vand.u32 2147483648, %v429_v63  ;;  %v439_v13 = vand.u32 2147483647, %v429_v63  ;;  %vm435_vm15 = vweird.f32 %v429_v63 }
 0x4ee   :  { %v442_v19 = vor.u32 1.1754944e-38, %v441_v10  ;;  %vm440_vm2 = vcmp.eq.f32.partialorder %v439_v13, 8.507059e+37 }
 0x4f2   :  { %v2475_v7 = vpop.eup %2474 }
 0x4f3   :  { %v431_v8 = vmul.f32 %v2475_v7, %v429_v63  ;;  %vm436_vm14 = vweird.f32 %v2475_v7 }
 0x4f4   :  { %vm437_vm0 = vmor %vm435_vm15, %vm436_vm14 }
 0x4f5   :  { %v432_v9 = vsub.f32 1.0, %v431_v8 }
 0x4f7   :  { %v433_v12 = vmul.f32 %v2475_v7, %v432_v9 }
 0x4f9   :  { %v434_v18 = vadd.f32 %v2475_v7, %v433_v12 }
 0x4fb   :  { %v438_v20 = vsel %vm437_vm0, %v2475_v7, %v434_v18 }
 0x4fc   :  { %v3082_v21 = vsel %vm440_vm2, %v442_v19, %v438_v20 }
 0x4fd   :  { %v461_v22 = vmul.f32 %v459_v2, %v3082_v21 }
 0x4ff   :  { %463 = vrot.lane.b32.xlu2 %v461_v22, %s2780_s30 }
 0x533   :  { %v649_v40 = vpop.permute.xlu2 %648 }
 0x535   :  { %v759_v23 = vpop.f32.mrf.mxu0 }
 0x536   :  { %v828_v24 = vadd.f32 %v759_v23, %v2890_v11  ;;  %v805_v46 = vrot.slane %v759_v23, 4 }
 0x538   :  { %v830_v25 = vrot.slane %v828_v24, 4  ;;  %v807_v13 = vadd.f32 %v805_v46, %v2894_v14 }
 0x53a   :  { %831 = vrot.lane.b32.xlu0 %v830_v25, %s2780_s30  ;;  %v808_v18 = vadd.f32 %v2900_v16, %v807_v13 }
 0x53b   :  { %v621_v27 = vpop.f32.mrf.mxu2 }
 0x53c   :  { %v624_v28 = vadd.f32 %v621_v27, %v522_v57  ;;  %v2384_v19 = vmul.f32 -1.442695, %v808_v18 }
 0x53e   :  { %v625_v30 = vadd.f32 %v2994_v4, %v624_v28 }
 0x540   :  { %v2378_v31 = vmul.f32 -1.442695, %v625_v30 }
 0x542   :  { %2476 = vpow2.f32 %v2378_v31 }
 0x548   :  { %v2477_v32 = vpop.eup %2476 }
 0x549   :  { %v629_v35 = vadd.f32 1.0, %v2477_v32 }
 0x54b   :  { %2478 = vrcp.f32 %v629_v35  ;;  %v641_v59 = vand.u32 2147483648, %v629_v35  ;;  %v639_v49 = vand.u32 2147483647, %v629_v35  ;;  %vm635_vm4 = vweird.f32 %v629_v35 }
 0x54d   :  { %v642_v63 = vor.u32 1.1754944e-38, %v641_v59  ;;  %vm640_vm6 = vcmp.eq.f32.partialorder %v639_v49, 8.507059e+37  ;;  %v468_v49 = vsub.f32 1.0, %v3082_v21 }
 0x551   :  { %v2479_v36 = vpop.eup %2478 }
 0x552   :  { %v631_v53 = vmul.f32 %v2479_v36, %v629_v35  ;;  %vm636_vm3 = vweird.f32 %v2479_v36 }
 0x553   :  { %vm637_vm5 = vmor %vm635_vm4, %vm636_vm3 }
 0x554   :  { %v632_v54 = vsub.f32 1.0, %v631_v53  ;;  %v645_v53 = vadd.f32 %v621_v27, %v3004_v47 }
 0x556   :  { %v633_v61 = vmul.f32 %v2479_v36, %v632_v54 }
 0x558   :  { %v634_v57 = vadd.f32 %v2479_v36, %v633_v61 }
 0x559   :  { %v464_v52 = vpop.permute.xlu2 %463 }
 0x55a   :  { %v466_v7 = vadd.f32 %v464_v52, %v450_v62  ;;  %v638_v8 = vsel %vm637_vm5, %v2479_v36, %v634_v57 }
 0x55b   :  { %v643_v9 = vsel %vm640_vm6, %v642_v63, %v638_v8 }
 0x55c   :  { %2480 = vtanh.f32 %v466_v7  ;;  %v651_v10 = vmul.f32 %v649_v40, %v643_v9  ;;  %v664_v13 = vmul.f32 %v643_v9, %v3022_v26  ;;  %v847_v26 = vrot.slane %v3041_v37, 6 }
 0x55d   :  { %2482 = vpow2.f32 %v2384_v19 }
 0x55e   :  { %653 = vrot.lane.b32.xlu0 %v651_v10, %s2780_s30 }
 0x562   :  { %v2481_v12 = vpop.eup %2480 }
 0x563   :  { %470 = vrot.lane.b32.xlu2 %v2481_v12, %s2781_s0  ;;  %v2483_v20 = vpop.eup %2482  ;;  %v658_v12 = vsub.f32 1.0, %v643_v9 }
 0x564   :  { %v812_v2 = vadd.f32 1.0, %v2483_v20 }
 0x566   :  { %474 = vrot.lane.b32.xlu0 %v2952_v51, %s2776_s18  ;;  %2484 = vrcp.f32 %v812_v2  ;;  %v824_v31 = vand.u32 2147483648, %v812_v2  ;;  %vm818_vm8 = vweird.f32 %v812_v2  ;;  %v822_v32 = vand.u32 2147483647, %v812_v2 }
 0x568   :  { %v825_v23 = vor.u32 1.1754944e-38, %v824_v31  ;;  %vm823_vm10 = vcmp.eq.f32.partialorder %v822_v32, 8.507059e+37 }
 0x56c   :  { %v2485_v22 = vpop.eup %2484 }
 0x56d   :  { %v814_v24 = vmul.f32 %v2485_v22, %v812_v2  ;;  %vm819_vm7 = vweird.f32 %v2485_v22 }
 0x56e   :  { %vm820_vm9 = vmor %vm818_vm8, %vm819_vm7 }
 0x56f   :  { %v815_v25 = vsub.f32 1.0, %v814_v24 }
 0x571   :  { %v816_v28 = vmul.f32 %v2485_v22, %v815_v25 }
 0x573   :  { %v817_v30 = vadd.f32 %v2485_v22, %v816_v28 }
 0x575   :  { %v821_v51 = vsel %vm820_vm9, %v2485_v22, %v817_v30 }
 0x576   :  { %v826_v36 = vsel %vm823_vm10, %v825_v23, %v821_v51 }
 0x577   :  { %v841_v9 = vsub.f32 1.0, %v826_v36  ;;  %v849_v2 = vmul.f32 %v847_v26, %v826_v36 }
 0x5ac   :  { %v832_v35 = vpop.permute.xlu0 %831 }
 0x5ad   :  { %v834_v40 = vmul.f32 %v832_v35, %v826_v36 }
 0x5af   :  { %836 = vrot.lane.b32.xlu1 %v834_v40, %s2780_s30 }
 0x5bd   :  { %v471_v61 = vpop.permute.xlu2 %470 }
 0x5be   :  { %v473_v52 = vmul.f32 %v471_v61, %v468_v49 }
 0x5d0   :  { %v654_v54 = vpop.permute.xlu0 %653 }
 0x5d1   :  { %v656_v59 = vadd.f32 %v654_v54, %v645_v53 }
 0x5d3   :  { %2486 = vtanh.f32 %v656_v59 }
 0x5d8   :  { %v475_v62 = vpop.permute.xlu0 %474 }
 0x5d9   :  { %v2487_v57 = vpop.eup %2486  ;;  %v477_v63 = vmul.f32 %v475_v62, %v3082_v21 }
 0x5da   :  { %660 = vrot.lane.b32.xlu1 %v2487_v57, %s2781_s0 }
 0x5db   :  { %v3103_v7 = vadd.f32 %v477_v63, %v473_v52 }
 0x5dd   :  { %480 = vrot.lane.b32.xlu0 %v3103_v7, %s2781_s0 }
 0x621   :  { %v837_v8 = vpop.permute.xlu1 %836 }
 0x622   :  { %v839_v27 = vadd.f32 %v837_v8, %v2908_v34 }
 0x624   :  { %2488 = vtanh.f32 %v839_v27 }
 0x62a   :  { %v2489_v10 = vpop.eup %2488 }
 0x62b   :  { %843 = vrot.lane.b32.xlu2 %v2489_v10, %s2781_s0 }
 0x64c   :  { %v661_v46 = vpop.permute.xlu1 %660 }
 0x64d   :  { %v663_v18 = vmul.f32 %v661_v46, %v658_v12 }
 0x64f   :  { %v3110_v21 = vadd.f32 %v664_v13, %v663_v18  ;;  %v481_v19 = vpop.permute.xlu0 %480 }
 0x650   :  { %484 = vst.msk [vmem:[#allocation2 - $0x1] sm:$0x2] %vm483_vm11, %v481_v19  ;;  %2375 = vmatmul.msk.f32.vlgmr.msra.gmra.mxu1 %vm176_vm1, %v481_v19 }
 0x651   :  { %671 = vrot.lane.b32.xlu1 %v3110_v21, %s2781_s0  ;;  %1011 = vmatpush.msra.mxu1 %v2861_v0 }
 0x653   :  { %1012 = vmatpush.msra.mxu1 %v2863_v1 }
 0x655   :  { %1013 = vmatpush.msra.mxu1 %v2869_v3 }
 0x657   :  { %1014 = vmatpush.msra.mxu1 %v2874_v5 }
 0x685   :  { %v844_v20 = vpop.permute.xlu2 %843 }
 0x686   :  { %v846_v22 = vmul.f32 %v844_v20, %v841_v9 }
 0x688   :  { %v3121_v24 = vadd.f32 %v849_v2, %v846_v22 }
 0x68a   :  { %v856_v25 = vrot.slane %v3121_v24, 4 }
 0x68c   :  { %857 = vrot.lane.b32.xlu2 %v856_v25, %s2781_s0 }
 0x6c3   :  { %v672_v28 = vpop.permute.xlu1 %671 }
 0x6c4   :  { %2379 = vmatmul.msk.f32.vlgmr.msra.gmra.mxu3 %vm176_vm1, %v672_v28  ;;  %2382 = vmatmul.msk.f32.vlgmr.msrb.gmra.mxu1 %vm176_vm1, %v672_v28  ;;  %v1104_v28 = vrot.slane %v3121_v24, 6 }
 0x6c5   :  { %1053 = vmatpush.msra.mxu3 %v2921_v42  ;;  %1201 = vmatpush.msrb.mxu1 %v3009_v15 }
 0x6c7   :  { %1054 = vmatpush.msra.mxu3 %v2925_v43  ;;  %1202 = vmatpush.msrb.mxu1 %v3011_v17 }
 0x6c9   :  { %1055 = vmatpush.msra.mxu3 %v2938_v48  ;;  %1203 = vmatpush.msrb.mxu1 %v3015_v6 }
 0x6cb   :  { %1056 = vmatpush.msra.mxu3 %v2946_v50  ;;  %1204 = vmatpush.msrb.mxu1 %v3028_v29 }
 0x6cd   :  { %v544_v0 = vpop.f32.mrf.mxu1 }
 0x6ce   :  { %v717_v1 = vadd.f32 %v544_v0, %v3051_v58 }
 0x6d0   :  { %719 = vrot.lane.b32.xlu0 %v717_v1, %s2780_s30 }
 0x6e6   :  { %v858_v3 = vpop.permute.xlu2 %857 }
 0x6e7   :  { %2385 = vmatmul.msk.f32.vlgmr.msrb.gmra.mxu3 %vm176_vm1, %v858_v3  ;;  %2389 = vmatmul.msk.f32.vlgmr.msra.gmra.mxu1 %vm176_vm1, %v858_v3 }
 0x6e8   :  { %1288 = vmatpush.msrb.mxu3 %v2913_v38 }
 0x6ea   :  { %1289 = vmatpush.msrb.mxu3 %v2915_v39 }
 0x6ec   :  { %1290 = vmatpush.msrb.mxu3 %v2919_v41 }
 0x6ee   :  { %1291 = vmatpush.msrb.mxu3 %v2929_v45 }
 0x741   :  { %v779_v5 = vpop.f32.mrf.mxu1 }
 0x742   :  { %v903_v15 = vadd.f32 %v779_v5, %v2979_v60  ;;  %v720_v57 = vpop.permute.xlu0 %719 }
 0x744   :  { %905 = vrot.lane.b32.xlu1 %v903_v15, %s2780_s30 }
 0x747   :  { %v3145_v17 = vpop.f32.mrf.mxu3 }
 0x748   :  { %v695_v6 = vadd.f32 %v3145_v17, %v544_v0 }
 0x74a   :  { %v696_v29 = vadd.f32 %v3078_v44, %v695_v6 }
 0x74c   :  { %v2380_v37 = vmul.f32 -1.442695, %v696_v29 }
 0x74e   :  { %2490 = vpow2.f32 %v2380_v37 }
 0x754   :  { %v2491_v30 = vpop.eup %2490 }
 0x755   :  { %v700_v31 = vadd.f32 1.0, %v2491_v30 }
 0x757   :  { %2492 = vrcp.f32 %v700_v31  ;;  %v712_v35 = vand.u32 2147483648, %v700_v31  ;;  %v710_v40 = vand.u32 2147483647, %v700_v31  ;;  %vm706_vm13 = vweird.f32 %v700_v31 }
 0x759   :  { %v713_v49 = vor.u32 1.1754944e-38, %v712_v35  ;;  %vm711_vm15 = vcmp.eq.f32.partialorder %v710_v40, 8.507059e+37 }
 0x75d   :  { %v2493_v32 = vpop.eup %2492 }
 0x75e   :  { %v702_v51 = vmul.f32 %v2493_v32, %v700_v31  ;;  %vm707_vm12 = vweird.f32 %v2493_v32 }
 0x75f   :  { %vm708_vm14 = vmor %vm706_vm13, %vm707_vm12 }
 0x760   :  { %v703_v23 = vsub.f32 1.0, %v702_v51 }
 0x762   :  { %v704_v36 = vmul.f32 %v2493_v32, %v703_v23 }
 0x764   :  { %v1016_v53 = vpop.f32.mrf.mxu1  ;;  %v705_v54 = vadd.f32 %v2493_v32, %v704_v36 }
 0x765   :  { %v1062_v59 = vrot.slane %v1016_v53, 2  ;;  %v1085_v61 = vadd.f32 %v1016_v53, %v2890_v11 }
 0x766   :  { %v709_v62 = vsel %vm708_vm14, %v2493_v32, %v705_v54 }
 0x767   :  { %v1064_v52 = vadd.f32 %v1062_v59, %v2894_v14  ;;  %v1087_v63 = vrot.slane %v1085_v61, 2  ;;  %v3151_v8 = vsel %vm711_vm15, %v713_v49, %v709_v62  ;;  %v716_v49 = vadd.f32 %v3145_v17, %v3089_v55 }
 0x768   :  { %v722_v27 = vmul.f32 %v720_v57, %v3151_v8  ;;  %v729_v17 = vsub.f32 1.0, %v3151_v8 }
 0x769   :  { %v1065_v10 = vadd.f32 %v2900_v16, %v1064_v52  ;;  %1088 = vrot.lane.b32.xlu2 %v1087_v63, %s2780_s30 }
 0x76a   :  { %724 = vrot.lane.b32.xlu0 %v722_v27, %s2780_s30  ;;  %v878_v26 = vpop.f32.mrf.mxu3 }
 0x76b   :  { %v2392_v12 = vmul.f32 -1.442695, %v1065_v10  ;;  %v881_v20 = vadd.f32 %v878_v26, %v779_v5 }
 0x76d   :  { %2494 = vpow2.f32 %v2392_v12  ;;  %v882_v0 = vadd.f32 %v2994_v4, %v881_v20  ;;  %v902_v12 = vadd.f32 %v878_v26, %v3004_v47 }
 0x76f   :  { %v2386_v6 = vmul.f32 -1.442695, %v882_v0 }
 0x773   :  { %v2495_v46 = vpop.eup %2494 }
 0x774   :  { %v1069_v13 = vadd.f32 1.0, %v2495_v46 }
 0x776   :  { %2496 = vrcp.f32 %v1069_v13  ;;  %v1081_v9 = vand.u32 2147483648, %v1069_v13  ;;  %v1079_v22 = vand.u32 2147483647, %v1069_v13  ;;  %vm1075_vm2 = vweird.f32 %v1069_v13 }
 0x777   :  { %2498 = vpow2.f32 %v2386_v6  ;;  %v3197_v6 = vld [vmem:[#allocation8] sm:$0xff] }
 0x778   :  { %v1082_v16 = vor.u32 1.1754944e-38, %v1081_v9  ;;  %vm1080_vm4 = vcmp.eq.f32.partialorder %v1079_v22, 8.507059e+37 }
 0x77c   :  { %v2497_v18 = vpop.eup %2496 }
 0x77d   :  { %v1071_v19 = vmul.f32 %v2497_v18, %v1069_v13  ;;  %vm1076_vm0 = vweird.f32 %v2497_v18  ;;  %v2499_v29 = vpop.eup %2498 }
 0x77e   :  { %vm1077_vm3 = vmor %vm1075_vm2, %vm1076_vm0  ;;  %v886_v37 = vadd.f32 1.0, %v2499_v29 }
 0x77f   :  { %v1072_v14 = vsub.f32 1.0, %v1071_v19 }
 0x780   :  { %2500 = vrcp.f32 %v886_v37  ;;  %v898_v23 = vand.u32 2147483648, %v886_v37  ;;  %vm892_vm6 = vweird.f32 %v886_v37  ;;  %v896_v24 = vand.u32 2147483647, %v886_v37 }
 0x781   :  { %v1073_v2 = vmul.f32 %v2497_v18, %v1072_v14  ;;  %v735_v14 = vmul.f32 %v3151_v8, %v3103_v7 }
 0x782   :  { %v899_v36 = vor.u32 1.1754944e-38, %v898_v23  ;;  %vm897_vm8 = vcmp.eq.f32.partialorder %v896_v24, 8.507059e+37 }
 0x783   :  { %v1074_v25 = vadd.f32 %v2497_v18, %v1073_v2 }
 0x785   :  { %v1078_v1 = vsel %vm1077_vm3, %v2497_v18, %v1074_v25 }
 0x786   :  { %v1083_v3 = vsel %vm1080_vm4, %v1082_v16, %v1078_v1  ;;  %v2501_v5 = vpop.eup %2500 }
 0x787   :  { %v1106_v15 = vmul.f32 %v1104_v28, %v1083_v3  ;;  %v888_v30 = vmul.f32 %v2501_v5, %v886_v37  ;;  %vm893_vm5 = vweird.f32 %v2501_v5  ;;  %v1098_v26 = vsub.f32 1.0, %v1083_v3 }
 0x788   :  { %vm894_vm7 = vmor %vm892_vm6, %vm893_vm5 }
 0x789   :  { %v889_v31 = vsub.f32 1.0, %v888_v30 }
 0x78b   :  { %v890_v32 = vmul.f32 %v2501_v5, %v889_v31 }
 0x78d   :  { %v891_v51 = vadd.f32 %v2501_v5, %v890_v32 }
 0x78f   :  { %v895_v35 = vsel %vm894_vm7, %v2501_v5, %v891_v51 }
 0x790   :  { %v900_v53 = vsel %vm897_vm8, %v899_v36, %v895_v35 }
 0x791   :  { %v915_v16 = vsub.f32 1.0, %v900_v53  ;;  %v921_v7 = vmul.f32 %v900_v53, %v3110_v21  ;;  %v3194_v21 = vld [vmem:[#allocation8 + $0x8] sm:$0xff] }
 0x7b6   :  { %v906_v40 = vpop.permute.xlu1 %905 }
 0x7b7   :  { %v908_v54 = vmul.f32 %v906_v40, %v900_v53 }
 0x7b9   :  { %910 = vrot.lane.b32.xlu1 %v908_v54, %s2780_s30 }
 0x7c3   :  { %v1089_v59 = vpop.permute.xlu2 %1088 }
 0x7c4   :  { %v1091_v61 = vmul.f32 %v1089_v59, %v1083_v3  ;;  %v3188_v3 = vld [vmem:[#allocation8 + $0x18] sm:$0xff] }
 0x7c6   :  { %1093 = vrot.lane.b32.xlu2 %v1091_v61, %s2780_s30 }
 0x7dc   :  { %v725_v62 = vpop.permute.xlu0 %724 }
 0x7dd   :  { %v727_v57 = vadd.f32 %v725_v62, %v716_v49 }
 0x7df   :  { %2502 = vtanh.f32 %v727_v57 }
 0x7e5   :  { %v2503_v52 = vpop.eup %2502 }
 0x7e6   :  { %731 = vrot.lane.b32.xlu0 %v2503_v52, %s2781_s0  ;;  %v3230_v52 = vld [vmem:[%s3572_s5] ss:$0 sm:$0xff] }
 0x820   :  { %v1094_v63 = vpop.permute.xlu2 %1093 }
 0x821   :  { %v1096_v27 = vadd.f32 %v1094_v63, %v2908_v34 }
 0x823   :  { %2504 = vtanh.f32 %v1096_v27 }
 0x829   :  { %v2505_v10 = vpop.eup %2504 }
 0x82a   :  { %1100 = vrot.lane.b32.xlu2 %v2505_v10, %s2781_s0 }
 0x82b   :  { %v911_v46 = vpop.permute.xlu1 %910 }
 0x82c   :  { %v913_v13 = vadd.f32 %v911_v46, %v902_v12 }
 0x82e   :  { %2506 = vtanh.f32 %v913_v13 }
 0x834   :  { %v2507_v18 = vpop.eup %2506 }
 0x835   :  { %917 = vrot.lane.b32.xlu1 %v2507_v18, %s2781_s0 }
 0x858   :  { %v732_v19 = vpop.permute.xlu0 %731 }
 0x859   :  { %v734_v9 = vmul.f32 %v732_v19, %v729_v17 }
 0x85b   :  { %v3171_v34 = vadd.f32 %v735_v14, %v734_v9 }
 0x85d   :  { %738 = vrot.lane.b32.xlu0 %v3171_v34, %s2781_s0 }
 0x884   :  { %v1101_v20 = vpop.permute.xlu2 %1100 }
 0x885   :  { %v1103_v2 = vmul.f32 %v1101_v20, %v1098_v26 }
 0x887   :  { %v3175_v22 = vadd.f32 %v1106_v15, %v1103_v2  ;;  %v3191_v15 = vld [vmem:[#allocation8 + $0x10] sm:$0xff] }
 0x889   :  { %v1113_v25 = vrot.slane %v3175_v22, 6  ;;  %v3271_v22 = vld [vmem:[#allocation6 + $0x18] sm:$0xff] }
 0x88a   :  { %1382 = vmatpush.msra.mxu1 %v3271_v22 }
 0x88b   :  { %1114 = vrot.lane.b32.xlu2 %v1113_v25, %s2781_s0 }
 0x8a7   :  { %v918_v28 = vpop.permute.xlu1 %917 }
 0x8a8   :  { %v920_v8 = vmul.f32 %v918_v28, %v915_v16 }
 0x8aa   :  { %v3182_v0 = vadd.f32 %v921_v7, %v920_v8 }
 0x8ac   :  { %928 = vrot.lane.b32.xlu1 %v3182_v0, %s2781_s0 }
 0x8cf   :  { %v739_v1 = vpop.permute.xlu0 %738 }
 0x8d0   :  { %741 = vst.msk [vmem:[#allocation2] sm:$0x2] %vm483_vm11, %v739_v1  ;;  %2383 = vmatmul.msk.f32.vlgmr.msrb.gmra.mxu2 %vm176_vm1, %v739_v1 }
 0x8d1   :  { %1268 = vmatpush.msrb.mxu2 %v3188_v3 }
 0x8d3   :  { %1269 = vmatpush.msrb.mxu2 %v3191_v15 }
 0x8d5   :  { %1270 = vmatpush.msrb.mxu2 %v3194_v21 }
 0x8d7   :  { %1271 = vmatpush.msrb.mxu2 %v3197_v6 }
 0x8e5   :  { %v1115_v37 = vpop.permute.xlu2 %1114 }
 0x91e   :  { %v929_v29 = vpop.permute.xlu1 %928 }
 0x91f   :  { %2387 = vmatmul.msk.f32.vlgmr.msrb.gmra.mxu0 %vm176_vm1, %v929_v29  ;;  %2390 = vmatmul.msk.f32.vlgmr.msra.gmra.mxu2 %vm176_vm1, %v929_v29 }
 0x920   :  { %1310 = vmatpush.msrb.mxu0 %v2921_v42 }
 0x922   :  { %1311 = vmatpush.msrb.mxu0 %v2925_v43 }
 0x924   :  { %1312 = vmatpush.msrb.mxu0 %v2938_v48 }
 0x926   :  { %1313 = vmatpush.msrb.mxu0 %v2946_v50 }
 0x927   :  { %2393 = vmatmul.msk.f32.vlgmr.msra.gmra.mxu0 %vm176_vm1, %v1115_v37  ;;  %2397 = vmatmul.msk.f32.vlgmr.msrb.gmra.mxu2 %vm176_vm1, %v1115_v37 }
 0x928   :  { %1540 = vmatpush.msra.mxu0 %v2913_v38 }
 0x92a   :  { %1541 = vmatpush.msra.mxu0 %v2915_v39 }
 0x92c   :  { %1542 = vmatpush.msra.mxu0 %v2919_v41 }
 0x92e   :  { %1543 = vmatpush.msra.mxu0 %v2929_v45 }
 0x953   :  { %v801_v42 = vpop.f32.mrf.mxu2 }
 0x954   :  { %v974_v43 = vadd.f32 %v801_v42, %v3051_v58 }
 0x956   :  { %976 = vrot.lane.b32.xlu0 %v974_v43, %s2780_s30 }
 0x99c   :  { %v3214_v48 = vpop.f32.mrf.mxu0 }
 0x99d   :  { %v952_v50 = vadd.f32 %v3214_v48, %v801_v42 }
 0x99f   :  { %v953_v5 = vadd.f32 %v3078_v44, %v952_v50 }
 0x9a1   :  { %v2388_v30 = vmul.f32 -1.442695, %v953_v5 }
 0x9a2   :  { %v1036_v31 = vpop.f32.mrf.mxu2 }
 0x9a3   :  { %2508 = vpow2.f32 %v2388_v30  ;;  %v1160_v38 = vadd.f32 %v1036_v31, %v2979_v60 }
 0x9a4   :  { %v1135_v10 = vpop.f32.mrf.mxu0 }
 0x9a5   :  { %1162 = vrot.lane.b32.xlu1 %v1160_v38, %s2780_s30  ;;  %v1138_v12 = vadd.f32 %v1135_v10, %v1036_v31 }
 0x9a7   :  { %v1139_v13 = vadd.f32 %v2994_v4, %v1138_v12 }
 0x9a9   :  { %v2509_v39 = vpop.eup %2508  ;;  %v2394_v17 = vmul.f32 -1.442695, %v1139_v13 }
 0x9aa   :  { %v957_v41 = vadd.f32 1.0, %v2509_v39  ;;  %v1273_v45 = vpop.f32.mrf.mxu2 }
 0x9ab   :  { %v1340_v32 = vadd.f32 %v1273_v45, %v2890_v11  ;;  %v1318_v57 = vadd.f32 %v1273_v45, %v3071_v56 }
 0x9ac   :  { %2510 = vrcp.f32 %v957_v41  ;;  %v969_v40 = vand.u32 2147483648, %v957_v41  ;;  %vm963_vm10 = vweird.f32 %v957_v41  ;;  %v967_v53 = vand.u32 2147483647, %v957_v41 }
 0x9ad   :  { %1342 = vrot.lane.b32.xlu2 %v1340_v32, %s2780_s30  ;;  %v1319_v63 = vadd.f32 %v3230_v52, %v1318_v57 }
 0x9ae   :  { %v970_v59 = vor.u32 1.1754944e-38, %v969_v40  ;;  %vm968_vm13 = vcmp.eq.f32.partialorder %v967_v53, 8.507059e+37  ;;  %v3241_v40 = vadd.f32 %v2904_v33, %v3071_v56 }
 0x9af   :  { %v2400_v27 = vmul.f32 -1.442695, %v1319_v63 }
 0x9b1   :  { %2512 = vpow2.f32 %v2400_v27 }
 0x9b2   :  { %v2511_v51 = vpop.eup %2510 }
 0x9b3   :  { %v959_v23 = vmul.f32 %v2511_v51, %v957_v41  ;;  %vm964_vm9 = vweird.f32 %v2511_v51 }
 0x9b4   :  { %vm965_vm12 = vmor %vm963_vm10, %vm964_vm9 }
 0x9b5   :  { %v960_v24 = vsub.f32 1.0, %v959_v23  ;;  %v973_v23 = vadd.f32 %v3214_v48, %v3089_v55 }
 0x9b7   :  { %v961_v35 = vmul.f32 %v2511_v51, %v960_v24  ;;  %v2513_v46 = vpop.eup %2512 }
 0x9b8   :  { %v1323_v18 = vadd.f32 1.0, %v2513_v46 }
 0x9b9   :  { %v962_v36 = vadd.f32 %v2511_v51, %v961_v35 }
 0x9ba   :  { %2514 = vrcp.f32 %v1323_v18  ;;  %v1335_v7 = vand.u32 2147483648, %v1323_v18  ;;  %vm1329_vm15 = vweird.f32 %v1323_v18  ;;  %v1333_v8 = vand.u32 2147483647, %v1323_v18 }
 0x9bb   :  { %v966_v54 = vsel %vm965_vm12, %v2511_v51, %v962_v36  ;;  %2516 = vpow2.f32 %v2394_v17 }
 0x9bc   :  { %v3222_v49 = vsel %vm968_vm13, %v970_v59, %v966_v54  ;;  %v1336_v29 = vor.u32 1.1754944e-38, %v1335_v7  ;;  %vm1334_vm2 = vcmp.eq.f32.partialorder %v1333_v8, 8.507059e+37  ;;  %v3288_v7 = vld [vmem:[#allocation8 + $0x50] sm:$0xff]  ;;  %v3291_v8 = vld [vmem:[#allocation8 + $0x48] sm:$0xff] }
 0x9bd   :  { %v986_v63 = vsub.f32 1.0, %v3222_v49  ;;  %v992_v33 = vmul.f32 %v3222_v49, %v3171_v34 }
 0x9c0   :  { %v2515_v19 = vpop.eup %2514 }
 0x9c1   :  { %v2517_v14 = vpop.eup %2516  ;;  %v1325_v9 = vmul.f32 %v2515_v19, %v1323_v18  ;;  %vm1330_vm14 = vweird.f32 %v2515_v19 }
 0x9c2   :  { %v1143_v26 = vadd.f32 1.0, %v2517_v14  ;;  %vm1331_vm0 = vmor %vm1329_vm15, %vm1330_vm14 }
 0x9c3   :  { %v1326_v20 = vsub.f32 1.0, %v1325_v9 }
 0x9c4   :  { %2518 = vrcp.f32 %v1143_v26  ;;  %v1155_v31 = vand.u32 2147483648, %v1143_v26  ;;  %vm1149_vm4 = vweird.f32 %v1143_v26  ;;  %v1153_v38 = vand.u32 2147483647, %v1143_v26 }
 0x9c5   :  { %v1327_v2 = vmul.f32 %v2515_v19, %v1326_v20 }
 0x9c6   :  { %v1156_v41 = vor.u32 1.1754944e-38, %v1155_v31  ;;  %vm1154_vm6 = vcmp.eq.f32.partialorder %v1153_v38, 8.507059e+37 }
 0x9c7   :  { %v1328_v16 = vadd.f32 %v2515_v19, %v1327_v2  ;;  %v3279_v2 = vld [vmem:[#allocation6] sm:$0xff] }
 0x9c8   :  { %v977_v61 = vpop.permute.xlu0 %976 }
 0x9c9   :  { %v979_v62 = vmul.f32 %v977_v61, %v3222_v49  ;;  %v1332_v1 = vsel %vm1331_vm0, %v2515_v19, %v1328_v16  ;;  %v1159_v61 = vadd.f32 %v1135_v10, %v3004_v47 }
 0x9ca   :  { %v2519_v28 = vpop.eup %2518  ;;  %v1337_v42 = vsel %vm1334_vm2, %v1336_v29, %v1332_v1  ;;  %v3299_v29 = vld [vmem:[#allocation8 + $0x38] sm:$0xff] }
 0x9cb   :  { %981 = vrot.lane.b32.xlu0 %v979_v62, %s2780_s30  ;;  %v1145_v4 = vmul.f32 %v2519_v28, %v1143_v26  ;;  %vm1150_vm3 = vweird.f32 %v2519_v28  ;;  %v1352_v13 = vsub.f32 1.0, %v1337_v42  ;;  %v1359_v18 = vmul.f32 %v1337_v42, %v1113_v25  ;;  %v3273_v25 = vld [vmem:[#allocation6 + $0x10] sm:$0xff] }
 0x9cc   :  { %vm1151_vm5 = vmor %vm1149_vm4, %vm1150_vm3  ;;  %1383 = vmatpush.msra.mxu1 %v3273_v25 }
 0x9cd   :  { %v1146_v50 = vsub.f32 1.0, %v1145_v4  ;;  %v3294_v4 = vld [vmem:[#allocation8 + $0x40] sm:$0xff] }
 0x9cf   :  { %v1147_v5 = vmul.f32 %v2519_v28, %v1146_v50 }
 0x9d1   :  { %v1148_v30 = vadd.f32 %v2519_v28, %v1147_v5 }
 0x9d3   :  { %v1152_v39 = vsel %vm1151_vm5, %v2519_v28, %v1148_v30  ;;  %v3285_v28 = vld [vmem:[#allocation8 + $0x58] sm:$0xff] }
 0x9d4   :  { %v1157_v32 = vsel %vm1154_vm6, %v1156_v41, %v1152_v39 }
 0x9d5   :  { %v1172_v14 = vsub.f32 1.0, %v1157_v32  ;;  %v1178_v34 = vmul.f32 %v1157_v32, %v3182_v0  ;;  %v3276_v0 = vld [vmem:[#allocation6 + $0x8] sm:$0xff] }
 0x9d6   :  { %1384 = vmatpush.msra.mxu1 %v3276_v0 }
 0x9d8   :  { %1385 = vmatpush.msra.mxu1 %v3279_v2 }
 0xa07   :  { %v1343_v37 = vpop.permute.xlu2 %1342 }
 0xa08   :  { %v1345_v43 = vmul.f32 %v1343_v37, %v1337_v42  ;;  %v3302_v37 = vld [vmem:[#allocation8 + $0x30] sm:$0xff]  ;;  %v3305_v42 = vld [vmem:[#allocation8 + $0x28] sm:$0xff] }
 0xa0a   :  { %1347 = vrot.lane.b32.xlu2 %v1345_v43, %s2780_s30  ;;  %v3308_v43 = vld [vmem:[#allocation8 + $0x20] sm:$0xff] }
 0xa17   :  { %v1163_v45 = vpop.permute.xlu1 %1162 }
 0xa18   :  { %v1165_v51 = vmul.f32 %v1163_v45, %v1157_v32 }
 0xa1a   :  { %1167 = vrot.lane.b32.xlu1 %v1165_v51, %s2780_s30 }
 0xa3d   :  { %v982_v24 = vpop.permute.xlu0 %981 }
 0xa3e   :  { %v984_v35 = vadd.f32 %v982_v24, %v973_v23 }
 0xa40   :  { %2520 = vtanh.f32 %v984_v35 }
 0xa46   :  { %v2521_v36 = vpop.eup %2520 }
 0xa47   :  { %988 = vrot.lane.b32.xlu0 %v2521_v36, %s2781_s0 }
 0xa64   :  { %v1348_v53 = vpop.permute.xlu2 %1347 }
 0xa65   :  { %v1350_v54 = vadd.f32 %v1348_v53, %v3241_v40 }
 0xa67   :  { %2522 = vtanh.f32 %v1350_v54 }
 0xa6d   :  { %v2523_v59 = vpop.eup %2522 }
 0xa6e   :  { %1354 = vrot.lane.b32.xlu2 %v2523_v59, %s2781_s0 }
 0xa8c   :  { %v1168_v48 = vpop.permute.xlu1 %1167 }
 0xa8d   :  { %v1170_v62 = vadd.f32 %v1168_v48, %v1159_v61 }
 0xa8f   :  { %2524 = vtanh.f32 %v1170_v62 }
 0xa95   :  { %v2525_v57 = vpop.eup %2524 }
 0xa96   :  { %1174 = vrot.lane.b32.xlu1 %v2525_v57, %s2781_s0 }
 0xab9   :  { %v989_v27 = vpop.permute.xlu0 %988 }
 0xaba   :  { %v991_v12 = vmul.f32 %v989_v27, %v986_v63 }
 0xabc   :  { %v3250_v46 = vadd.f32 %v992_v33, %v991_v12 }
 0xabe   :  { %995 = vrot.lane.b32.xlu0 %v3250_v46, %s2781_s0 }
 0xac8   :  { %v1355_v10 = vpop.permute.xlu2 %1354 }
 0xac9   :  { %v1357_v17 = vmul.f32 %v1355_v10, %v1352_v13 }
 0xacb   :  { %v3256_v19 = vadd.f32 %v1359_v18, %v1357_v17 }
 0xacd   :  { %1366 = vrot.lane.b32.xlu2 %v3256_v19, %s2781_s0 }
 0xb08   :  { %v1175_v9 = vpop.permute.xlu1 %1174 }
 0xb09   :  { %v1177_v49 = vmul.f32 %v1175_v9, %v1172_v14 }
 0xb0b   :  { %v3261_v26 = vadd.f32 %v1178_v34, %v1177_v49 }
 0xb0d   :  { %1185 = vrot.lane.b32.xlu1 %v3261_v26, %s2781_s0 }
 0xb27   :  { %v1367_v1 = vpop.permute.xlu2 %1366 }
 0xb30   :  { %v996_v20 = vpop.permute.xlu0 %995 }
 0xb31   :  { %998 = vst.msk [vmem:[#allocation2 + $0x1] sm:$0x2] %vm483_vm11, %v996_v20  ;;  %2391 = vmatmul.msk.f32.vlgmr.msra.gmra.mxu3 %vm176_vm1, %v996_v20 }
 0xb32   :  { %1520 = vmatpush.msra.mxu3 %v3188_v3 }
 0xb34   :  { %1521 = vmatpush.msra.mxu3 %v3191_v15 }
 0xb36   :  { %1522 = vmatpush.msra.mxu3 %v3194_v21 }
 0xb38   :  { %1523 = vmatpush.msra.mxu3 %v3197_v6 }
 0xb7f   :  { %v1186_v16 = vpop.permute.xlu1 %1185 }
 0xb80   :  { %2395 = vmatmul.msk.f32.vlgmr.msrb.gmra.mxu1 %vm176_vm1, %v1186_v16  ;;  %2398 = vmatmul.msk.f32.vlgmr.msrb.gmra.mxu3 %vm176_vm1, %v1186_v16 }
 0xb81   :  { %1562 = vmatpush.msrb.mxu1 %v3285_v28 }
 0xb83   :  { %1563 = vmatpush.msrb.mxu1 %v3288_v7 }
 0xb85   :  { %1564 = vmatpush.msrb.mxu1 %v3291_v8 }
 0xb87   :  { %1565 = vmatpush.msrb.mxu1 %v3294_v4 }
 0xb88   :  { %2401 = vmatmul.msk.f32.vlgmr.msra.gmra.mxu1 %vm176_vm1, %v1367_v1  ;;  %2405 = vmatmul.msk.f32.vlgmr.msra.gmra.mxu3 %vm176_vm1, %v1367_v1 }
 0xb89   :  { %1797 = vmatpush.msra.mxu1 %v3299_v29 }
 0xb8b   :  { %1798 = vmatpush.msra.mxu1 %v3302_v37 }
 0xb8d   :  { %1799 = vmatpush.msra.mxu1 %v3305_v42 }
 0xb8f   :  { %1800 = vmatpush.msra.mxu1 %v3308_v43 }
 0xbb4   :  { %v1058_v50 = vpop.f32.mrf.mxu3 }
 0xbb5   :  { %v1231_v5 = vadd.f32 %v1058_v50, %v3051_v58 }
 0xbb7   :  { %1233 = vrot.lane.b32.xlu0 %v1231_v5, %s2780_s30 }
 0xbfd   :  { %v3313_v30 = vpop.f32.mrf.mxu1 }
 0xbfe   :  { %v1209_v31 = vadd.f32 %v3313_v30, %v1058_v50 }
 0xc00   :  { %v1210_v38 = vadd.f32 %v3078_v44, %v1209_v31  ;;  %v1613_v31 = vrot.slane %v3256_v19, 6 }
 0xc02   :  { %v2396_v39 = vmul.f32 -1.442695, %v1210_v38 }
 0xc03   :  { %v1293_v41 = vpop.f32.mrf.mxu3 }
 0xc04   :  { %2526 = vpow2.f32 %v2396_v39  ;;  %v1412_v45 = vadd.f32 %v1293_v41, %v2979_v60 }
 0xc06   :  { %1414 = vrot.lane.b32.xlu1 %v1412_v45, %s2780_s30 }
 0xc0a   :  { %v2527_v32 = vpop.eup %2526 }
 0xc0b   :  { %v1214_v51 = vadd.f32 1.0, %v2527_v32  ;;  %v1525_v23 = vpop.f32.mrf.mxu3  ;;  %v1387_v32 = vpop.f32.mrf.mxu1 }
 0xc0c   :  { %v1571_v24 = vrot.slane %v1525_v23, 6  ;;  %v1594_v35 = vadd.f32 %v1525_v23, %v2890_v11  ;;  %v3328_v23 = vld [vmem:[%s3572_s5 + $0x1] ss:$0 sm:$0xff] }
 0xc0d   :  { %2528 = vrcp.f32 %v1214_v51  ;;  %v1226_v12 = vand.u32 2147483648, %v1214_v51  ;;  %vm1220_vm8 = vweird.f32 %v1214_v51  ;;  %v1224_v13 = vand.u32 2147483647, %v1214_v51 }
 0xc0e   :  { %v1573_v36 = vadd.f32 %v1571_v24, %v3071_v56  ;;  %v1596_v53 = vrot.slane %v1594_v35, 6 }
 0xc0f   :  { %v1227_v14 = vor.u32 1.1754944e-38, %v1226_v12  ;;  %vm1225_vm10 = vcmp.eq.f32.partialorder %v1224_v13, 8.507059e+37 }
 0xc10   :  { %v1574_v54 = vadd.f32 %v3230_v52, %v1573_v36  ;;  %1597 = vrot.lane.b32.xlu2 %v1596_v53, %s2780_s30 }
 0xc12   :  { %v2408_v44 = vmul.f32 -1.442695, %v1574_v54 }
 0xc13   :  { %v2529_v59 = vpop.eup %2528 }
 0xc14   :  { %2530 = vpow2.f32 %v2408_v44  ;;  %v1216_v61 = vmul.f32 %v2529_v59, %v1214_v51  ;;  %vm1221_vm7 = vweird.f32 %v2529_v59  ;;  %v1390_v51 = vadd.f32 %v1387_v32, %v1293_v41 }
 0xc15   :  { %vm1222_vm9 = vmor %vm1220_vm8, %vm1221_vm7 }
 0xc16   :  { %v1217_v62 = vsub.f32 1.0, %v1216_v61  ;;  %v1391_v24 = vadd.f32 %v3328_v23, %v1390_v51 }
 0xc18   :  { %v1218_v63 = vmul.f32 %v2529_v59, %v1217_v62  ;;  %v2402_v35 = vmul.f32 -1.442695, %v1391_v24 }
 0xc1a   :  { %v2531_v48 = vpop.eup %2530  ;;  %v1219_v27 = vadd.f32 %v2529_v59, %v1218_v63 }
 0xc1b   :  { %v1578_v57 = vadd.f32 1.0, %v2531_v48 }
 0xc1c   :  { %v1223_v18 = vsel %vm1222_vm9, %v2529_v59, %v1219_v27 }
 0xc1d   :  { %2532 = vrcp.f32 %v1578_v57  ;;  %v1590_v9 = vand.u32 2147483648, %v1578_v57  ;;  %v1588_v49 = vand.u32 2147483647, %v1578_v57  ;;  %v1228_v16 = vsel %vm1225_vm10, %v1227_v14, %v1223_v18 }
 0xc1e   :  { %vm1584_vm13 = vweird.f32 %v1578_v57  ;;  %2534 = vpow2.f32 %v2402_v35 }
 0xc1f   :  { %v1591_v5 = vor.u32 1.1754944e-38, %v1590_v9  ;;  %vm1589_vm15 = vcmp.eq.f32.partialorder %v1588_v49, 8.507059e+37 }
 0xc23   :  { %v2533_v33 = vpop.eup %2532 }
 0xc24   :  { %v1580_v10 = vmul.f32 %v2533_v33, %v1578_v57  ;;  %vm1585_vm12 = vweird.f32 %v2533_v33  ;;  %v2535_v36 = vpop.eup %2534 }
 0xc25   :  { %vm1586_vm14 = vmor %vm1584_vm13, %vm1585_vm12  ;;  %v1395_v53 = vadd.f32 1.0, %v2535_v36 }
 0xc26   :  { %v1581_v17 = vsub.f32 1.0, %v1580_v10  ;;  %v1230_v10 = vadd.f32 %v3313_v30, %v3089_v55  ;;  %v1243_v30 = vsub.f32 1.0, %v1228_v16 }
 0xc27   :  { %2536 = vrcp.f32 %v1395_v53  ;;  %v1407_v62 = vand.u32 2147483648, %v1395_v53  ;;  %vm1401_vm2 = vweird.f32 %v1395_v53  ;;  %v1405_v57 = vand.u32 2147483647, %v1395_v53 }
 0xc28   :  { %v1582_v34 = vmul.f32 %v2533_v33, %v1581_v17 }
 0xc29   :  { %v1234_v20 = vpop.permute.xlu0 %1233  ;;  %v1408_v27 = vor.u32 1.1754944e-38, %v1407_v62  ;;  %vm1406_vm4 = vcmp.eq.f32.partialorder %v1405_v57, 8.507059e+37 }
 0xc2a   :  { %v1236_v1 = vmul.f32 %v1234_v20, %v1228_v16  ;;  %v1583_v50 = vadd.f32 %v2533_v33, %v1582_v34  ;;  %v1411_v20 = vadd.f32 %v1387_v32, %v3004_v47 }
 0xc2c   :  { %1238 = vrot.lane.b32.xlu0 %v1236_v1, %s2780_s30  ;;  %v1587_v38 = vsel %vm1586_vm14, %v2533_v33, %v1583_v50 }
 0xc2d   :  { %v1592_v39 = vsel %vm1589_vm15, %v1591_v5, %v1587_v38  ;;  %v2537_v19 = vpop.eup %2536  ;;  %v1249_v38 = vmul.f32 %v1228_v16, %v3250_v46 }
 0xc2e   :  { %v1615_v45 = vmul.f32 %v1613_v31, %v1592_v39  ;;  %v1397_v54 = vmul.f32 %v2537_v19, %v1395_v53  ;;  %vm1402_vm0 = vweird.f32 %v2537_v19  ;;  %v1607_v35 = vsub.f32 1.0, %v1592_v39 }
 0xc2f   :  { %vm1403_vm3 = vmor %vm1401_vm2, %vm1402_vm0 }
 0xc30   :  { %v1398_v44 = vsub.f32 1.0, %v1397_v54 }
 0xc32   :  { %v1399_v41 = vmul.f32 %v2537_v19, %v1398_v44 }
 0xc34   :  { %v1400_v48 = vadd.f32 %v2537_v19, %v1399_v41 }
 0xc36   :  { %v1404_v63 = vsel %vm1403_vm3, %v2537_v19, %v1400_v48 }
 0xc37   :  { %v1409_v12 = vsel %vm1406_vm4, %v1408_v27, %v1404_v63 }
 0xc38   :  { %v1424_v54 = vsub.f32 1.0, %v1409_v12 }
 0xc6a   :  { %v1598_v59 = vpop.permute.xlu2 %1597 }
 0xc6b   :  { %v1600_v61 = vmul.f32 %v1598_v59, %v1592_v39  ;;  %v1430_v59 = vmul.f32 %v1409_v12, %v3261_v26  ;;  %v3356_v39 = vld [vmem:[#allocation6 + $0x30] sm:$0xff]  ;;  %v3364_v26 = vld [vmem:[#allocation6 + $0x20] sm:$0xff] }
 0xc6d   :  { %1602 = vrot.lane.b32.xlu2 %v1600_v61, %s2780_s30  ;;  %v3354_v61 = vld [vmem:[#allocation6 + $0x38] sm:$0xff] }
 0xc6e   :  { %1453 = vmatpush.msra.mxu2 %v3354_v61  ;;  %1710 = vmatpush.msrb.mxu3 %v3354_v61 }
 0xc70   :  { %1454 = vmatpush.msra.mxu2 %v3356_v39  ;;  %1711 = vmatpush.msrb.mxu3 %v3356_v39 }
 0xc78   :  { %v1415_v33 = vpop.permute.xlu1 %1414 }
 0xc79   :  { %v1417_v13 = vmul.f32 %v1415_v33, %v1409_v12 }
 0xc7b   :  { %1419 = vrot.lane.b32.xlu1 %v1417_v13, %s2780_s30 }
 0xc9e   :  { %v1239_v18 = vpop.permute.xlu0 %1238 }
 0xc9f   :  { %v1241_v17 = vadd.f32 %v1239_v18, %v1230_v10 }
 0xca1   :  { %2538 = vtanh.f32 %v1241_v17 }
 0xca7   :  { %v2539_v14 = vpop.eup %2538 }
 0xca8   :  { %1245 = vrot.lane.b32.xlu0 %v2539_v14, %s2781_s0 }
 0xcc7   :  { %v1603_v9 = vpop.permute.xlu2 %1602 }
 0xcc8   :  { %v1605_v34 = vadd.f32 %v1603_v9, %v3241_v40 }
 0xcca   :  { %2540 = vtanh.f32 %v1605_v34 }
 0xcd0   :  { %v2541_v49 = vpop.eup %2540 }
 0xcd1   :  { %1609 = vrot.lane.b32.xlu2 %v2541_v49, %s2781_s0 }
 0xced   :  { %v1420_v1 = vpop.permute.xlu1 %1419 }
 0xcee   :  { %v1422_v50 = vadd.f32 %v1420_v1, %v1411_v20 }
 0xcf0   :  { %2542 = vtanh.f32 %v1422_v50 }
 0xcf6   :  { %v2543_v5 = vpop.eup %2542 }
 0xcf7   :  { %1426 = vrot.lane.b32.xlu1 %v2543_v5, %s2781_s0 }
 0xd1a   :  { %v1246_v31 = vpop.permute.xlu0 %1245 }
 0xd1b   :  { %v1248_v51 = vmul.f32 %v1246_v31, %v1243_v30 }
 0xd1d   :  { %v3341_v24 = vadd.f32 %v1249_v38, %v1248_v51 }
 0xd1f   :  { %1252 = vrot.lane.b32.xlu0 %v3341_v24, %s2781_s0 }
 0xd2b   :  { %v1610_v36 = vpop.permute.xlu2 %1609 }
 0xd2c   :  { %v1612_v53 = vmul.f32 %v1610_v36, %v1607_v35 }
 0xd2e   :  { %v3345_v32 = vadd.f32 %v1615_v45, %v1612_v53  ;;  %v3360_v45 = vld [vmem:[#allocation6 + $0x28] sm:$0xff] }
 0xd2f   :  { %1455 = vmatpush.msra.mxu2 %v3360_v45  ;;  %1712 = vmatpush.msrb.mxu3 %v3360_v45 }
 0xd30   :  { %v1622_v19 = vrot.slane %v3345_v32, 2 }
 0xd31   :  { %1456 = vmatpush.msra.mxu2 %v3364_v26  ;;  %1713 = vmatpush.msrb.mxu3 %v3364_v26 }
 0xd32   :  { %1623 = vrot.lane.b32.xlu2 %v1622_v19, %s2781_s0 }
 0xd33   :  { %1639 = vmatpush.msrb.mxu2 %v3271_v22  ;;  %1896 = vmatpush.msra.mxu3 %v3271_v22 }
 0xd35   :  { %1640 = vmatpush.msrb.mxu2 %v3273_v25  ;;  %1897 = vmatpush.msra.mxu3 %v3273_v25 }
 0xd37   :  { %1641 = vmatpush.msrb.mxu2 %v3276_v0  ;;  %1898 = vmatpush.msra.mxu3 %v3276_v0 }
 0xd39   :  { %1642 = vmatpush.msrb.mxu2 %v3279_v2  ;;  %1899 = vmatpush.msra.mxu3 %v3279_v2 }
 0xd69   :  { %v1427_v44 = vpop.permute.xlu1 %1426 }
 0xd6a   :  { %v1429_v46 = vmul.f32 %v1427_v44, %v1424_v54 }
 0xd6c   :  { %v3350_v16 = vadd.f32 %v1430_v59, %v1429_v46 }
 0xd6e   :  { %1437 = vrot.lane.b32.xlu1 %v3350_v16, %s2781_s0 }
 0xd8c   :  { %v1624_v62 = vpop.permute.xlu2 %1623 }
 0xd91   :  { %v1253_v41 = vpop.permute.xlu0 %1252 }
 0xd92   :  { %1255 = vst.msk [vmem:[#allocation2 + $0x2] sm:$0x2] %vm483_vm11, %v1253_v41  ;;  %2399 = vmatmul.msk.f32.vlgmr.msrb.gmra.mxu0 %vm176_vm1, %v1253_v41 }
 0xd93   :  { %1777 = vmatpush.msrb.mxu0 %v3188_v3 }
 0xd95   :  { %1778 = vmatpush.msrb.mxu0 %v3191_v15 }
 0xd97   :  { %1779 = vmatpush.msrb.mxu0 %v3194_v21 }
 0xd99   :  { %1780 = vmatpush.msrb.mxu0 %v3197_v6 }
 0xde0   :  { %v1438_v48 = vpop.permute.xlu1 %1437 }
 0xde1   :  { %2403 = vmatmul.msk.f32.vlgmr.msra.gmra.mxu2 %vm176_vm1, %v1438_v48  ;;  %2406 = vmatmul.msk.f32.vlgmr.msra.gmra.mxu0 %vm176_vm1, %v1438_v48 }
 0xde2   :  { %1819 = vmatpush.msra.mxu2 %v3285_v28  ;;  %1967 = vmatpush.msra.mxu0 %v3354_v61 }
 0xde4   :  { %1820 = vmatpush.msra.mxu2 %v3288_v7  ;;  %1968 = vmatpush.msra.mxu0 %v3356_v39 }
 0xde6   :  { %1821 = vmatpush.msra.mxu2 %v3291_v8  ;;  %1969 = vmatpush.msra.mxu0 %v3360_v45 }
 0xde8   :  { %1822 = vmatpush.msra.mxu2 %v3294_v4  ;;  %1970 = vmatpush.msra.mxu0 %v3364_v26 }
 0xde9   :  { %2409 = vmatmul.msk.f32.vlgmr.msrb.gmra.mxu2 %vm176_vm1, %v1624_v62  ;;  %2413 = vmatmul.msk.f32.vlgmr.msrb.gmra.mxu0 %vm176_vm1, %v1624_v62 }
 0xdea   :  { %2054 = vmatpush.msrb.mxu2 %v3299_v29  ;;  %2153 = vmatpush.msrb.mxu0 %v3271_v22 }
 0xdec   :  { %2055 = vmatpush.msrb.mxu2 %v3302_v37  ;;  %2154 = vmatpush.msrb.mxu0 %v3273_v25 }
 0xdee   :  { %2056 = vmatpush.msrb.mxu2 %v3305_v42  ;;  %2155 = vmatpush.msrb.mxu0 %v3276_v0  ;;  %v3414_v0 = vld [vmem:[%s3572_s5 + $0x2] ss:$0 sm:$0xff] }
 0xdf0   :  { %2057 = vmatpush.msrb.mxu2 %v3308_v43  ;;  %2156 = vmatpush.msrb.mxu0 %v3279_v2 }
 0xe0f   :  { %v1315_v57 = vpop.f32.mrf.mxu0 }
 0xe10   :  { %v1483_v63 = vadd.f32 %v1315_v57, %v3051_v58 }
 0xe12   :  { %1485 = vrot.lane.b32.xlu0 %v1483_v63, %s2780_s30 }
 0xe5e   :  { %v1545_v29 = vpop.f32.mrf.mxu0 }
 0xe5f   :  { %v1669_v22 = vadd.f32 %v1545_v29, %v2979_v60 }
 0xe61   :  { %1671 = vrot.lane.b32.xlu1 %v1669_v22, %s2780_s30 }
 0xe64   :  { %v3408_v37 = vpop.f32.mrf.mxu2 }
 0xe65   :  { %v1461_v25 = vadd.f32 %v3408_v37, %v1315_v57  ;;  %v1870_v57 = vrot.slane %v3345_v32, 6 }
 0xe66   :  { %v1782_v42 = vpop.f32.mrf.mxu0 }
 0xe67   :  { %v1462_v2 = vadd.f32 %v3414_v0, %v1461_v25  ;;  %v1828_v43 = vrot.slane %v1782_v42, 4  ;;  %v1851_v27 = vadd.f32 %v1782_v42, %v2890_v11 }
 0xe69   :  { %v2404_v33 = vmul.f32 -1.442695, %v1462_v2  ;;  %v1830_v12 = vadd.f32 %v1828_v43, %v3071_v56  ;;  %v1853_v13 = vrot.slane %v1851_v27, 4 }
 0xe6b   :  { %2544 = vpow2.f32 %v2404_v33  ;;  %v1831_v10 = vadd.f32 %v3230_v52, %v1830_v12  ;;  %1854 = vrot.lane.b32.xlu2 %v1853_v13, %s2780_s30 }
 0xe6c   :  { %v1644_v42 = vpop.f32.mrf.mxu2 }
 0xe6d   :  { %v2416_v18 = vmul.f32 -1.442695, %v1831_v10  ;;  %v1647_v2 = vadd.f32 %v1644_v42, %v1545_v29 }
 0xe6f   :  { %2546 = vpow2.f32 %v2416_v18  ;;  %v1648_v43 = vadd.f32 %v3328_v23, %v1647_v2 }
 0xe71   :  { %v2545_v17 = vpop.eup %2544  ;;  %v2410_v27 = vmul.f32 -1.442695, %v1648_v43 }
 0xe72   :  { %v1466_v14 = vadd.f32 1.0, %v2545_v17 }
 0xe74   :  { %2548 = vrcp.f32 %v1466_v14  ;;  %v1476_v5 = vand.u32 2147483647, %v1466_v14  ;;  %v1478_v30 = vand.u32 2147483648, %v1466_v14  ;;  %vm1472_vm6 = vweird.f32 %v1466_v14 }
 0xe75   :  { %v2547_v9 = vpop.eup %2546 }
 0xe76   :  { %v1835_v34 = vadd.f32 1.0, %v2547_v9  ;;  %vm1477_vm8 = vcmp.eq.f32.partialorder %v1476_v5, 8.507059e+37  ;;  %v1479_v36 = vor.u32 1.1754944e-38, %v1478_v30  ;;  %v1482_v30 = vadd.f32 %v3408_v37, %v3089_v55 }
 0xe78   :  { %2550 = vrcp.f32 %v1835_v34  ;;  %v1847_v53 = vand.u32 2147483648, %v1835_v34  ;;  %v1845_v44 = vand.u32 2147483647, %v1835_v34  ;;  %vm1841_vm10 = vweird.f32 %v1835_v34 }
 0xe79   :  { %2552 = vpow2.f32 %v2410_v27 }
 0xe7a   :  { %v2549_v49 = vpop.eup %2548  ;;  %v1848_v62 = vor.u32 1.1754944e-38, %v1847_v53  ;;  %vm1846_vm13 = vcmp.eq.f32.partialorder %v1845_v44, 8.507059e+37 }
 0xe7b   :  { %v1468_v20 = vmul.f32 %v2549_v49, %v1466_v14  ;;  %vm1473_vm5 = vweird.f32 %v2549_v49 }
 0xe7c   :  { %vm1474_vm7 = vmor %vm1472_vm6, %vm1473_vm5 }
 0xe7d   :  { %v1469_v1 = vsub.f32 1.0, %v1468_v20 }
 0xe7e   :  { %v2551_v50 = vpop.eup %2550 }
 0xe7f   :  { %v1470_v31 = vmul.f32 %v2549_v49, %v1469_v1  ;;  %v1837_v38 = vmul.f32 %v2551_v50, %v1835_v34  ;;  %vm1842_vm9 = vweird.f32 %v2551_v50  ;;  %v2553_v33 = vpop.eup %2552 }
 0xe80   :  { %vm1843_vm12 = vmor %vm1841_vm10, %vm1842_vm9  ;;  %v1652_v12 = vadd.f32 1.0, %v2553_v33 }
 0xe81   :  { %v1471_v51 = vadd.f32 %v2549_v49, %v1470_v31  ;;  %v1838_v35 = vsub.f32 1.0, %v1837_v38 }
 0xe82   :  { %2554 = vrcp.f32 %v1652_v12  ;;  %v1664_v34 = vand.u32 2147483648, %v1652_v12  ;;  %vm1658_vm15 = vweird.f32 %v1652_v12  ;;  %v1662_v29 = vand.u32 2147483647, %v1652_v12 }
 0xe83   :  { %v1475_v19 = vsel %vm1474_vm7, %v2549_v49, %v1471_v51  ;;  %v1839_v54 = vmul.f32 %v2551_v50, %v1838_v35 }
 0xe84   :  { %v1486_v59 = vpop.permute.xlu0 %1485  ;;  %v1480_v46 = vsel %vm1477_vm8, %v1479_v36, %v1475_v19  ;;  %v1665_v20 = vor.u32 1.1754944e-38, %v1664_v34  ;;  %vm1663_vm2 = vcmp.eq.f32.partialorder %v1662_v29, 8.507059e+37  ;;  %v1668_v19 = vadd.f32 %v1644_v42, %v3004_v47 }
 0xe85   :  { %v1488_v41 = vmul.f32 %v1486_v59, %v1480_v46  ;;  %v1840_v48 = vadd.f32 %v2551_v50, %v1839_v54  ;;  %v1495_v37 = vsub.f32 1.0, %v1480_v46 }
 0xe87   :  { %1490 = vrot.lane.b32.xlu0 %v1488_v41, %s2780_s30  ;;  %v1844_v63 = vsel %vm1843_vm12, %v2551_v50, %v1840_v48  ;;  %v1501_v48 = vmul.f32 %v1480_v46, %v3341_v24 }
 0xe88   :  { %v1849_v22 = vsel %vm1846_vm13, %v1848_v62, %v1844_v63  ;;  %v2555_v13 = vpop.eup %2554 }
 0xe89   :  { %v1872_v25 = vmul.f32 %v1870_v57, %v1849_v22  ;;  %v1654_v10 = vmul.f32 %v2555_v13, %v1652_v12  ;;  %vm1659_vm14 = vweird.f32 %v2555_v13  ;;  %v1864_v63 = vsub.f32 1.0, %v1849_v22 }
 0xe8a   :  { %vm1660_vm0 = vmor %vm1658_vm15, %vm1659_vm14 }
 0xe8b   :  { %v1655_v18 = vsub.f32 1.0, %v1654_v10 }
 0xe8d   :  { %v1656_v14 = vmul.f32 %v2555_v13, %v1655_v18 }
 0xe8f   :  { %v1657_v9 = vadd.f32 %v2555_v13, %v1656_v14 }
 0xe91   :  { %v1661_v49 = vsel %vm1660_vm0, %v2555_v13, %v1657_v9 }
 0xe92   :  { %v1666_v50 = vsel %vm1663_vm2, %v1665_v20, %v1661_v49 }
 0xe93   :  { %v1681_v33 = vsub.f32 1.0, %v1666_v50  ;;  %v1687_v13 = vmul.f32 %v1666_v50, %v3350_v16 }
 0xec5   :  { %v1855_v17 = vpop.permute.xlu2 %1854 }
 0xec6   :  { %v1857_v32 = vmul.f32 %v1855_v17, %v1849_v22 }
 0xec8   :  { %1859 = vrot.lane.b32.xlu2 %v1857_v32, %s2780_s30 }
 0xed3   :  { %v1672_v1 = vpop.permute.xlu1 %1671 }
 0xed4   :  { %v1674_v5 = vmul.f32 %v1672_v1, %v1666_v50 }
 0xed6   :  { %1676 = vrot.lane.b32.xlu1 %v1674_v5, %s2780_s30 }
 0xef9   :  { %v1491_v31 = vpop.permute.xlu0 %1490 }
 0xefa   :  { %v1493_v38 = vadd.f32 %v1491_v31, %v1482_v30 }
 0xefc   :  { %2556 = vtanh.f32 %v1493_v38 }
 0xf02   :  { %v2557_v51 = vpop.eup %2556 }
 0xf03   :  { %1497 = vrot.lane.b32.xlu0 %v2557_v51, %s2781_s0 }
 0xf22   :  { %v1860_v35 = vpop.permute.xlu2 %1859 }
 0xf23   :  { %v1862_v36 = vadd.f32 %v1860_v35, %v3241_v40 }
 0xf25   :  { %2558 = vtanh.f32 %v1862_v36 }
 0xf2b   :  { %v2559_v53 = vpop.eup %2558 }
 0xf2c   :  { %1866 = vrot.lane.b32.xlu2 %v2559_v53, %s2781_s0 }
 0xf48   :  { %v1677_v54 = vpop.permute.xlu1 %1676 }
 0xf49   :  { %v1679_v44 = vadd.f32 %v1677_v54, %v1668_v19 }
 0xf4b   :  { %2560 = vtanh.f32 %v1679_v44 }
 0xf51   :  { %v2561_v59 = vpop.eup %2560 }
 0xf52   :  { %1683 = vrot.lane.b32.xlu1 %v2561_v59, %s2781_s0 }
 0xf75   :  { %v1498_v41 = vpop.permute.xlu0 %1497 }
 0xf76   :  { %v1500_v62 = vmul.f32 %v1498_v41, %v1495_v37 }
 0xf78   :  { %v3434_v57 = vadd.f32 %v1501_v48, %v1500_v62 }
 0xf7a   :  { %1504 = vrot.lane.b32.xlu0 %v3434_v57, %s2781_s0 }
 0xf86   :  { %v1867_v2 = vpop.permute.xlu2 %1866 }
 0xf87   :  { %v1869_v43 = vmul.f32 %v1867_v2, %v1864_v63 }
 0xf89   :  { %v3438_v42 = vadd.f32 %v1872_v25, %v1869_v43 }
 0xf8b   :  { %v1879_v27 = vrot.slane %v3438_v42, 4  ;;  %v2127_v37 = vrot.slane %v3438_v42, 6 }
 0xf8d   :  { %1880 = vrot.lane.b32.xlu2 %v1879_v27, %s2781_s0 }
 0xfc4   :  { %v1684_v12 = vpop.permute.xlu1 %1683 }
 0xfc5   :  { %v1686_v24 = vmul.f32 %v1684_v12, %v1681_v33 }
 0xfc7   :  { %v3443_v46 = vadd.f32 %v1687_v13, %v1686_v24 }
 0xfc9   :  { %1694 = vrot.lane.b32.xlu1 %v3443_v46, %s2781_s0 }
 0xfec   :  { %v1505_v10 = vpop.permute.xlu0 %1504 }
 0xfed   :  { %1507 = vst.msk [vmem:[#allocation2 + $0x3] sm:$0x2] %vm483_vm11, %v1505_v10  ;;  %2407 = vmatmul.msk.f32.vlgmr.msrb.gmra.mxu1 %vm176_vm1, %v1505_v10 }
 0xfee   :  { %2034 = vmatpush.msrb.mxu1 %v3188_v3  ;;  %v1881_v3 = vpop.permute.xlu2 %1880 }
 0xff0   :  { %2035 = vmatpush.msrb.mxu1 %v3191_v15 }
 0xff2   :  { %2036 = vmatpush.msrb.mxu1 %v3194_v21 }
 0xff4   :  { %2037 = vmatpush.msrb.mxu1 %v3197_v6 }
0x103b   :  { %v1695_v16 = vpop.permute.xlu1 %1694 }
0x103c   :  { %2411 = vmatmul.msk.f32.vlgmr.msrb.gmra.mxu3 %vm176_vm1, %v1695_v16  ;;  %2414 = vmatmul.msk.f32.vlgmr.msra.gmra.mxu1 %vm176_vm1, %v1695_v16 }
0x103d   :  { %2076 = vmatpush.msrb.mxu3 %v3285_v28  ;;  %2224 = vmatpush.msra.mxu1 %v3354_v61 }
0x103f   :  { %2077 = vmatpush.msrb.mxu3 %v3288_v7  ;;  %2225 = vmatpush.msra.mxu1 %v3356_v39 }
0x1041   :  { %2078 = vmatpush.msrb.mxu3 %v3291_v8  ;;  %2226 = vmatpush.msra.mxu1 %v3360_v45 }
0x1043   :  { %2079 = vmatpush.msrb.mxu3 %v3294_v4  ;;  %2227 = vmatpush.msra.mxu1 %v3364_v26 }
0x1044   :  { %2417 = vmatmul.msk.f32.vlgmr.msra.gmra.mxu3 %vm176_vm1, %v1881_v3  ;;  %2421 = vmatmul.msk.f32.vlgmr.msrb.gmra.mxu1 %vm176_vm1, %v1881_v3 }
0x106a   :  { %v1567_v15 = vpop.f32.mrf.mxu1 }
0x106b   :  { %v1740_v21 = vadd.f32 %v1567_v15, %v3051_v58 }
0x106d   :  { %1742 = vrot.lane.b32.xlu0 %v1740_v21, %s2780_s30 }
0x10b9   :  { %v1802_v6 = vpop.f32.mrf.mxu1 }
0x10ba   :  { %v1926_v28 = vadd.f32 %v1802_v6, %v2979_v60 }
0x10bc   :  { %1928 = vrot.lane.b32.xlu1 %v1926_v28, %s2780_s30 }
0x10bf   :  { %v3469_v7 = vpop.f32.mrf.mxu3 }
0x10c0   :  { %v1718_v8 = vadd.f32 %v3469_v7, %v1567_v15 }
0x10c1   :  { %v2039_v4 = vpop.f32.mrf.mxu1 }
0x10c2   :  { %v1719_v61 = vadd.f32 %v3414_v0, %v1718_v8  ;;  %v2085_v39 = vrot.slane %v2039_v4, 2  ;;  %v2108_v45 = vadd.f32 %v2039_v4, %v2890_v11 }
0x10c4   :  { %v2412_v26 = vmul.f32 -1.442695, %v1719_v61  ;;  %v2087_v22 = vadd.f32 %v2085_v39, %v3071_v56  ;;  %v2110_v25 = vrot.slane %v2108_v45, 2  ;;  %v1739_v45 = vadd.f32 %v3469_v7, %v3089_v55 }
0x10c6   :  { %2562 = vpow2.f32 %v2412_v26  ;;  %v2088_v18 = vadd.f32 %v3230_v52, %v2087_v22  ;;  %2111 = vrot.lane.b32.xlu2 %v2110_v25, %s2780_s30 }
0x10c7   :  { %v1901_v63 = vpop.f32.mrf.mxu3 }
0x10c8   :  { %v2424_v17 = vmul.f32 -1.442695, %v2088_v18  ;;  %v1904_v2 = vadd.f32 %v1901_v63, %v1802_v6 }
0x10ca   :  { %2564 = vpow2.f32 %v2424_v17  ;;  %v1905_v43 = vadd.f32 %v3328_v23, %v1904_v2 }
0x10cc   :  { %v2563_v32 = vpop.eup %2562  ;;  %v2418_v27 = vmul.f32 -1.442695, %v1905_v43 }
0x10cd   :  { %v1723_v14 = vadd.f32 1.0, %v2563_v32 }
0x10cf   :  { %2566 = vrcp.f32 %v1723_v14  ;;  %v1733_v1 = vand.u32 2147483647, %v1723_v14  ;;  %v1735_v56 = vand.u32 2147483648, %v1723_v14  ;;  %vm1729_vm4 = vweird.f32 %v1723_v14 }
0x10d0   :  { %v2565_v9 = vpop.eup %2564 }
0x10d1   :  { %v2092_v34 = vadd.f32 1.0, %v2565_v9  ;;  %vm1734_vm6 = vcmp.eq.f32.partialorder %v1733_v1, 8.507059e+37  ;;  %v1736_v31 = vor.u32 1.1754944e-38, %v1735_v56 }
0x10d3   :  { %2568 = vrcp.f32 %v2092_v34  ;;  %v2104_v38 = vand.u32 2147483648, %v2092_v34  ;;  %v2102_v36 = vand.u32 2147483647, %v2092_v34  ;;  %vm2098_vm8 = vweird.f32 %v2092_v34 }
0x10d4   :  { %2570 = vpow2.f32 %v2418_v27 }
0x10d5   :  { %v2567_v29 = vpop.eup %2566  ;;  %v2105_v59 = vor.u32 1.1754944e-38, %v2104_v38  ;;  %vm2103_vm10 = vcmp.eq.f32.partialorder %v2102_v36, 8.507059e+37 }
0x10d6   :  { %v1725_v49 = vmul.f32 %v2567_v29, %v1723_v14  ;;  %vm1730_vm3 = vweird.f32 %v2567_v29  ;;  %v1925_v14 = vadd.f32 %v1901_v63, %v3004_v47 }
0x10d7   :  { %vm1731_vm5 = vmor %vm1729_vm4, %vm1730_vm3 }
0x10d8   :  { %v1726_v11 = vsub.f32 1.0, %v1725_v49 }
0x10d9   :  { %v2569_v20 = vpop.eup %2568 }
0x10da   :  { %v1727_v50 = vmul.f32 %v2567_v29, %v1726_v11  ;;  %v2094_v5 = vmul.f32 %v2569_v20, %v2092_v34  ;;  %vm2099_vm7 = vweird.f32 %v2569_v20  ;;  %v2571_v33 = vpop.eup %2570 }
0x10db   :  { %vm2100_vm9 = vmor %vm2098_vm8, %vm2099_vm7  ;;  %v1909_v12 = vadd.f32 1.0, %v2571_v33 }
0x10dc   :  { %v1728_v52 = vadd.f32 %v2567_v29, %v1727_v50  ;;  %v2095_v30 = vsub.f32 1.0, %v2094_v5 }
0x10dd   :  { %2572 = vrcp.f32 %v1909_v12  ;;  %v1921_v21 = vand.u32 2147483648, %v1909_v12  ;;  %vm1915_vm13 = vweird.f32 %v1909_v12  ;;  %v1919_v6 = vand.u32 2147483647, %v1909_v12 }
0x10de   :  { %v1732_v51 = vsel %vm1731_vm5, %v2567_v29, %v1728_v52  ;;  %v2096_v35 = vmul.f32 %v2569_v20, %v2095_v30 }
0x10df   :  { %v1743_v53 = vpop.permute.xlu0 %1742  ;;  %v1737_v19 = vsel %vm1734_vm6, %v1736_v31, %v1732_v51  ;;  %v1922_v8 = vor.u32 1.1754944e-38, %v1921_v21  ;;  %vm1920_vm15 = vcmp.eq.f32.partialorder %v1919_v6, 8.507059e+37 }
0x10e0   :  { %v1745_v54 = vmul.f32 %v1743_v53, %v1737_v19  ;;  %v2097_v44 = vadd.f32 %v2569_v20, %v2096_v35  ;;  %v1752_v7 = vsub.f32 1.0, %v1737_v19  ;;  %v1758_v11 = vmul.f32 %v1737_v19, %v3434_v57 }
0x10e2   :  { %1747 = vrot.lane.b32.xlu0 %v1745_v54, %s2780_s30  ;;  %v2101_v41 = vsel %vm2100_vm9, %v2569_v20, %v2097_v44  ;;  %vm2286_vm9 = vcmask 254976  }
0x10e3   :  { %v2106_v48 = vsel %vm2103_vm10, %v2105_v59, %v2101_v41  ;;  %v2573_v13 = vpop.eup %2572 }
0x10e4   :  { %v2129_v62 = vmul.f32 %v2127_v37, %v2106_v48  ;;  %v1911_v24 = vmul.f32 %v2573_v13, %v1909_v12  ;;  %vm1916_vm12 = vweird.f32 %v2573_v13 }
0x10e5   :  { %vm1917_vm14 = vmor %vm1915_vm13, %vm1916_vm12 }
0x10e6   :  { %v1912_v10 = vsub.f32 1.0, %v1911_v24 }
0x10e8   :  { %v1913_v3 = vmul.f32 %v2573_v13, %v1912_v10 }
0x10ea   :  { %v1914_v15 = vadd.f32 %v2573_v13, %v1913_v3 }
0x10ec   :  { %v1918_v28 = vsel %vm1917_vm14, %v2573_v13, %v1914_v15 }
0x10ed   :  { %v1923_v61 = vsel %vm1920_vm15, %v1922_v8, %v1918_v28  ;;  %vm2282_vm15 = vcmask 261126  }
0x10ee   :  { %v1938_v30 = vsub.f32 1.0, %v1923_v61  ;;  %v1944_v38 = vmul.f32 %v1923_v61, %v3443_v46 }
0x1120   :  { %v2112_v16 = vpop.permute.xlu2 %2111 }
0x1121   :  { %v2114_v42 = vmul.f32 %v2112_v16, %v2106_v48 }
0x1123   :  { %2116 = vrot.lane.b32.xlu2 %v2114_v42, %s2780_s30 }
0x112e   :  { %v1929_v4 = vpop.permute.xlu1 %1928 }
0x112f   :  { %v1931_v39 = vmul.f32 %v1929_v4, %v1923_v61 }
0x1131   :  { %1933 = vrot.lane.b32.xlu1 %v1931_v39, %s2780_s30 }
0x1154   :  { %v1748_v26 = vpop.permute.xlu0 %1747 }
0x1155   :  { %v1750_v22 = vadd.f32 %v1748_v26, %v1739_v45 }
0x1157   :  { %2574 = vtanh.f32 %v1750_v22 }
0x115d   :  { %v2575_v25 = vpop.eup %2574 }
0x115e   :  { %1754 = vrot.lane.b32.xlu0 %v2575_v25, %s2781_s0 }
0x117d   :  { %v2117_v18 = vpop.permute.xlu2 %2116 }
0x117e   :  { %v2119_v17 = vadd.f32 %v2117_v18, %v3241_v40  ;;  %v2121_v40 = vsub.f32 1.0, %v2106_v48 }
0x1180   :  { %2576 = vtanh.f32 %v2119_v17 }
0x1186   :  { %v2577_v32 = vpop.eup %2576 }
0x1187   :  { %2123 = vrot.lane.b32.xlu2 %v2577_v32, %s2781_s0 }
0x11a3   :  { %v1934_v9 = vpop.permute.xlu1 %1933 }
0x11a4   :  { %v1936_v34 = vadd.f32 %v1934_v9, %v1925_v14 }
0x11a6   :  { %2578 = vtanh.f32 %v1936_v34 }
0x11ac   :  { %v2579_v29 = vpop.eup %2578 }
0x11ad   :  { %1940 = vrot.lane.b32.xlu1 %v2579_v29, %s2781_s0 }
0x11d0   :  { %v1755_v49 = vpop.permute.xlu0 %1754 }
0x11d1   :  { %v1757_v20 = vmul.f32 %v1755_v49, %v1752_v7 }
0x11d3   :  { %v3490_v1 = vadd.f32 %v1758_v11, %v1757_v20 }
0x11d5   :  { %1761 = vrot.lane.b32.xlu0 %v3490_v1, %s2781_s0 }
0x11e1   :  { %v2124_v56 = vpop.permute.xlu2 %2123 }
0x11e2   :  { %v2126_v50 = vmul.f32 %v2124_v56, %v2121_v40 }
0x11e4   :  { %v3494_v5 = vadd.f32 %v2129_v62, %v2126_v50 }
0x11e6   :  { %v2136_v52 = vrot.slane %v3494_v5, 6 }
0x11e8   :  { %2137 = vrot.lane.b32.xlu2 %v2136_v52, %s2781_s0 }
0x121f   :  { %v1941_v31 = vpop.permute.xlu1 %1940 }
0x1220   :  { %v1943_v57 = vmul.f32 %v1941_v31, %v1938_v30 }
0x1222   :  { %v3499_v51 = vadd.f32 %v1944_v38, %v1943_v57 }
0x1224   :  { %1951 = vrot.lane.b32.xlu1 %v3499_v51, %s2781_s0 }
0x1242   :  { %v2138_v53 = vpop.permute.xlu2 %2137 }
0x1247   :  { %v1762_v35 = vpop.permute.xlu0 %1761 }
0x1248   :  { %1764 = vst.msk [vmem:[#allocation2 + $0x4] sm:$0x2] %vm483_vm11, %v1762_v35  ;;  %2415 = vmatmul.msk.f32.vlgmr.msra.gmra.mxu2 %vm176_vm1, %v1762_v35 }
0x1296   :  { %v1952_v36 = vpop.permute.xlu1 %1951 }
0x1297   :  { %2419 = vmatmul.msk.f32.vlgmr.msra.gmra.mxu0 %vm176_vm1, %v1952_v36  ;;  %2422 = vmatmul.msk.f32.vlgmr.msrb.gmra.mxu2 %vm176_vm1, %v1952_v36 }
0x129f   :  { %2425 = vmatmul.msk.f32.vlgmr.msrb.gmra.mxu0 %vm176_vm1, %v2138_v53 }
0x12cb   :  { %v1824_v46 = vpop.f32.mrf.mxu2 }
0x12cc   :  { %v1997_v19 = vadd.f32 %v1824_v46, %v3051_v58 }
0x12ce   :  { %1999 = vrot.lane.b32.xlu0 %v1997_v19, %s2780_s30 }
0x1314   :  { %v1972_v54 = vpop.f32.mrf.mxu0 }
0x1315   :  { %v1975_v44 = vadd.f32 %v1972_v54, %v1824_v46  ;;  %v1996_v34 = vadd.f32 %v1972_v54, %v3089_v55 }
0x1317   :  { %v1976_v59 = vadd.f32 %v3414_v0, %v1975_v44 }
0x1319   :  { %v2420_v37 = vmul.f32 -1.442695, %v1976_v59 }
0x131a   :  { %v2059_v41 = vpop.f32.mrf.mxu2 }
0x131b   :  { %2580 = vpow2.f32 %v2420_v37  ;;  %v2183_v48 = vadd.f32 %v2059_v41, %v2979_v60 }
0x131c   :  { %v2158_v15 = vpop.f32.mrf.mxu0 }
0x131d   :  { %2185 = vrot.lane.b32.xlu1 %v2183_v48, %s2780_s30  ;;  %v2161_v21 = vadd.f32 %v2158_v15, %v2059_v41  ;;  %v2182_v11 = vadd.f32 %v2158_v15, %v3004_v47 }
0x131f   :  { %v2162_v6 = vadd.f32 %v3328_v23, %v2161_v21 }
0x1321   :  { %v2581_v62 = vpop.eup %2580  ;;  %v2426_v28 = vmul.f32 -1.442695, %v2162_v6 }
0x1322   :  { %v1980_v63 = vadd.f32 1.0, %v2581_v62 }
0x1324   :  { %2582 = vrcp.f32 %v1980_v63  ;;  %v1992_v13 = vand.u32 2147483648, %v1980_v63  ;;  %vm1986_vm2 = vweird.f32 %v1980_v63  ;;  %v1990_v24 = vand.u32 2147483647, %v1980_v63 }
0x1325   :  { %2584 = vpow2.f32 %v2426_v28 }
0x1326   :  { %v1993_v16 = vor.u32 1.1754944e-38, %v1992_v13  ;;  %vm1991_vm4 = vcmp.eq.f32.partialorder %v1990_v24, 8.507059e+37 }
0x132a   :  { %v2583_v2 = vpop.eup %2582 }
0x132b   :  { %v1982_v43 = vmul.f32 %v2583_v2, %v1980_v63  ;;  %vm1987_vm0 = vweird.f32 %v2583_v2  ;;  %v2585_v8 = vpop.eup %2584 }
0x132c   :  { %vm1988_vm3 = vmor %vm1986_vm2, %vm1987_vm0  ;;  %v2166_v4 = vadd.f32 1.0, %v2585_v8  ;;  %vm2323_vm0 = vcmask 23552  }
0x132d   :  { %v1983_v27 = vsub.f32 1.0, %v1982_v43 }
0x132e   :  { %2586 = vrcp.f32 %v2166_v4  ;;  %v2178_v25 = vand.u32 2147483648, %v2166_v4  ;;  %vm2172_vm6 = vweird.f32 %v2166_v4  ;;  %v2176_v18 = vand.u32 2147483647, %v2166_v4 }
0x132f   :  { %v1984_v33 = vmul.f32 %v2583_v2, %v1983_v27 }
0x1330   :  { %v2179_v32 = vor.u32 1.1754944e-38, %v2178_v25  ;;  %vm2177_vm8 = vcmp.eq.f32.partialorder %v2176_v18, 8.507059e+37  ;;  %v2453_v25 = vld [vmem:[%s3576_s9] ss:$0 sm:$0xff]  ;;  %s2346_s9 = sshll.u32 %s3578_s11, 4  ;;  %s2347_s9 = int_to_ptr.hbm [resolvable:$true] %s2346_s9 }
0x1331   :  { %v1985_v12 = vadd.f32 %v2583_v2, %v1984_v33 }
0x1333   :  { %v1989_v10 = vsel %vm1988_vm3, %v2583_v2, %v1985_v12 }
0x1334   :  { %v1994_v60 = vsel %vm1991_vm4, %v1993_v16, %v1989_v10  ;;  %v2587_v61 = vpop.eup %2586 }
0x1335   :  { %v2168_v39 = vmul.f32 %v2587_v61, %v2166_v4  ;;  %vm2173_vm5 = vweird.f32 %v2587_v61  ;;  %v2009_v50 = vsub.f32 1.0, %v1994_v60  ;;  %v2015_v30 = vmul.f32 %v1994_v60, %v3490_v1  ;;  %v2294_v4 = vld [vmem:[%s3575_s8 + $0x10] sm:$0xff] }
0x1336   :  { %vm2174_vm7 = vmor %vm2172_vm6, %vm2173_vm5 }
0x1337   :  { %v2169_v45 = vsub.f32 1.0, %v2168_v39  ;;  %v2292_v39 = vld [vmem:[%s3575_s8] sm:$0xff] }
0x1339   :  { %v2170_v26 = vmul.f32 %v2587_v61, %v2169_v45 }
0x133b   :  { %v2171_v22 = vadd.f32 %v2587_v61, %v2170_v26 }
0x133d   :  { %v2175_v17 = vsel %vm2174_vm7, %v2587_v61, %v2171_v22  ;;  %v2293_v61 = vld [vmem:[%s3575_s8 + $0x8] sm:$0xff] }
0x133e   :  { %v2180_v23 = vsel %vm2177_vm8, %v2179_v32, %v2175_v17 }
0x133f   :  { %v2195_v57 = vsub.f32 1.0, %v2180_v23  ;;  %v2201_v36 = vmul.f32 %v2180_v23, %v3499_v51 }
0x1340   :  { %v2000_v42 = vpop.permute.xlu0 %1999 }
0x1341   :  { %v2002_v3 = vmul.f32 %v2000_v42, %v1994_v60 }
0x1343   :  { %2004 = vrot.lane.b32.xlu2 %v2002_v3, %s2780_s30 }
0x138f   :  { %v2186_v14 = vpop.permute.xlu1 %2185 }
0x1390   :  { %v2188_v9 = vmul.f32 %v2186_v14, %v2180_v23 }
0x1392   :  { %2190 = vrot.lane.b32.xlu0 %v2188_v9, %s2780_s30 }
0x139d   :  { %v2005_v29 = vpop.permute.xlu2 %2004 }
0x139e   :  { %v2007_v7 = vadd.f32 %v2005_v29, %v1996_v34 }
0x13a0   :  { %2588 = vtanh.f32 %v2007_v7 }
0x13a6   :  { %v2589_v49 = vpop.eup %2588 }
0x13a7   :  { %2011 = vrot.lane.b32.xlu1 %v2589_v49, %s2781_s0 }
0x1404   :  { %v2191_v20 = vpop.permute.xlu0 %2190 }
0x1405   :  { %v2193_v40 = vadd.f32 %v2191_v20, %v2182_v11 }
0x1407   :  { %2590 = vtanh.f32 %v2193_v40 }
0x140d   :  { %v2591_v56 = vpop.eup %2590 }
0x140e   :  { %2197 = vrot.lane.b32.xlu2 %v2591_v56, %s2781_s0 }
0x1419   :  { %v2012_v52 = vpop.permute.xlu1 %2011 }
0x141a   :  { %v2014_v31 = vmul.f32 %v2012_v52, %v2009_v50 }
0x141c   :  { %v2016_v38 = vadd.f32 %v2015_v30, %v2014_v31 }
0x141e   :  { %2018 = vrot.lane.b32.xlu0 %v2016_v38, %s2781_s0 }
0x1468   :  { %v2198_v35 = vpop.permute.xlu2 %2197 }
0x1469   :  { %v2200_v53 = vmul.f32 %v2198_v35, %v2195_v57 }
0x146b   :  { %v2202_v47 = vadd.f32 %v2201_v36, %v2200_v53 }
0x146d   :  { %2208 = vrot.lane.b32.xlu1 %v2202_v47, %s2781_s0 }
0x1490   :  { %v2019_v46 = vpop.permute.xlu0 %2018 }
0x1491   :  { %2021 = vst.msk [vmem:[#allocation2 + $0x5] sm:$0x2] %vm483_vm11, %v2019_v46  ;;  %2423 = vmatmul.msk.f32.vlgmr.msrb.gmra.mxu3 %vm176_vm1, %v2019_v46 }
0x14df   :  { %v2209_v19 = vpop.permute.xlu1 %2208 }
0x14e0   :  { %2287 = vst.msk [vmem:[#allocation12 + $0x2] sm:$0x3] %vm2286_vm9, %v2209_v19  ;;  %2427 = vmatmul.msk.f32.vlgmr.msra.gmra.mxu1 %vm176_vm1, %v2209_v19 }
0x1514   :  { %v2081_v1 = vpop.f32.mrf.mxu3 }
0x1515   :  { %v2254_v54 = vadd.f32 %v2081_v1, %v3051_v58 }
0x1517   :  { %2256 = vrot.lane.b32.xlu2 %v2254_v54, %s2780_s30 }
0x155d   :  { %v2229_v51 = vpop.f32.mrf.mxu1 }
0x155e   :  { %v2232_v44 = vadd.f32 %v2229_v51, %v2081_v1  ;;  %v2253_v16 = vadd.f32 %v2229_v51, %v3089_v55  ;;  %v2295_v55 = vld [vmem:[%s3575_s8 + $0x18] sm:$0xff]  ;;  %s2782_s8 = smov [#allocation12]  }
0x155f   :  { %2315 = vmatpush.msra.mxu2 %v2295_v55  ;;  %s2344_s2 = sshll.u32 %s2782_s8, 4  ;;  %s2345_s2 = int_to_ptr.vmem [resolvable:$true] %s2344_s2 }
0x1560   :  { %v2233_v59 = vadd.f32 %v3414_v0, %v2232_v44 }
0x1561   :  { %2316 = vmatpush.msra.mxu2 %v2294_v4 }
0x1562   :  { %v2428_v37 = vmul.f32 -1.442695, %v2233_v59 }
0x1563   :  { %2317 = vmatpush.msra.mxu2 %v2293_v61 }
0x1564   :  { %2592 = vpow2.f32 %v2428_v37 }
0x1565   :  { %2318 = vmatpush.msra.mxu2 %v2292_v39 }
0x156a   :  { %v2593_v41 = vpop.eup %2592 }
0x156b   :  { %v2237_v48 = vadd.f32 1.0, %v2593_v41 }
0x156d   :  { %2594 = vrcp.f32 %v2237_v48  ;;  %v2249_v43 = vand.u32 2147483648, %v2237_v48  ;;  %v2247_v33 = vand.u32 2147483647, %v2237_v48  ;;  %vm2243_vm12 = vweird.f32 %v2237_v48 }
0x156f   :  { %v2250_v58 = vor.u32 1.1754944e-38, %v2249_v43  ;;  %vm2248_vm14 = vcmp.eq.f32.partialorder %v2247_v33, 8.507059e+37 }
0x1571   :  { %v2257_v0 = vpop.permute.xlu2 %2256 }
0x1573   :  { %v2595_v62 = vpop.eup %2594 }
0x1574   :  { %v2239_v63 = vmul.f32 %v2595_v62, %v2237_v48  ;;  %vm2244_vm10 = vweird.f32 %v2595_v62 }
0x1575   :  { %vm2245_vm13 = vmor %vm2243_vm12, %vm2244_vm10 }
0x1576   :  { %v2240_v2 = vsub.f32 1.0, %v2239_v63 }
0x1578   :  { %v2241_v27 = vmul.f32 %v2595_v62, %v2240_v2 }
0x157a   :  { %v2242_v12 = vadd.f32 %v2595_v62, %v2241_v27 }
0x157c   :  { %v2246_v13 = vsel %vm2245_vm13, %v2595_v62, %v2242_v12 }
0x157d   :  { %v2251_v24 = vsel %vm2248_vm14, %v2250_v58, %v2246_v13 }
0x157e   :  { %v2259_v10 = vmul.f32 %v2257_v0, %v2251_v24  ;;  %v2266_v15 = vsub.f32 1.0, %v2251_v24  ;;  %v2272_v6 = vmul.f32 %v2251_v24, %v2016_v38 }
0x1580   :  { %2261 = vrot.lane.b32.xlu0 %v2259_v10, %s2780_s30 }
0x15f2   :  { %v2262_v42 = vpop.permute.xlu0 %2261 }
0x15f3   :  { %v2264_v60 = vadd.f32 %v2262_v42, %v2253_v16 }
0x15f5   :  { %2596 = vtanh.f32 %v2264_v60 }
0x15fb   :  { %v2597_v3 = vpop.eup %2596 }
0x15fc   :  { %2268 = vrot.lane.b32.xlu1 %v2597_v3, %s2781_s0 }
0x166e   :  { %v2269_v21 = vpop.permute.xlu1 %2268 }
0x166f   :  { %v2271_v28 = vmul.f32 %v2269_v21, %v2266_v15 }
0x1671   :  { %v2273_v8 = vadd.f32 %v2272_v6, %v2271_v28 }
0x1673   :  { %2275 = vrot.lane.b32.xlu2 %v2273_v8, %s2781_s0 }
0x167b   :  { %2279 = vrot.lane.b32.xlu2 %v3494_v5, %s2781_s0 }
0x16cd   :  { %v2276_v5 = vpop.permute.xlu2 %2275 }
0x16ce   :  { %2278 = vst.msk [vmem:[#allocation2 + $0x6] sm:$0x2] %vm483_vm11, %v2276_v5 }
0x16cf   :  { %2289 = vst.msk [vmem:[#allocation12 + $0x4] sm:$0x3] %vm2286_vm9, %v2276_v5 }
0x16d5   :  { %v2280_v45 = vpop.permute.xlu2 %2279  ;;  %v2290_v26 = vld [vmem:[#allocation2] sm:$0xff] }
0x16d6   :  { %2283 = vst.msk [vmem:[#allocation12 - $0x6] sm:$0xc0] %vm2282_vm15, %v2280_v45  ;;  %v2291_v22 = vmax.f32 %v2290_v26, 0.0 }
0x16d7   :  { %2352 = dma.vmem_to_hbm [thread:$0]  %s2345_s2, 96, %s2347_s9, [#allocation5], %s2776_s18, %s2776_s18, %s2777_s19  }
0x16d8   :  { %2429 = vmatmul.msk.f32.vlgmr.msra.gmra.mxu2 %vm176_vm1, %v2291_v22 }
0x175b   :  { %v2320_v18 = vpop.f32.mrf.mxu2 }
0x175c   :  { %v2321_v17 = vadd.f32 %v2453_v25, %v2320_v18 }
0x175e   :  { %v2324_v32 = vsel %vm2323_vm0, %v2321_v17, -inf }
0x175f   :  { %2325 = vmax.xlane.f32.xlu0 %v2324_v32 }
0x17d2   :  { %v2326_v14 = vpop.xlane.xlu0 %2325 }
0x17d3   :  { %v2327_v23 = vsub.f32 %v2321_v17, %v2326_v14 }
0x17d5   :  { %v2328_v9 = vmul.f32 1.442695, %v2327_v23 }
0x17d7   :  { %2598 = vpow2.f32 %v2328_v9 }
0x17dd   :  { %v2599_v34 = vpop.eup %2598 }
0x17de   :  { %v2330_v29 = vsel %vm2323_vm0, %v2599_v34, 0.0 }
0x17df   :  { %2331 = vadd.xlane.f32.xlu1 %v2330_v29 }
0x1852   :  { %v2332_v7 = vpop.xlane.xlu1 %2331 }
0x1853   :  { %2600 = vlog2.f32 %v2332_v7 }
0x1859   :  { %v2601_v49 = vpop.eup %2600 }
0x185a   :  { %v2334_v11 = vmul.f32 0.6931472, %v2601_v49 }
0x185c   :  { %v2335_v20 = vadd.f32 %v2334_v11, %v2326_v14 }
0x185e   :  { %v2336_v40 = vsub.f32 %v2321_v17, %v2335_v20 }
0x1860   :  { %2337 = vst.msk [vmem:[%s3577_s10] sm:$0xff] %vm2323_vm0, %v2336_v40 }
0x1861   :  { %2767 = dma.done.wait [#allocation5], 96  }
0x1862   :  { %2768 = vsyncadd [#allocation5], 4294967200 }
0x1863   :  { %2359 = vsyncpa [#allocation4], 1 }
0x1864   :  { %2360 = vsyncpa [#allocation7], 1 }
0x1865   :  { %2361 = vsyncpa [#allocation10], 1 }
0x1866   :  { %2362 = vsyncpa [#allocation5], 1 }

</bundles_post_ra>
